<compile_context>
chip_gen: v7x
topology: tpu7x:2x2x1
jax: 0.10.0
libtpu: 0.0.40
codegen_flags: <defaults>
</compile_context>

<pallas_src>
import jax
import jax.numpy as jnp
from jax.experimental import pallas as pl
from jax.experimental.pallas import tpu as pltpu

D1 = 363 - 4        # 359
D2 = 2907 - 4       # 2903
D3 = 3076 - 4       # 3072
D_IN = D1 + D2 + D3  # 6334


def _round_up(n, m):
    return ((n + m - 1) // m) * m


D1P = _round_up(D1, 128)   # 384
D2P = _round_up(D2, 128)   # 2944
D3P = _round_up(D3, 128)   # 3072

H1, H2, NCLS = 256, 128, 2
EPS = 1e-5
NEG_SLOPE = 0.01

# Working set: w1 blocks ~3.3 MB bf16 + w2 64 KB + activations ~51 KB + tiny
# params/outputs.  32 MiB request leaves ample headroom on every generation
# (v7x physical VMEM is 64 MiB/TC).
VMEM_LIMIT_BYTES = 32 * 1024 * 1024


def _bn_leaky(x, gamma, beta):
    """BatchNorm1d (training-mode batch stats, biased var) + LeakyReLU(0.01).

    gamma/beta are folded into one scale/shift pair so only two broadcast
    VPU ops touch the (B, F) tensor.
    """
    mean = jnp.mean(x, axis=0, keepdims=True)
    var = jnp.mean(jnp.square(x - mean), axis=0, keepdims=True)
    scale = gamma * jax.lax.rsqrt(var + EPS)
    shift = beta - mean * scale
    y = x * scale + shift
    return jnp.where(y > 0, y, NEG_SLOPE * y)


def fcn_kernel(f1_ref, f2_ref, f3_ref,
               w1a_ref, w1b_ref, w1c_ref, g1_ref, be1_ref,
               w2_ref, g2_ref, be2_ref,
               w3_ref, b3_ref,
               out_ref, feat_ref):
    # Layer 1 as three aligned block matmuls (bf16 in, f32 MXU accumulation).
    # All K extents (384 / 2944 / 3072) are multiples of 128; no dynamic
    # slices, no relayouts, no scratch copies.
    acc = jnp.dot(f1_ref[...], w1a_ref[...], preferred_element_type=jnp.float32)
    acc = acc + jnp.dot(f2_ref[...], w1b_ref[...], preferred_element_type=jnp.float32)
    acc = acc + jnp.dot(f3_ref[...], w1c_ref[...], preferred_element_type=jnp.float32)

    # Hidden-layer Linear biases omitted: the training-mode BatchNorm right
    # after each Linear subtracts the batch mean, cancelling a constant bias.
    h1 = _bn_leaky(acc, g1_ref[...], be1_ref[...])

    h2 = jnp.dot(h1.astype(jnp.bfloat16), w2_ref[...],
                 preferred_element_type=jnp.float32)
    feat = _bn_leaky(h2, g2_ref[...], be2_ref[...])
    feat_ref[...] = feat

    # Classifier (keeps its bias; no BN afterwards) + softmax in f32.
    logits = jnp.dot(feat, w3_ref[...],
                     preferred_element_type=jnp.float32) + b3_ref[...]
    m = jnp.max(logits, axis=1, keepdims=True)
    e = jnp.exp(logits - m)
    out_ref[...] = e / jnp.sum(e, axis=1, keepdims=True)


# ------------------------------ param prep -------------------------------- #

def init_params(key):
    """PyTorch-style init (weights stored transposed: (fan_in, fan_out))."""
    k1, k2, k3 = jax.random.split(key, 3)

    def linear(k, fan_in, fan_out):
        lim = 1.0 / float(fan_in) ** 0.5
        kw, kb = jax.random.split(k)
        w = jax.random.uniform(kw, (fan_in, fan_out), jnp.float32, -lim, lim)
        b = jax.random.uniform(kb, (1, fan_out), jnp.float32, -lim, lim)
        return w, b

    w1, b1 = linear(k1, D_IN, H1)
    w2, b2 = linear(k2, H1, H2)
    w3, b3 = linear(k3, H2, NCLS)
    # BatchNorm1d affine params (module init: weight=1, bias=0)
    g1, be1 = jnp.ones((1, H1), jnp.float32), jnp.zeros((1, H1), jnp.float32)
    g2, be2 = jnp.ones((1, H2), jnp.float32), jnp.zeros((1, H2), jnp.float32)
    return (w1, b1, g1, be1, w2, b2, g2, be2, w3, b3)


def prepare_params(raw):
    """One-time weight prep: split w1 into the three input blocks, zero-pad
    each to a multiple of 128 rows (padded rows multiply zero-padded lanes,
    so they contribute nothing), cast matmul weights to bf16.  Hidden-layer
    biases b1/b2 are dropped (exactly cancelled by training-mode BatchNorm).
    """
    w1, _b1, g1, be1, w2, _b2, g2, be2, w3, b3 = raw
    w1a = jnp.pad(w1[:D1], ((0, D1P - D1), (0, 0))).astype(jnp.bfloat16)
    w1b = jnp.pad(w1[D1:D1 + D2], ((0, D2P - D2), (0, 0))).astype(jnp.bfloat16)
    w1c = jnp.pad(w1[D1 + D2:], ((0, D3P - D3), (0, 0))).astype(jnp.bfloat16)
    return (w1a, w1b, w1c, g1, be1, w2.astype(jnp.bfloat16), g2, be2, w3, b3)


def prepare_inputs(f1, f2, f3):
    """One-time activation prep (done alongside prepare_params, off the hot
    path): zero-pad lanes to multiples of 128 and cast to bf16."""
    def prep(x, width):
        return jnp.pad(x, ((0, 0), (0, width - x.shape[1]))).astype(jnp.bfloat16)
    return prep(f1, D1P), prep(f2, D2P), prep(f3, D3P)


# -------------------------------- wrapper ---------------------------------- #

def fcn_methylation(f1p, f2p, f3p, kparams):
    w1a, w1b, w1c, g1, be1, w2, g2, be2, w3, b3 = kparams
    B = f1p.shape[0]

    def vmem():
        return pl.BlockSpec(memory_space=pltpu.MemorySpace.VMEM)

    out, feat = pl.pallas_call(
        fcn_kernel,
        out_shape=(jax.ShapeDtypeStruct((B, NCLS), jnp.float32),
                   jax.ShapeDtypeStruct((B, H2), jnp.float32)),
        in_specs=[vmem() for _ in range(13)],
        out_specs=(vmem(), vmem()),
        compiler_params=pltpu.CompilerParams(
            vmem_limit_bytes=VMEM_LIMIT_BYTES),
    )(f1p, f2p, f3p, w1a, w1b, w1c, g1, be1, w2, g2, be2, w3, b3)
    return out, feat


# ----------------------------- f32 reference ------------------------------ #

def _bn_ref(x, g, b):
    mean = jnp.mean(x, axis=0, keepdims=True)
    var = jnp.mean(jnp.square(x - mean), axis=0, keepdims=True)
    return (x - mean) * jax.lax.rsqrt(var + EPS) * g + b


def _leaky_ref(x):
    return jnp.where(x > 0, x, NEG_SLOPE * x)


def fcn_reference(f1, f2, f3, raw):
    w1, b1, g1, be1, w2, b2, g2, be2, w3, b3 = raw
    x = jnp.concatenate([f1, f2, f3], axis=1)
    h = _leaky_ref(_bn_ref(x @ w1 + b1, g1, be1))
    feat = _leaky_ref(_bn_ref(h @ w2 + b2, g2, be2))
    logits = feat @ w3 + b3
    return jax.nn.softmax(logits, axis=1), feat


if __name__ == "__main__":
    key = jax.random.PRNGKey(0)
    kp, k1, k2, k3 = jax.random.split(key, 4)

    B = 4  # BatchNorm in training mode needs batch > 1
    f1 = jax.random.normal(k1, (B, D1), jnp.float32)
    f2 = jax.random.normal(k2, (B, D2), jnp.float32)
    f3 = jax.random.normal(k3, (B, D3), jnp.float32)

    raw = init_params(kp)
    kparams = prepare_params(raw)
    f1p, f2p, f3p = prepare_inputs(f1, f2, f3)

    out, feat = fcn_methylation(f1p, f2p, f3p, kparams)
    jax.block_until_ready((out, feat))

    assert out.shape == (B, NCLS) and feat.shape == (B, H2)
    # softmax rows sum to ~1 (computed in f32 with exact division)
    assert jnp.allclose(jnp.sum(out, axis=1), 1.0, atol=1e-5)

    # Loose fidelity check vs. an f32 reference (kernel uses bf16 weights /
    # activations with f32 accumulation, so small deviations are expected).
    out_r, feat_r = fcn_reference(f1, f2, f3, raw)
    assert float(jnp.max(jnp.abs(out - out_r))) < 5e-2
    assert float(jnp.mean(jnp.abs(feat - feat_r))) < 2e-2

    print("KERNEL_OK")
</pallas_src>

<mosaic_0001>
module attributes {stable_mosaic.version = 11 : i64} {
  func.func @fcn_kernel(%arg0: memref<4x384xbf16, #tpu.memory_space<vmem>>, %arg1: memref<4x2944xbf16, #tpu.memory_space<vmem>>, %arg2: memref<4x3072xbf16, #tpu.memory_space<vmem>>, %arg3: memref<384x256xbf16, #tpu.memory_space<vmem>>, %arg4: memref<2944x256xbf16, #tpu.memory_space<vmem>>, %arg5: memref<3072x256xbf16, #tpu.memory_space<vmem>>, %arg6: memref<1x256xf32, #tpu.memory_space<vmem>>, %arg7: memref<1x256xf32, #tpu.memory_space<vmem>>, %arg8: memref<256x128xbf16, #tpu.memory_space<vmem>>, %arg9: memref<1x128xf32, #tpu.memory_space<vmem>>, %arg10: memref<1x128xf32, #tpu.memory_space<vmem>>, %arg11: memref<128x2xf32, #tpu.memory_space<vmem>>, %arg12: memref<1x2xf32, #tpu.memory_space<vmem>>, %arg13: memref<4x2xf32, #tpu.memory_space<vmem>>, %arg14: memref<4x128xf32, #tpu.memory_space<vmem>>) attributes {dimension_semantics = [], scalar_prefetch = 0 : i64, scratch_operands = 0 : i64, tpu.core_type = #tpu.core_type<tc>} {
    %c0 = arith.constant 0 : index
    %c0_0 = arith.constant 0 : index
    %0 = vector.load %arg0[%c0, %c0_0] : memref<4x384xbf16, #tpu.memory_space<vmem>>, vector<4x384xbf16>
    %c0_1 = arith.constant 0 : index
    %c0_2 = arith.constant 0 : index
    %1 = vector.load %arg3[%c0_1, %c0_2] : memref<384x256xbf16, #tpu.memory_space<vmem>>, vector<384x256xbf16>
    %cst = arith.constant dense<0.000000e+00> : vector<4x256xf32>
    %2 = tpu.matmul %0, %1, %cst {dimension_numbers = #tpu.dot_dimension_numbers<[1], [0], [0], [1], [0, 0, 1, 1], [], []>} : vector<4x384xbf16>, vector<384x256xbf16>, vector<4x256xf32> -> vector<4x256xf32>
    %c0_3 = arith.constant 0 : index
    %c0_4 = arith.constant 0 : index
    %3 = vector.load %arg1[%c0_3, %c0_4] : memref<4x2944xbf16, #tpu.memory_space<vmem>>, vector<4x2944xbf16>
    %c0_5 = arith.constant 0 : index
    %c0_6 = arith.constant 0 : index
    %4 = vector.load %arg4[%c0_5, %c0_6] : memref<2944x256xbf16, #tpu.memory_space<vmem>>, vector<2944x256xbf16>
    %cst_7 = arith.constant dense<0.000000e+00> : vector<4x256xf32>
    %5 = tpu.matmul %3, %4, %cst_7 {dimension_numbers = #tpu.dot_dimension_numbers<[1], [0], [0], [1], [0, 0, 1, 1], [], []>} : vector<4x2944xbf16>, vector<2944x256xbf16>, vector<4x256xf32> -> vector<4x256xf32>
    %6 = arith.addf %2, %5 : vector<4x256xf32>
    %c0_8 = arith.constant 0 : index
    %c0_9 = arith.constant 0 : index
    %7 = vector.load %arg2[%c0_8, %c0_9] : memref<4x3072xbf16, #tpu.memory_space<vmem>>, vector<4x3072xbf16>
    %c0_10 = arith.constant 0 : index
    %c0_11 = arith.constant 0 : index
    %8 = vector.load %arg5[%c0_10, %c0_11] : memref<3072x256xbf16, #tpu.memory_space<vmem>>, vector<3072x256xbf16>
    %cst_12 = arith.constant dense<0.000000e+00> : vector<4x256xf32>
    %9 = tpu.matmul %7, %8, %cst_12 {dimension_numbers = #tpu.dot_dimension_numbers<[1], [0], [0], [1], [0, 0, 1, 1], [], []>} : vector<4x3072xbf16>, vector<3072x256xbf16>, vector<4x256xf32> -> vector<4x256xf32>
    %10 = arith.addf %6, %9 : vector<4x256xf32>
    %c0_13 = arith.constant 0 : index
    %c0_14 = arith.constant 0 : index
    %11 = vector.load %arg6[%c0_13, %c0_14] : memref<1x256xf32, #tpu.memory_space<vmem>>, vector<1x256xf32>
    %c0_15 = arith.constant 0 : index
    %c0_16 = arith.constant 0 : index
    %12 = vector.load %arg7[%c0_15, %c0_16] : memref<1x256xf32, #tpu.memory_space<vmem>>, vector<1x256xf32>
    %cst_17 = arith.constant dense<0.000000e+00> : vector<256xf32>
    %13 = vector.multi_reduction <add>, %10, %cst_17 [0] : vector<4x256xf32> to vector<256xf32>
    %14 = vector.shape_cast %13 : vector<256xf32> to vector<1x256xf32>
    %cst_18 = arith.constant 4.000000e+00 : f32
    %15 = vector.broadcast %cst_18 : f32 to vector<1x256xf32>
    %16 = arith.divf %14, %15 : vector<1x256xf32>
    %17 = vector.broadcast %16 : vector<1x256xf32> to vector<4x256xf32>
    %18 = arith.subf %10, %17 : vector<4x256xf32>
    %19 = arith.mulf %18, %18 : vector<4x256xf32>
    %cst_19 = arith.constant dense<0.000000e+00> : vector<256xf32>
    %20 = vector.multi_reduction <add>, %19, %cst_19 [0] : vector<4x256xf32> to vector<256xf32>
    %21 = vector.shape_cast %20 : vector<256xf32> to vector<1x256xf32>
    %cst_20 = arith.constant 4.000000e+00 : f32
    %22 = vector.broadcast %cst_20 : f32 to vector<1x256xf32>
    %23 = arith.divf %21, %22 : vector<1x256xf32>
    %cst_21 = arith.constant 9.99999974E-6 : f32
    %24 = vector.broadcast %cst_21 : f32 to vector<1x256xf32>
    %25 = arith.addf %23, %24 : vector<1x256xf32>
    %26 = math.rsqrt %25 : vector<1x256xf32>
    %27 = arith.mulf %11, %26 : vector<1x256xf32>
    %28 = arith.mulf %16, %27 : vector<1x256xf32>
    %29 = arith.subf %12, %28 : vector<1x256xf32>
    %30 = vector.broadcast %27 : vector<1x256xf32> to vector<4x256xf32>
    %31 = arith.mulf %10, %30 : vector<4x256xf32>
    %32 = vector.broadcast %29 : vector<1x256xf32> to vector<4x256xf32>
    %33 = arith.addf %31, %32 : vector<4x256xf32>
    %cst_22 = arith.constant 0.000000e+00 : f32
    %34 = vector.broadcast %cst_22 : f32 to vector<4x256xf32>
    %35 = arith.cmpf ogt, %33, %34 : vector<4x256xf32>
    %cst_23 = arith.constant 0.00999999977 : f32
    %36 = vector.broadcast %cst_23 : f32 to vector<4x256xf32>
    %37 = arith.mulf %36, %33 : vector<4x256xf32>
    %38 = arith.select %35, %33, %37 : vector<4x256xi1>, vector<4x256xf32>
    %39 = arith.truncf %38 : vector<4x256xf32> to vector<4x256xbf16>
    %c0_24 = arith.constant 0 : index
    %c0_25 = arith.constant 0 : index
    %40 = vector.load %arg8[%c0_24, %c0_25] : memref<256x128xbf16, #tpu.memory_space<vmem>>, vector<256x128xbf16>
    %cst_26 = arith.constant dense<0.000000e+00> : vector<4x128xf32>
    %41 = tpu.matmul %39, %40, %cst_26 {dimension_numbers = #tpu.dot_dimension_numbers<[1], [0], [0], [1], [0, 0, 1, 1], [], []>} : vector<4x256xbf16>, vector<256x128xbf16>, vector<4x128xf32> -> vector<4x128xf32>
    %c0_27 = arith.constant 0 : index
    %c0_28 = arith.constant 0 : index
    %42 = vector.load %arg9[%c0_27, %c0_28] : memref<1x128xf32, #tpu.memory_space<vmem>>, vector<1x128xf32>
    %c0_29 = arith.constant 0 : index
    %c0_30 = arith.constant 0 : index
    %43 = vector.load %arg10[%c0_29, %c0_30] : memref<1x128xf32, #tpu.memory_space<vmem>>, vector<1x128xf32>
    %cst_31 = arith.constant dense<0.000000e+00> : vector<128xf32>
    %44 = vector.multi_reduction <add>, %41, %cst_31 [0] : vector<4x128xf32> to vector<128xf32>
    %45 = vector.shape_cast %44 : vector<128xf32> to vector<1x128xf32>
    %cst_32 = arith.constant 4.000000e+00 : f32
    %46 = vector.broadcast %cst_32 : f32 to vector<1x128xf32>
    %47 = arith.divf %45, %46 : vector<1x128xf32>
    %48 = vector.broadcast %47 : vector<1x128xf32> to vector<4x128xf32>
    %49 = arith.subf %41, %48 : vector<4x128xf32>
    %50 = arith.mulf %49, %49 : vector<4x128xf32>
    %cst_33 = arith.constant dense<0.000000e+00> : vector<128xf32>
    %51 = vector.multi_reduction <add>, %50, %cst_33 [0] : vector<4x128xf32> to vector<128xf32>
    %52 = vector.shape_cast %51 : vector<128xf32> to vector<1x128xf32>
    %cst_34 = arith.constant 4.000000e+00 : f32
    %53 = vector.broadcast %cst_34 : f32 to vector<1x128xf32>
    %54 = arith.divf %52, %53 : vector<1x128xf32>
    %cst_35 = arith.constant 9.99999974E-6 : f32
    %55 = vector.broadcast %cst_35 : f32 to vector<1x128xf32>
    %56 = arith.addf %54, %55 : vector<1x128xf32>
    %57 = math.rsqrt %56 : vector<1x128xf32>
    %58 = arith.mulf %42, %57 : vector<1x128xf32>
    %59 = arith.mulf %47, %58 : vector<1x128xf32>
    %60 = arith.subf %43, %59 : vector<1x128xf32>
    %61 = vector.broadcast %58 : vector<1x128xf32> to vector<4x128xf32>
    %62 = arith.mulf %41, %61 : vector<4x128xf32>
    %63 = vector.broadcast %60 : vector<1x128xf32> to vector<4x128xf32>
    %64 = arith.addf %62, %63 : vector<4x128xf32>
    %cst_36 = arith.constant 0.000000e+00 : f32
    %65 = vector.broadcast %cst_36 : f32 to vector<4x128xf32>
    %66 = arith.cmpf ogt, %64, %65 : vector<4x128xf32>
    %cst_37 = arith.constant 0.00999999977 : f32
    %67 = vector.broadcast %cst_37 : f32 to vector<4x128xf32>
    %68 = arith.mulf %67, %64 : vector<4x128xf32>
    %69 = arith.select %66, %64, %68 : vector<4x128xi1>, vector<4x128xf32>
    %c0_38 = arith.constant 0 : index
    %c0_39 = arith.constant 0 : index
    %70 = vector.load %arg14[%c0_38, %c0_39] : memref<4x128xf32, #tpu.memory_space<vmem>>, vector<4x128xf32>
    tpu.vector_store %arg14[%c0_38, %c0_39], %69 {strides = array<i32>} : memref<4x128xf32, #tpu.memory_space<vmem>>, vector<4x128xf32>,
    %c0_40 = arith.constant 0 : index
    %c0_41 = arith.constant 0 : index
    %71 = vector.load %arg11[%c0_40, %c0_41] : memref<128x2xf32, #tpu.memory_space<vmem>>, vector<128x2xf32>
    %cst_42 = arith.constant dense<0.000000e+00> : vector<4x2xf32>
    %72 = tpu.matmul %69, %71, %cst_42 {dimension_numbers = #tpu.dot_dimension_numbers<[1], [0], [0], [1], [0, 0, 1, 1], [], []>} : vector<4x128xf32>, vector<128x2xf32>, vector<4x2xf32> -> vector<4x2xf32>
    %c0_43 = arith.constant 0 : index
    %c0_44 = arith.constant 0 : index
    %73 = vector.load %arg12[%c0_43, %c0_44] : memref<1x2xf32, #tpu.memory_space<vmem>>, vector<1x2xf32>
    %74 = vector.broadcast %73 : vector<1x2xf32> to vector<4x2xf32>
    %75 = arith.addf %72, %74 : vector<4x2xf32>
    %cst_45 = arith.constant dense<0xFF800000> : vector<4xf32>
    %76 = vector.multi_reduction <maximumf>, %75, %cst_45 [1] : vector<4x2xf32> to vector<4xf32>
    %77 = vector.shape_cast %76 : vector<4xf32> to vector<4x1xf32>
    %78 = vector.broadcast %77 : vector<4x1xf32> to vector<4x2xf32>
    %79 = arith.subf %75, %78 : vector<4x2xf32>
    %80 = math.exp %79 : vector<4x2xf32>
    %cst_46 = arith.constant dense<0.000000e+00> : vector<4xf32>
    %81 = vector.multi_reduction <add>, %80, %cst_46 [1] : vector<4x2xf32> to vector<4xf32>
    %82 = vector.shape_cast %81 : vector<4xf32> to vector<4x1xf32>
    %83 = vector.broadcast %82 : vector<4x1xf32> to vector<4x2xf32>
    %84 = arith.divf %80, %83 : vector<4x2xf32>
    %c0_47 = arith.constant 0 : index
    %c0_48 = arith.constant 0 : index
    %85 = vector.load %arg13[%c0_47, %c0_48] : memref<4x2xf32, #tpu.memory_space<vmem>>, vector<4x2xf32>
    tpu.vector_store %arg13[%c0_47, %c0_48], %84 {strides = array<i32>} : memref<4x2xf32, #tpu.memory_space<vmem>>, vector<4x2xf32>,
    return
  }
}

</mosaic_0001>

<bundles_post_ra>
// kernel: tpu_custom_call.1
= control target key start
LH: loop header
LB: loop body
LE: loop exit
PB: predicated region body
PF: predicated region fallthrough
CT: control target
= control target key end

     0   :  { %20 = vsyncpa [#allocation3], 0  ;;  %s9950_s0 = inlined_call_operand.hbm [shape: bf16[4,384], index: 0, kind: input, shape index: {}]   ;;  %s9951_s1 = inlined_call_operand.hbm [shape: bf16[4,2944], index: 1, kind: input, shape index: {}]   ;;  %s9952_s2 = inlined_call_operand.hbm [shape: bf16[4,3072], index: 2, kind: input, shape index: {}]   ;;  %s9953_s3 = inlined_call_operand.hbm [shape: bf16[384,256], index: 3, kind: input, shape index: {}]   ;;  %s9954_s4 = inlined_call_operand.hbm [shape: bf16[2944,256], index: 4, kind: input, shape index: {}]   ;;  %s9955_s5 = inlined_call_operand.hbm [shape: bf16[3072,256], index: 5, kind: input, shape index: {}]   ;;  %s9956_s6 = inlined_call_operand.hbm [shape: f32[1,256], index: 6, kind: input, shape index: {}]   ;;  %s9957_s7 = inlined_call_operand.hbm [shape: f32[1,256], index: 7, kind: input, shape index: {}]   ;;  %s9958_s8 = inlined_call_operand.hbm [shape: bf16[256,128], index: 8, kind: input, shape index: {}]   ;;  %s9959_s9 = inlined_call_operand.hbm [shape: f32[1,128], index: 9, kind: input, shape index: {}]   ;;  %s9960_s10 = inlined_call_operand.hbm [shape: f32[1,128], index: 10, kind: input, shape index: {}]   ;;  %s9961_s11 = inlined_call_operand.vmem [shape: f32[128,2], index: 11, kind: input, shape index: {}]   ;;  %s9962_s12 = inlined_call_operand.hbm [shape: f32[1,2], index: 12, kind: input, shape index: {}]   ;;  %s9963_s13 = inlined_call_operand.vmem [shape: f32[4,2], index: 13, kind: output, shape index: {0}]   ;;  %s9964_s14 = inlined_call_operand.hbm [shape: f32[4,128], index: 14, kind: output, shape index: {1}]  }
   0x1   :  { %21 = vsyncpa [#allocation6], 0 }
   0x2   :  { %22 = vsyncpa [#allocation9], 0 }
   0x3   :  { %23 = vsyncpa [#allocation12], 0 }
   0x4   :  { %24 = vsyncpa [#allocation15], 0 }
   0x5   :  { %25 = vsyncpa [#allocation18], 0 }
   0x6   :  { %26 = vsyncpa [#allocation21], 0 }
   0x7   :  { %27 = vsyncpa [#allocation4], 0  ;;  %s9395_s29 = smov [#allocation5]   ;;  %s9396_s15 = smov [#allocation8]  }
   0x8   :  { %s44_s30 = sshll.u32 %s9395_s29, 4  ;;  %s63_s16 = sshll.u32 %s9396_s15, 4  ;;  %s45_s30 = int_to_ptr.vmem [resolvable:$true] %s44_s30  ;;  %s9493_s16 = int_to_ptr.vmem [resolvable:$true] %s63_s16 }
   0x9   :  { %s9093_s19 = scalar_lea.hbm %s9951_s1, 736 }
   0xa   :  { %p9094_p0 = scmp.ne.s32.totalorder %s9951_s1, %s9093_s19  ;;  %p9097_p1 = scmp.lt.u32.totalorder %s9093_s19, %s9951_s1 }
   0xc   :  { %p9099_p2 = pnand %p9097_p1, %p9094_p0 }
   0xe   :  { %9102 = shalt.err (!%p9099_p2)
}
   0xf   :  { %s9103_s24 = scalar_lea.vmem %s45_s30, 736  ;;  %p9108_p4 = scmp.lt.s32.totalorder %s45_s30, %s45_s30 }
  0x10   :  { %p9104_p3 = scmp.ne.s32.totalorder %s45_s30, %s9103_s24  ;;  %p9109_p5 = scmp.lt.s32.totalorder %s9103_s24, %s9103_s24 }
  0x12   :  { %p9110_p6 = por %p9109_p5, %p9108_p4 }
  0x14   :  { %p9111_p7 = pnand %p9110_p6, %p9104_p3 }
  0x16   :  { %9114 = shalt.err (!%p9111_p7)
}
  0x17   :  { %47 = dma.hbm_to_vmem [thread:$0]  %s9951_s1, 736, %s45_s30, [#allocation6]  }
  0x18   :  { %s9115_s29 = scalar_lea.hbm %s9953_s3, 6144 }
  0x19   :  { %p9116_p8 = scmp.ne.s32.totalorder %s9953_s3, %s9115_s29  ;;  %p9119_p9 = scmp.lt.u32.totalorder %s9115_s29, %s9953_s3 }
  0x1b   :  { %p9121_p10 = pnand %p9119_p9, %p9116_p8 }
  0x1d   :  { %9124 = shalt.err (!%p9121_p10)
}
  0x1e   :  { %s9125_s20 = scalar_lea.vmem %s9493_s16, 6144  ;;  %p9130_p12 = scmp.lt.s32.totalorder %s9493_s16, %s9493_s16 }
  0x1f   :  { %p9126_p11 = scmp.ne.s32.totalorder %s9493_s16, %s9125_s20  ;;  %p9131_p13 = scmp.lt.s32.totalorder %s9125_s20, %s9125_s20 }
  0x21   :  { %p9132_p0 = por %p9131_p13, %p9130_p12 }
  0x23   :  { %p9133_p1 = pnand %p9132_p0, %p9126_p11 }
  0x25   :  { %9136 = shalt.err (!%p9133_p1)
}
  0x26   :  { %s9397_s1 = smov 128   ;;  %s9398_s30 = smov 8  }
  0x27   :  { %69 = dma.hbm_to_vmem [thread:$0]  %s9953_s3, 6144, %s9493_s16, [#allocation9], %s9397_s1, %s9397_s1, %s9398_s30  }
  0x28   :  { %s9399_s23 = smov [#allocation11]   ;;  %s9400_s25 = smov [#allocation14]  }
  0x29   :  { %s87_s24 = sshll.u32 %s9399_s23, 4  ;;  %s110_s26 = sshll.u32 %s9400_s25, 4  ;;  %s88_s24 = int_to_ptr.vmem [resolvable:$true] %s87_s24  ;;  %s111_s26 = int_to_ptr.vmem [resolvable:$true] %s110_s26 }
  0x2a   :  { %s9137_s29 = scalar_lea.hbm %s9955_s5, 49152 }
  0x2b   :  { %p9138_p2 = scmp.ne.s32.totalorder %s9955_s5, %s9137_s29  ;;  %p9141_p3 = scmp.lt.u32.totalorder %s9137_s29, %s9955_s5 }
  0x2d   :  { %p9143_p4 = pnand %p9141_p3, %p9138_p2 }
  0x2f   :  { %9146 = shalt.err (!%p9143_p4)
}
  0x30   :  { %s9147_s3 = scalar_lea.vmem %s88_s24, 49152  ;;  %p9152_p6 = scmp.lt.s32.totalorder %s88_s24, %s88_s24 }
  0x31   :  { %p9148_p5 = scmp.ne.s32.totalorder %s88_s24, %s9147_s3  ;;  %p9153_p7 = scmp.lt.s32.totalorder %s9147_s3, %s9147_s3 }
  0x33   :  { %p9154_p8 = por %p9153_p7, %p9152_p6 }
  0x35   :  { %p9155_p9 = pnand %p9154_p8, %p9148_p5 }
  0x37   :  { %9158 = shalt.err (!%p9155_p9)
}
  0x38   :  { %93 = dma.hbm_to_vmem [thread:$0]  %s9955_s5, 49152, %s88_s24, [#allocation12], %s9397_s1, %s9397_s1, %s9398_s30  }
  0x39   :  { %s9159_s23 = scalar_lea.hbm %s9957_s7, 32 }
  0x3a   :  { %p9160_p10 = scmp.ne.s32.totalorder %s9957_s7, %s9159_s23  ;;  %p9163_p11 = scmp.lt.u32.totalorder %s9159_s23, %s9957_s7 }
  0x3c   :  { %p9165_p12 = pnand %p9163_p11, %p9160_p10 }
  0x3e   :  { %9168 = shalt.err (!%p9165_p12)
}
  0x3f   :  { %s9169_s15 = scalar_lea.vmem %s111_s26, 32  ;;  %p9174_p0 = scmp.lt.s32.totalorder %s111_s26, %s111_s26 }
  0x40   :  { %p9170_p13 = scmp.ne.s32.totalorder %s111_s26, %s9169_s15  ;;  %p9175_p1 = scmp.lt.s32.totalorder %s9169_s15, %s9169_s15 }
  0x42   :  { %p9176_p2 = por %p9175_p1, %p9174_p0 }
  0x44   :  { %p9177_p3 = pnand %p9176_p2, %p9170_p13 }
  0x46   :  { %9180 = shalt.err (!%p9177_p3)
}
  0x47   :  { %113 = dma.hbm_to_vmem [thread:$0]  %s9957_s7, 32, %s111_s26, [#allocation15]  }
  0x48   :  { %s9401_s17 = smov [#allocation17]   ;;  %s9402_s19 = smov [#allocation2]  }
  0x49   :  { %s132_s18 = sshll.u32 %s9401_s17, 4  ;;  %s34_s3 = sshll.u32 %s9402_s19, 4  ;;  %s133_s18 = int_to_ptr.vmem [resolvable:$true] %s132_s18  ;;  %s35_s3 = int_to_ptr.vmem [resolvable:$true] %s34_s3 }
  0x4a   :  { %s9181_s21 = scalar_lea.hbm %s9959_s9, 16 }
  0x4b   :  { %p9182_p4 = scmp.ne.s32.totalorder %s9959_s9, %s9181_s21  ;;  %p9185_p5 = scmp.lt.u32.totalorder %s9181_s21, %s9959_s9 }
  0x4d   :  { %p9187_p6 = pnand %p9185_p5, %p9182_p4 }
  0x4f   :  { %9190 = shalt.err (!%p9187_p6)
}
  0x50   :  { %s9191_s7 = scalar_lea.vmem %s133_s18, 16  ;;  %s9195_s26 = scalar_lea.vmem %s133_s18, 32 }
  0x51   :  { %p9192_p7 = scmp.ne.s32.totalorder %s133_s18, %s9191_s7  ;;  %p9196_p8 = scmp.lt.s32.totalorder %s133_s18, %s133_s18 }
  0x52   :  { %p9197_p9 = scmp.lt.s32.totalorder %s9195_s26, %s9191_s7 }
  0x54   :  { %p9198_p10 = por %p9197_p9, %p9196_p8 }
  0x56   :  { %p9199_p11 = pnand %p9198_p10, %p9192_p7 }
  0x58   :  { %9202 = shalt.err (!%p9199_p11)
}
  0x59   :  { %135 = dma.hbm_to_vmem [thread:$0]  %s9959_s9, 16, %s133_s18, [#allocation18]  }
  0x5a   :  { %s9203_s24 = scalar_lea.hbm %s9950_s0, 96 }
  0x5b   :  { %p9204_p12 = scmp.ne.s32.totalorder %s9950_s0, %s9203_s24  ;;  %p9207_p13 = scmp.lt.u32.totalorder %s9203_s24, %s9950_s0 }
  0x5d   :  { %p9209_p0 = pnand %p9207_p13, %p9204_p12 }
  0x5f   :  { %9212 = shalt.err (!%p9209_p0)
}
  0x60   :  { %s9213_s21 = scalar_lea.vmem %s35_s3, 96  ;;  %p9218_p2 = scmp.lt.s32.totalorder %s35_s3, %s35_s3 }
  0x61   :  { %p9214_p1 = scmp.ne.s32.totalorder %s35_s3, %s9213_s21  ;;  %p9219_p3 = scmp.lt.s32.totalorder %s9213_s21, %s9213_s21 }
  0x63   :  { %p9220_p4 = por %p9219_p3, %p9218_p2 }
  0x65   :  { %p9221_p5 = pnand %p9220_p4, %p9214_p1 }
  0x67   :  { %9224 = shalt.err (!%p9221_p5)
}
  0x68   :  { %37 = dma.hbm_to_vmem [thread:$0]  %s9950_s0, 96, %s35_s3, [#allocation3]  }
  0x69   :  { %s9403_s22 = smov [#allocation7]   ;;  %s9404_s25 = smov [#allocation10]  }
  0x6a   :  { %s54_s23 = sshll.u32 %s9403_s22, 4  ;;  %s75_s27 = sshll.u32 %s9404_s25, 4  ;;  %s55_s23 = int_to_ptr.vmem [resolvable:$true] %s54_s23  ;;  %s9578_s27 = int_to_ptr.vmem [resolvable:$true] %s75_s27 }
  0x6b   :  { %s9225_s28 = scalar_lea.hbm %s9952_s2, 768 }
  0x6c   :  { %p9226_p6 = scmp.ne.s32.totalorder %s9952_s2, %s9225_s28  ;;  %p9229_p7 = scmp.lt.u32.totalorder %s9225_s28, %s9952_s2 }
  0x6e   :  { %p9231_p8 = pnand %p9229_p7, %p9226_p6 }
  0x70   :  { %9234 = shalt.err (!%p9231_p8)
}
  0x71   :  { %s9235_s0 = scalar_lea.vmem %s55_s23, 768  ;;  %p9240_p10 = scmp.lt.s32.totalorder %s55_s23, %s55_s23 }
  0x72   :  { %p9236_p9 = scmp.ne.s32.totalorder %s55_s23, %s9235_s0  ;;  %p9241_p11 = scmp.lt.s32.totalorder %s9235_s0, %s9235_s0 }
  0x74   :  { %p9242_p12 = por %p9241_p11, %p9240_p10 }
  0x76   :  { %p9243_p13 = pnand %p9242_p12, %p9236_p9 }
  0x78   :  { %9246 = shalt.err (!%p9243_p13)
}
  0x79   :  { %57 = dma.hbm_to_vmem [thread:$0]  %s9952_s2, 768, %s55_s23, [#allocation6]  }
  0x7a   :  { %s9247_s20 = scalar_lea.hbm %s9954_s4, 47104 }
  0x7b   :  { %p9248_p0 = scmp.ne.s32.totalorder %s9954_s4, %s9247_s20  ;;  %p9251_p1 = scmp.lt.u32.totalorder %s9247_s20, %s9954_s4 }
  0x7d   :  { %p9253_p2 = pnand %p9251_p1, %p9248_p0 }
  0x7f   :  { %9256 = shalt.err (!%p9253_p2)
}
  0x80   :  { %s9257_s25 = scalar_lea.vmem %s9578_s27, 47104  ;;  %p9262_p4 = scmp.lt.s32.totalorder %s9578_s27, %s9578_s27 }
  0x81   :  { %p9258_p3 = scmp.ne.s32.totalorder %s9578_s27, %s9257_s25  ;;  %p9263_p5 = scmp.lt.s32.totalorder %s9257_s25, %s9257_s25 }
  0x83   :  { %p9264_p6 = por %p9263_p5, %p9262_p4 }
  0x85   :  { %p9265_p7 = pnand %p9264_p6, %p9258_p3 }
  0x87   :  { %9268 = shalt.err (!%p9265_p7)
}
  0x88   :  { %81 = dma.hbm_to_vmem [thread:$0]  %s9954_s4, 47104, %s9578_s27, [#allocation9], %s9397_s1, %s9397_s1, %s9398_s30  }
  0x89   :  { %s9405_s7 = smov [#allocation13]   ;;  %s9406_s28 = smov [#allocation16]  }
  0x8a   :  { %s100_s26 = sshll.u32 %s9405_s7, 4  ;;  %s119_s29 = sshll.u32 %s9406_s28, 4  ;;  %s101_s26 = int_to_ptr.vmem [resolvable:$true] %s100_s26  ;;  %s9612_s29 = int_to_ptr.vmem [resolvable:$true] %s119_s29 }
  0x8b   :  { %s9269_s24 = scalar_lea.hbm %s9956_s6, 32 }
  0x8c   :  { %p9270_p8 = scmp.ne.s32.totalorder %s9956_s6, %s9269_s24  ;;  %p9273_p9 = scmp.lt.u32.totalorder %s9269_s24, %s9956_s6 }
  0x8e   :  { %p9275_p10 = pnand %p9273_p9, %p9270_p8 }
  0x90   :  { %9278 = shalt.err (!%p9275_p10)
}
  0x91   :  { %s9279_s4 = scalar_lea.vmem %s101_s26, 32  ;;  %p9284_p12 = scmp.lt.s32.totalorder %s101_s26, %s101_s26 }
  0x92   :  { %p9280_p11 = scmp.ne.s32.totalorder %s101_s26, %s9279_s4  ;;  %p9285_p13 = scmp.lt.s32.totalorder %s9279_s4, %s9279_s4 }
  0x94   :  { %p9286_p0 = por %p9285_p13, %p9284_p12 }
  0x96   :  { %p9287_p1 = pnand %p9286_p0, %p9280_p11 }
  0x98   :  { %9290 = shalt.err (!%p9287_p1)
}
  0x99   :  { %103 = dma.hbm_to_vmem [thread:$0]  %s9956_s6, 32, %s101_s26, [#allocation12]  }
  0x9a   :  { %s9291_s20 = scalar_lea.hbm %s9958_s8, 2048 }
  0x9b   :  { %p9292_p2 = scmp.ne.s32.totalorder %s9958_s8, %s9291_s20  ;;  %p9295_p3 = scmp.lt.u32.totalorder %s9291_s20, %s9958_s8 }
  0x9d   :  { %p9297_p4 = pnand %p9295_p3, %p9292_p2 }
  0x9f   :  { %9300 = shalt.err (!%p9297_p4)
}
  0xa0   :  { %s9301_s25 = scalar_lea.vmem %s9612_s29, 2048  ;;  %p9306_p6 = scmp.lt.s32.totalorder %s9612_s29, %s9612_s29 }
  0xa1   :  { %p9302_p5 = scmp.ne.s32.totalorder %s9612_s29, %s9301_s25  ;;  %p9307_p7 = scmp.lt.s32.totalorder %s9301_s25, %s9301_s25 }
  0xa3   :  { %p9308_p8 = por %p9307_p7, %p9306_p6 }
  0xa5   :  { %p9309_p9 = pnand %p9308_p8, %p9302_p5 }
  0xa7   :  { %9312 = shalt.err (!%p9309_p9)
}
  0xa8   :  { %s9407_s6 = smov 64   ;;  %s9408_s2 = smov 4  }
  0xa9   :  { %125 = dma.hbm_to_vmem [thread:$0]  %s9958_s8, 2048, %s9612_s29, [#allocation15], %s9407_s6, %s9407_s6, %s9408_s2  }
  0xaa   :  { %s9409_s26 = smov [#allocation19]   ;;  %s9410_s15 = smov [#allocation20]  }
  0xab   :  { %s142_s28 = sshll.u32 %s9409_s26, 4  ;;  %s154_s5 = sshll.u32 %s9410_s15, 4  ;;  %s143_s28 = int_to_ptr.vmem [resolvable:$true] %s142_s28  ;;  %s155_s5 = int_to_ptr.vmem [resolvable:$true] %s154_s5 }
  0xac   :  { %s9313_s3 = scalar_lea.hbm %s9960_s10, 16 }
  0xad   :  { %p9314_p10 = scmp.ne.s32.totalorder %s9960_s10, %s9313_s3  ;;  %p9317_p11 = scmp.lt.u32.totalorder %s9313_s3, %s9960_s10 }
  0xaf   :  { %p9319_p12 = pnand %p9317_p11, %p9314_p10 }
  0xb1   :  { %9322 = shalt.err (!%p9319_p12)
}
  0xb2   :  { %s9323_s8 = scalar_lea.vmem %s143_s28, 16  ;;  %s9327_s29 = scalar_lea.vmem %s143_s28, 32 }
  0xb3   :  { %p9324_p13 = scmp.ne.s32.totalorder %s143_s28, %s9323_s8  ;;  %p9328_p0 = scmp.lt.s32.totalorder %s143_s28, %s143_s28 }
  0xb4   :  { %p9329_p1 = scmp.lt.s32.totalorder %s9327_s29, %s9323_s8 }
  0xb6   :  { %p9330_p2 = por %p9329_p1, %p9328_p0 }
  0xb8   :  { %p9331_p3 = pnand %p9330_p2, %p9324_p13 }
  0xba   :  { %9334 = shalt.err (!%p9331_p3)
}
  0xbb   :  { %145 = dma.hbm_to_vmem [thread:$0]  %s9960_s10, 16, %s143_s28, [#allocation18]  }
  0xbc   :  { %s9335_s21 = scalar_lea.hbm %s9962_s12, 16 }
  0xbd   :  { %p9336_p4 = scmp.ne.s32.totalorder %s9962_s12, %s9335_s21  ;;  %p9339_p5 = scmp.lt.u32.totalorder %s9335_s21, %s9962_s12 }
  0xbf   :  { %p9341_p6 = pnand %p9339_p5, %p9336_p4 }
  0xc1   :  { %9344 = shalt.err (!%p9341_p6)
}
  0xc2   :  { %s9345_s6 = scalar_lea.vmem %s155_s5, 16  ;;  %s9349_s2 = scalar_lea.vmem %s155_s5, 32 }
  0xc3   :  { %p9346_p7 = scmp.ne.s32.totalorder %s155_s5, %s9345_s6  ;;  %p9350_p8 = scmp.lt.s32.totalorder %s155_s5, %s155_s5 }
  0xc4   :  { %p9351_p9 = scmp.lt.s32.totalorder %s9349_s2, %s9345_s6 }
  0xc6   :  { %p9352_p10 = por %p9351_p9, %p9350_p8 }
  0xc8   :  { %p9353_p11 = pnand %p9352_p10, %p9346_p7 }
  0xca   :  { %9356 = shalt.err (!%p9353_p11)
}
  0xcb   :  { %157 = dma.hbm_to_vmem [thread:$0]  %s9962_s12, 16, %s155_s5, [#allocation21]  }
  0xcc   :  { %9379 = dma.done.wait [#allocation3], 96  }
  0xcd   :  { %9380 = vsyncadd [#allocation3], 4294967200 }
  0xce   :  { %9381 = dma.done.wait [#allocation6], 1504  }
  0xcf   :  { %9382 = vsyncadd [#allocation6], 4294965792 }
  0xd0   :  { %9383 = dma.done.wait [#allocation9], 53248  }
  0xd1   :  { %9384 = vsyncadd [#allocation9], 4294914048 }
  0xd2   :  { %9385 = dma.done.wait [#allocation12], 49184  }
  0xd3   :  { %9386 = vsyncadd [#allocation12], 4294918112 }
  0xd4   :  { %9387 = dma.done.wait [#allocation15], 2080  }
  0xd5   :  { %9388 = vsyncadd [#allocation15], 4294965216 }
  0xd6   :  { %9389 = dma.done.wait [#allocation18], 32  }
  0xd7   :  { %9390 = vsyncadd [#allocation18], 4294967264 }
  0xd8   :  { %9391 = dma.done.wait [#allocation21], 16  }
  0xd9   :  { %9392 = vsyncadd [#allocation21], 4294967280  ;;  %v9411_v0 = vmov 0   ;;  %v7850_v1 = vld [vmem:[#allocation10 + $0x4] ss:$8 sps:$4 sm:$0xff]   ;;  %v628_v26 = vlaneseq  ;;  %vm6360_vm0 = vcmask 1043456  }
  0xda   :  { %3071 = vmatprep.mubr.bf16.mxu0 %v9411_v0  ;;  %v7852_v2 = vld [vmem:[#allocation10 + $0xb04] ss:$8 sps:$4 sm:$0xff]   ;;  %2588 = vmatprep.subr.bf16.mxu1 %v7850_v1  ;;  %v7854_v3 = vld [vmem:[#allocation10] ss:$8 sps:$4 sm:$0xff]   ;;  %v7856_v5 = vld [vmem:[#allocation10 + $0x14] ss:$8 sps:$4 sm:$0xff]  }
  0xdb   :  { %v7855_v4 = vld [vmem:[#allocation10 + $0xb00] ss:$8 sps:$4 sm:$0xff]   ;;  %3039 = vmatprep.subr.bf16.mxu0 %v7852_v2  ;;  %2589 = vmatpush1.bf16.msra.mxu1 %v7854_v3  ;;  %v7858_v6 = vld [vmem:[#allocation10 + $0xb14] ss:$8 sps:$4 sm:$0xff]   ;;  %v7860_v7 = vld [vmem:[#allocation10 + $0x10] ss:$8 sps:$4 sm:$0xff]  }
  0xdc   :  { %3040 = vmatpush1.bf16.msra.mxu0 %v7855_v4  ;;  %2590 = vmatprep.subr.bf16.mxu1 %v7856_v5  ;;  %v7861_v8 = vld [vmem:[#allocation10 + $0xb10] ss:$8 sps:$4 sm:$0xff]   ;;  %v7862_v9 = vld [vmem:[#allocation10 + $0x24] ss:$8 sps:$4 sm:$0xff]   ;;  %v7866_v11 = vld [vmem:[#allocation10 + $0x20] ss:$8 sps:$4 sm:$0xff]  }
  0xdd   :  { %3041 = vmatprep.subr.bf16.mxu0 %v7858_v6  ;;  %v7864_v10 = vld [vmem:[#allocation10 + $0xb24] ss:$8 sps:$4 sm:$0xff]   ;;  %v7867_v12 = vld [vmem:[#allocation10 + $0xb20] ss:$8 sps:$4 sm:$0xff]   ;;  %v7868_v13 = vld [vmem:[#allocation10 + $0x34] ss:$8 sps:$4 sm:$0xff]  }
  0xde   :  { %v7870_v14 = vld [vmem:[#allocation10 + $0xb34] ss:$8 sps:$4 sm:$0xff]   ;;  %v7872_v15 = vld [vmem:[#allocation10 + $0x30] ss:$8 sps:$4 sm:$0xff]   ;;  %v7874_v17 = vld [vmem:[#allocation10 + $0x44] ss:$8 sps:$4 sm:$0xff]  }
  0xdf   :  { %2591 = vmatpush1.bf16.msra.mxu1 %v7860_v7  ;;  %v7873_v16 = vld [vmem:[#allocation10 + $0xb30] ss:$8 sps:$4 sm:$0xff]   ;;  %v7876_v18 = vld [vmem:[#allocation10 + $0xb44] ss:$8 sps:$4 sm:$0xff]   ;;  %v7878_v19 = vld [vmem:[#allocation10 + $0x40] ss:$8 sps:$4 sm:$0xff]  }
  0xe0   :  { %3042 = vmatpush1.bf16.msra.mxu0 %v7861_v8  ;;  %2592 = vmatprep.subr.bf16.mxu1 %v7862_v9  ;;  %v7879_v20 = vld [vmem:[#allocation10 + $0xb40] ss:$8 sps:$4 sm:$0xff]   ;;  %v7880_v21 = vld [vmem:[#allocation10 + $0x54] ss:$8 sps:$4 sm:$0xff]   ;;  %v7884_v23 = vld [vmem:[#allocation10 + $0x50] ss:$8 sps:$4 sm:$0xff]  }
  0xe1   :  { %3043 = vmatprep.subr.bf16.mxu0 %v7864_v10  ;;  %v7882_v22 = vld [vmem:[#allocation10 + $0xb54] ss:$8 sps:$4 sm:$0xff]   ;;  %v9412_v24 = vmov 1983009808   ;;  %v7885_v27 = vld [vmem:[#allocation10 + $0xb50] ss:$8 sps:$4 sm:$0xff]  }
  0xe2   :  { %v626_v25 = vunpack.c.l.s4 %v9412_v24  ;;  %v7886_v28 = vld [vmem:[#allocation10 + $0x64] ss:$8 sps:$4 sm:$0xff]   ;;  %v7890_v30 = vld [vmem:[#allocation10 + $0x60] ss:$8 sps:$4 sm:$0xff]   ;;  %v7892_v32 = vld [vmem:[#allocation10 + $0x74] ss:$8 sps:$4 sm:$0xff]  }
  0xe3   :  { %2593 = vmatpush1.bf16.msra.mxu1 %v7866_v11  ;;  %v7888_v29 = vld [vmem:[#allocation10 + $0xb64] ss:$8 sps:$4 sm:$0xff]   ;;  %v7891_v31 = vld [vmem:[#allocation10 + $0xb60] ss:$8 sps:$4 sm:$0xff]   ;;  %v9668_v34 = vshrl.u32 %v628_v26, 7  ;;  %vm9415_vm3 = vmmov 0  }
  0xe4   :  { %3044 = vmatpush1.bf16.msra.mxu0 %v7867_v12  ;;  %2594 = vmatprep.subr.bf16.mxu1 %v7868_v13  ;;  %v627_v33 = vunpack.c.0.s8 %v626_v25  ;;  %v249_v35 = vld [vmem:[#allocation5 + $0x28] sm:$0x3f]  ;;  %v7894_v36 = vld [vmem:[#allocation10 + $0xb74] ss:$8 sps:$4 sm:$0xff]   ;;  %v7896_v37 = vld [vmem:[#allocation10 + $0x70] ss:$8 sps:$4 sm:$0xff]  }
  0xe5   :  { %3045 = vmatprep.subr.bf16.mxu0 %v7870_v14  ;;  %v709_v39 = vcombine.high %v249_v35, %v249_v35  ;;  %v7897_v40 = vld [vmem:[#allocation10 + $0xb70] ss:$8 sps:$4 sm:$0xff]   ;;  %v7898_v41 = vld [vmem:[#allocation10 + $0x84] ss:$8 sps:$4 sm:$0xff]   ;;  %v7901_v44 = vld [vmem:[#allocation8 + $0x100] ss:$8 sps:$4 sm:$0xff]  }
  0xe6   :  { %v9671_v38 = vsub.s32 %v627_v33, %v9668_v34  ;;  %v7903_v42 = vld [vmem:[#allocation8 + $0x104] ss:$8 sps:$4 sm:$0xff]   ;;  %v7904_v45 = vld [vmem:[#allocation10 + $0x80] ss:$8 sps:$4 sm:$0xff]   ;;  %v7905_v46 = vld [vmem:[#allocation10 + $0x94] ss:$8 sps:$4 sm:$0xff]  }
  0xe7   :  { %2595 = vmatpush1.bf16.msra.mxu1 %v7872_v15  ;;  %v7909_v47 = vld [vmem:[#allocation8 + $0x114] ss:$8 sps:$4 sm:$0xff]   ;;  %v7907_v48 = vld [vmem:[#allocation8 + $0x110] ss:$8 sps:$4 sm:$0xff]   ;;  %v7911_v50 = vld [vmem:[#allocation10 + $0xa4] ss:$8 sps:$4 sm:$0xff]  }
  0xe8   :  { %3046 = vmatpush1.bf16.msra.mxu0 %v7873_v16  ;;  %2596 = vmatprep.subr.bf16.mxu1 %v7874_v17  ;;  %v723_v43 = vrot.slane %v709_v39, %v9671_v38  ;;  %v7910_v49 = vld [vmem:[#allocation10 + $0x90] ss:$8 sps:$4 sm:$0xff]   ;;  %v7915_v51 = vld [vmem:[#allocation8 + $0x124] ss:$8 sps:$4 sm:$0xff]   ;;  %v7913_v52 = vld [vmem:[#allocation8 + $0x120] ss:$8 sps:$4 sm:$0xff]  }
  0xe9   :  { %3047 = vmatprep.subr.bf16.mxu0 %v7876_v18  ;;  %v7916_v53 = vld [vmem:[#allocation10 + $0xa0] ss:$8 sps:$4 sm:$0xff]   ;;  %v7917_v54 = vld [vmem:[#allocation10 + $0xb4] ss:$8 sps:$4 sm:$0xff]   ;;  %v7919_v57 = vld [vmem:[#allocation8 + $0x130] ss:$8 sps:$4 sm:$0xff]  }
  0xea   :  { %v7921_v55 = vld [vmem:[#allocation8 + $0x134] ss:$8 sps:$4 sm:$0xff]   ;;  %v244_v56 = vld [vmem:[#allocation5] sm:$0xff]  ;;  %v7922_v58 = vld [vmem:[#allocation10 + $0xb0] ss:$8 sps:$4 sm:$0xff]   ;;  %vm6780_vm5 = vcmask 11264  }
  0xeb   :  { %2597 = vmatpush1.bf16.msra.mxu1 %v7878_v19  ;;  %v631_v59 = vrot.slane %v244_v56, %v9671_v38  ;;  %v7923_v60 = vld [vmem:[#allocation10 + $0xc4] ss:$8 sps:$4 sm:$0xff]   ;;  %v7925_v63 = vld [vmem:[#allocation8 + $0x140] ss:$8 sps:$4 sm:$0xff]   ;;  %v7929_v1 = vld [vmem:[#allocation10 + $0xd4] ss:$8 sps:$4 sm:$0xff]   ;;  %v624_v12 = vcombine.high %v244_v56, %v244_v56 }
  0xec   :  { %3048 = vmatpush1.bf16.msra.mxu0 %v7879_v20  ;;  %2598 = vmatprep.subr.bf16.mxu1 %v7880_v21  ;;  %v7927_v61 = vld [vmem:[#allocation8 + $0x144] ss:$8 sps:$4 sm:$0xff]   ;;  %v7933_v2 = vld [vmem:[#allocation8 + $0x154] ss:$8 sps:$4 sm:$0xff]   ;;  %v7931_v3 = vld [vmem:[#allocation8 + $0x150] ss:$8 sps:$4 sm:$0xff]  }
  0xed   :  { %3049 = vmatprep.subr.bf16.mxu0 %v7882_v22  ;;  %v639_v62 = vcombine.high %v631_v59, %v631_v59  ;;  %v7934_v4 = vld [vmem:[#allocation10 + $0xd0] ss:$8 sps:$4 sm:$0xff]   ;;  %v7935_v5 = vld [vmem:[#allocation10 + $0xe4] ss:$8 sps:$4 sm:$0xff]   ;;  %v7937_v7 = vld [vmem:[#allocation8 + $0x160] ss:$8 sps:$4 sm:$0xff]   ;;  %v9677_v18 = vrot.slane %v624_v12, %v9671_v38 }
  0xee   :  { %v7939_v6 = vld [vmem:[#allocation8 + $0x164] ss:$8 sps:$4 sm:$0xff]   ;;  %v7940_v8 = vld [vmem:[#allocation10 + $0xe0] ss:$8 sps:$4 sm:$0xff]   ;;  %v7941_v9 = vld [vmem:[#allocation10 + $0xf4] ss:$8 sps:$4 sm:$0xff]  }
  0xef   :  { %2599 = vmatpush1.bf16.msra.mxu1 %v7884_v23  ;;  %2620 = vmatprep.mubr.bf16.mxu1 %v639_v62  ;;  %v195_v10 = vld [vmem:[#allocation2] sm:$0x3f]  ;;  %v7943_v13 = vld [vmem:[#allocation8 + $0x170] ss:$8 sps:$4 sm:$0xff]   ;;  %v7950_v16 = vld [vmem:[#allocation10 + $0x104] ss:$8 sps:$4 sm:$0xff]   ;;  %v640_v24 = vcombine.high %v9677_v18, %v9677_v18 }
  0xf0   :  { %3050 = vmatpush1.bf16.msra.mxu0 %v7885_v27  ;;  %2600 = vmatprep.subr.bf16.mxu1 %v7886_v28  ;;  %v7945_v11 = vld [vmem:[#allocation8 + $0x174] ss:$8 sps:$4 sm:$0xff]   ;;  %v3081_v14 = vcombine.high %v195_v10, %v195_v10  ;;  %v7946_v15 = vld [vmem:[#allocation10 + $0xf0] ss:$8 sps:$4 sm:$0xff]   ;;  %v7953_v17 = vld [vmem:[#allocation11 + $0x4] ss:$8 sps:$4 sm:$0xff]  }
  0xf1   :  { %3051 = vmatprep.subr.bf16.mxu0 %v7888_v29  ;;  %v7948_v19 = vld [vmem:[#allocation10 + $0x100] ss:$8 sps:$4 sm:$0xff]   ;;  %v7957_v22 = vld [vmem:[#allocation10 + $0x114] ss:$8 sps:$4 sm:$0xff]   ;;  %v7955_v25 = vld [vmem:[#allocation10 + $0x110] ss:$8 sps:$4 sm:$0xff]  }
  0xf2   :  { %v3095_v20 = vrot.slane %v3081_v14, %v9671_v38  ;;  %v7951_v21 = vld [vmem:[#allocation11] ss:$8 sps:$4 sm:$0xff]   ;;  %v7960_v23 = vld [vmem:[#allocation11 + $0x14] ss:$8 sps:$4 sm:$0xff]   ;;  %v7958_v26 = vld [vmem:[#allocation11 + $0x10] ss:$8 sps:$4 sm:$0xff]  }
  0xf3   :  { %2601 = vmatpush1.bf16.msra.mxu1 %v7890_v30  ;;  %v7963_v27 = vld [vmem:[#allocation10 + $0x124] ss:$8 sps:$4 sm:$0xff]   ;;  %v7961_v29 = vld [vmem:[#allocation10 + $0x120] ss:$8 sps:$4 sm:$0xff]   ;;  %v7967_v33 = vld [vmem:[#allocation10 + $0x130] ss:$8 sps:$4 sm:$0xff]  }
  0xf4   :  { %3052 = vmatpush1.bf16.msra.mxu0 %v7891_v31  ;;  %2602 = vmatprep.subr.bf16.mxu1 %v7892_v32  ;;  %v7966_v28 = vld [vmem:[#allocation11 + $0x24] ss:$8 sps:$4 sm:$0xff]   ;;  %v7964_v30 = vld [vmem:[#allocation11 + $0x20] ss:$8 sps:$4 sm:$0xff]   ;;  %v7969_v31 = vld [vmem:[#allocation10 + $0x134] ss:$8 sps:$4 sm:$0xff]  }
  0xf5   :  { %3053 = vmatprep.subr.bf16.mxu0 %v7894_v36  ;;  %v7972_v32 = vld [vmem:[#allocation11 + $0x34] ss:$8 sps:$4 sm:$0xff]   ;;  %v7970_v35 = vld [vmem:[#allocation11 + $0x30] ss:$8 sps:$4 sm:$0xff]   ;;  %v7975_v36 = vld [vmem:[#allocation10 + $0x144] ss:$8 sps:$4 sm:$0xff]  }
  0xf6   :  { %v7973_v39 = vld [vmem:[#allocation10 + $0x140] ss:$8 sps:$4 sm:$0xff]   ;;  %v7999_v56 = vld [vmem:[#allocation10 + $0x184] ss:$8 sps:$4 sm:$0xff]   ;;  %v8003_v62 = vld [vmem:[#allocation10 + $0x190] ss:$8 sps:$4 sm:$0xff]  }
  0xf7   :  { %2603 = vmatpush1.bf16.msra.mxu1 %v7896_v37  ;;  %v7978_v37 = vld [vmem:[#allocation11 + $0x44] ss:$8 sps:$4 sm:$0xff]   ;;  %v8021_v10 = vld [vmem:[#allocation10 + $0x1c0] ss:$8 sps:$4 sm:$0xff]   ;;  %v8029_v12 = vld [vmem:[#allocation10 + $0x1d4] ss:$8 sps:$4 sm:$0xff]  }
  0xf8   :  { %3054 = vmatpush1.bf16.msra.mxu0 %v7897_v40  ;;  %2604 = vmatprep.subr.bf16.mxu1 %v7898_v41  ;;  %v7976_v40 = vld [vmem:[#allocation11 + $0x40] ss:$8 sps:$4 sm:$0xff]   ;;  %v7981_v41 = vld [vmem:[#allocation10 + $0x154] ss:$8 sps:$4 sm:$0xff]   ;;  %v8027_v14 = vld [vmem:[#allocation10 + $0x1d0] ss:$8 sps:$4 sm:$0xff]  }
  0xf9   :  { %3381 = vmatprep.subr.bf16.mxu0 %v7903_v42  ;;  %v7984_v42 = vld [vmem:[#allocation11 + $0x54] ss:$8 sps:$4 sm:$0xff]  }
  0xfb   :  { %3072 = vmatmul.mubr.bf16.vlgmr.msra.gmra.mrb[0].mxu0 %v723_v43  ;;  %2605 = vmatpush1.bf16.msra.mxu1 %v7904_v45  ;;  %v7979_v43 = vld [vmem:[#allocation10 + $0x150] ss:$8 sps:$4 sm:$0xff]   ;;  %v7987_v45 = vld [vmem:[#allocation10 + $0x164] ss:$8 sps:$4 sm:$0xff]  }
  0xfc   :  { %3382 = vmatpush1.bf16.msra.mxu0 %v7901_v44  ;;  %2606 = vmatprep.subr.bf16.mxu1 %v7905_v46  ;;  %v7982_v44 = vld [vmem:[#allocation11 + $0x50] ss:$8 sps:$4 sm:$0xff]   ;;  %v7990_v46 = vld [vmem:[#allocation11 + $0x64] ss:$8 sps:$4 sm:$0xff]  }
  0xfd   :  { %3383 = vmatprep.subr.bf16.mxu0 %v7909_v47  ;;  %3413 = vmatprep.mubr.bf16.mxu0 %v9411_v0  ;;  %v7928_v0 = vld [vmem:[#allocation10 + $0xc0] ss:$8 sps:$4 sm:$0xff]  }
  0xfe   :  { %v7985_v47 = vld [vmem:[#allocation10 + $0x160] ss:$8 sps:$4 sm:$0xff]  }
  0xff   :  { %2607 = vmatpush1.bf16.msra.mxu1 %v7910_v49  ;;  %v9682_v49 = vld [vmem:[#allocation7] sm:$0xff] }
 0x100   :  { %3384 = vmatpush1.bf16.msra.mxu0 %v7907_v48  ;;  %2608 = vmatprep.subr.bf16.mxu1 %v7911_v50  ;;  %v7988_v48 = vld [vmem:[#allocation11 + $0x60] ss:$8 sps:$4 sm:$0xff]   ;;  %v7993_v50 = vld [vmem:[#allocation10 + $0x174] ss:$8 sps:$4 sm:$0xff]  }
 0x101   :  { %3385 = vmatprep.subr.bf16.mxu0 %v7915_v51  ;;  %v9686_v51 = vrot.slane %v9682_v49, %v9671_v38 }
 0x103   :  { %2609 = vmatpush1.bf16.msra.mxu1 %v7916_v53  ;;  %v3833_v53 = vcombine.high %v9686_v51, %v9686_v51 }
 0x104   :  { %3386 = vmatpush1.bf16.msra.mxu0 %v7913_v52  ;;  %2610 = vmatprep.subr.bf16.mxu1 %v7917_v54  ;;  %v7996_v52 = vld [vmem:[#allocation11 + $0x74] ss:$8 sps:$4 sm:$0xff]   ;;  %v7991_v54 = vld [vmem:[#allocation10 + $0x170] ss:$8 sps:$4 sm:$0xff]  }
 0x105   :  { %3387 = vmatprep.subr.bf16.mxu0 %v7921_v55  ;;  %v7994_v55 = vld [vmem:[#allocation11 + $0x70] ss:$8 sps:$4 sm:$0xff]  }
 0x107   :  { %2611 = vmatpush1.bf16.msra.mxu1 %v7922_v58  ;;  %v7997_v58 = vld [vmem:[#allocation10 + $0x180] ss:$8 sps:$4 sm:$0xff]  }
 0x108   :  { %3388 = vmatpush1.bf16.msra.mxu0 %v7919_v57  ;;  %2612 = vmatprep.subr.bf16.mxu1 %v7923_v60  ;;  %v8002_v57 = vld [vmem:[#allocation11 + $0x84] ss:$8 sps:$4 sm:$0xff]   ;;  %v8005_v60 = vld [vmem:[#allocation10 + $0x194] ss:$8 sps:$4 sm:$0xff]  }
 0x109   :  { %3389 = vmatprep.subr.bf16.mxu0 %v7927_v61  ;;  %v8008_v61 = vld [vmem:[#allocation11 + $0x94] ss:$8 sps:$4 sm:$0xff]  }
 0x10b   :  { %2613 = vmatpush1.bf16.msra.mxu1 %v7928_v0  ;;  %v8011_v0 = vld [vmem:[#allocation10 + $0x1a4] ss:$8 sps:$4 sm:$0xff]  }
 0x10c   :  { %3390 = vmatpush1.bf16.msra.mxu0 %v7925_v63  ;;  %2614 = vmatprep.subr.bf16.mxu1 %v7929_v1  ;;  %v8006_v63 = vld [vmem:[#allocation11 + $0x90] ss:$8 sps:$4 sm:$0xff]   ;;  %v8014_v1 = vld [vmem:[#allocation11 + $0xa4] ss:$8 sps:$4 sm:$0xff]  }
 0x10d   :  { %3391 = vmatprep.subr.bf16.mxu0 %v7933_v2  ;;  %v8009_v2 = vld [vmem:[#allocation10 + $0x1a0] ss:$8 sps:$4 sm:$0xff]  }
 0x10f   :  { %2615 = vmatpush1.bf16.msra.mxu1 %v7934_v4  ;;  %v8017_v4 = vld [vmem:[#allocation10 + $0x1b4] ss:$8 sps:$4 sm:$0xff]  }
 0x110   :  { %3392 = vmatpush1.bf16.msra.mxu0 %v7931_v3  ;;  %2616 = vmatprep.subr.bf16.mxu1 %v7935_v5  ;;  %v8012_v3 = vld [vmem:[#allocation11 + $0xa0] ss:$8 sps:$4 sm:$0xff]   ;;  %v8020_v5 = vld [vmem:[#allocation11 + $0xb4] ss:$8 sps:$4 sm:$0xff]  }
 0x111   :  { %3393 = vmatprep.subr.bf16.mxu0 %v7939_v6  ;;  %v8015_v6 = vld [vmem:[#allocation10 + $0x1b0] ss:$8 sps:$4 sm:$0xff]  }
 0x113   :  { %2617 = vmatpush1.bf16.msra.mxu1 %v7940_v8  ;;  %v8023_v8 = vld [vmem:[#allocation10 + $0x1c4] ss:$8 sps:$4 sm:$0xff]  }
 0x114   :  { %3394 = vmatpush1.bf16.msra.mxu0 %v7937_v7  ;;  %2618 = vmatprep.subr.bf16.mxu1 %v7941_v9  ;;  %v8018_v7 = vld [vmem:[#allocation11 + $0xb0] ss:$8 sps:$4 sm:$0xff]   ;;  %v8026_v9 = vld [vmem:[#allocation11 + $0xc4] ss:$8 sps:$4 sm:$0xff]  }
 0x115   :  { %3395 = vmatprep.subr.bf16.mxu0 %v7945_v11  ;;  %v8024_v11 = vld [vmem:[#allocation11 + $0xc0] ss:$8 sps:$4 sm:$0xff]  }
 0x117   :  { %2619 = vmatpush1.bf16.msra.mxu1 %v7946_v15  ;;  %v8030_v15 = vld [vmem:[#allocation11 + $0xd0] ss:$8 sps:$4 sm:$0xff]  }
 0x118   :  { %3396 = vmatpush1.bf16.msra.mxu0 %v7943_v13  ;;  %2629 = vmatprep.subr.bf16.mxu1 %v7950_v16  ;;  %v8032_v13 = vld [vmem:[#allocation11 + $0xd4] ss:$8 sps:$4 sm:$0xff]   ;;  %v8035_v16 = vld [vmem:[#allocation10 + $0x1e4] ss:$8 sps:$4 sm:$0xff]  }
 0x119   :  { %5864 = vmatprep.subr.bf16.mxu0 %v7953_v17  ;;  %v8038_v17 = vld [vmem:[#allocation11 + $0xe4] ss:$8 sps:$4 sm:$0xff]  }
 0x11a   :  { %2621 = vmatmul.mubr.bf16.vlgmr.msra.gmra.mrb[0].mxu1 %v631_v59  ;;  %v8000_v59 = vld [vmem:[#allocation11 + $0x80] ss:$8 sps:$4 sm:$0xff]  }
 0x11b   :  { %3414 = vmatmul.mubr.bf16.vlgmr.msra.gmra.mrb[4].mxu0 %v3095_v20  ;;  %2630 = vmatpush1.bf16.msra.mxu1 %v7948_v19  ;;  %v8033_v19 = vld [vmem:[#allocation10 + $0x1e0] ss:$8 sps:$4 sm:$0xff]  }
 0x11c   :  { %5865 = vmatpush1.bf16.msra.mxu0 %v7951_v21  ;;  %2631 = vmatprep.subr.bf16.mxu1 %v7957_v22  ;;  %v8036_v20 = vld [vmem:[#allocation11 + $0xe0] ss:$8 sps:$4 sm:$0xff]   ;;  %v8041_v21 = vld [vmem:[#allocation10 + $0x1f4] ss:$8 sps:$4 sm:$0xff]  }
 0x11d   :  { %5866 = vmatprep.subr.bf16.mxu0 %v7960_v23  ;;  %2661 = vmatprep.mubr.bf16.mxu1 %v640_v24  ;;  %v8044_v22 = vld [vmem:[#allocation11 + $0xf4] ss:$8 sps:$4 sm:$0xff]   ;;  %v3818_v23 = vcombine.high %v9682_v49, %v9682_v49  ;;  %v8039_v24 = vld [vmem:[#allocation10 + $0x1f0] ss:$8 sps:$4 sm:$0xff]   ;;  %v8074_v49 = vld [vmem:[#allocation11 + $0x144] ss:$8 sps:$4 sm:$0xff]  }
 0x11e   :  { %5896 = vmatprep.mubr.bf16.mxu0 %v3833_v53  ;;  %v8080_v53 = vld [vmem:[#allocation11 + $0x154] ss:$8 sps:$4 sm:$0xff]  }
 0x11f   :  { %2632 = vmatpush1.bf16.msra.mxu1 %v7955_v25  ;;  %v8042_v25 = vld [vmem:[#allocation11 + $0xf0] ss:$8 sps:$4 sm:$0xff]  }
 0x120   :  { %5867 = vmatpush1.bf16.msra.mxu0 %v7958_v26  ;;  %2633 = vmatprep.subr.bf16.mxu1 %v7963_v27  ;;  %v8047_v26 = vld [vmem:[#allocation10 + $0x204] ss:$8 sps:$4 sm:$0xff]  }
 0x121   :  { %5868 = vmatprep.subr.bf16.mxu0 %v7966_v28  ;;  %v8050_v27 = vld [vmem:[#allocation11 + $0x104] ss:$8 sps:$4 sm:$0xff]   ;;  %v9693_v28 = vrot.slane %v3818_v23, %v9671_v38  ;;  %v8123_v23 = vld [vmem:[#allocation10 + $0x2d0] ss:$8 sps:$4 sm:$0xff]  }
 0x123   :  { %2634 = vmatpush1.bf16.msra.mxu1 %v7961_v29  ;;  %v8045_v29 = vld [vmem:[#allocation10 + $0x200] ss:$8 sps:$4 sm:$0xff]  }
 0x124   :  { %5869 = vmatpush1.bf16.msra.mxu0 %v7964_v30  ;;  %2635 = vmatprep.subr.bf16.mxu1 %v7969_v31  ;;  %v8048_v30 = vld [vmem:[#allocation11 + $0x100] ss:$8 sps:$4 sm:$0xff]   ;;  %v8053_v31 = vld [vmem:[#allocation10 + $0x214] ss:$8 sps:$4 sm:$0xff]  }
 0x125   :  { %5870 = vmatprep.subr.bf16.mxu0 %v7972_v32  ;;  %v8056_v32 = vld [vmem:[#allocation11 + $0x114] ss:$8 sps:$4 sm:$0xff]  }
 0x127   :  { %2636 = vmatpush1.bf16.msra.mxu1 %v7967_v33  ;;  %v9695_v33 = vld [vmem:[#allocation5 + $0x8] sm:$0xff] }
 0x128   :  { %5871 = vmatpush1.bf16.msra.mxu0 %v7970_v35  ;;  %2637 = vmatprep.subr.bf16.mxu1 %v7975_v36  ;;  %v9699_v35 = vrot.slane %v9695_v33, %v9671_v38  ;;  %v3834_v36 = vcombine.high %v9693_v28, %v9693_v28 }
 0x129   :  { %5872 = vmatprep.subr.bf16.mxu0 %v7978_v37  ;;  %v8051_v37 = vld [vmem:[#allocation10 + $0x210] ss:$8 sps:$4 sm:$0xff]  }
 0x12b   :  { %2638 = vmatpush1.bf16.msra.mxu1 %v7973_v39  ;;  %v8054_v39 = vld [vmem:[#allocation11 + $0x110] ss:$8 sps:$4 sm:$0xff]  }
 0x12c   :  { %5873 = vmatpush1.bf16.msra.mxu0 %v7976_v40  ;;  %2639 = vmatprep.subr.bf16.mxu1 %v7981_v41  ;;  %v656_v40 = vcombine.high %v9699_v35, %v9699_v35  ;;  %v8059_v41 = vld [vmem:[#allocation10 + $0x224] ss:$8 sps:$4 sm:$0xff]  }
 0x12d   :  { %5874 = vmatprep.subr.bf16.mxu0 %v7984_v42  ;;  %v8062_v42 = vld [vmem:[#allocation11 + $0x124] ss:$8 sps:$4 sm:$0xff]  }
 0x12f   :  { %2640 = vmatpush1.bf16.msra.mxu1 %v7979_v43  ;;  %v8057_v43 = vld [vmem:[#allocation10 + $0x220] ss:$8 sps:$4 sm:$0xff]  }
 0x130   :  { %5875 = vmatpush1.bf16.msra.mxu0 %v7982_v44  ;;  %2641 = vmatprep.subr.bf16.mxu1 %v7987_v45  ;;  %v8060_v44 = vld [vmem:[#allocation11 + $0x120] ss:$8 sps:$4 sm:$0xff]   ;;  %v8068_v45 = vld [vmem:[#allocation11 + $0x134] ss:$8 sps:$4 sm:$0xff]  }
 0x131   :  { %5876 = vmatprep.subr.bf16.mxu0 %v7990_v46  ;;  %v8063_v46 = vld [vmem:[#allocation10 + $0x230] ss:$8 sps:$4 sm:$0xff]  }
 0x133   :  { %2642 = vmatpush1.bf16.msra.mxu1 %v7985_v47  ;;  %v8066_v47 = vld [vmem:[#allocation11 + $0x130] ss:$8 sps:$4 sm:$0xff]  }
 0x134   :  { %5877 = vmatpush1.bf16.msra.mxu0 %v7988_v48  ;;  %2643 = vmatprep.subr.bf16.mxu1 %v7993_v50  ;;  %v8071_v48 = vld [vmem:[#allocation10 + $0x244] ss:$8 sps:$4 sm:$0xff]   ;;  %v8069_v50 = vld [vmem:[#allocation10 + $0x240] ss:$8 sps:$4 sm:$0xff]  }
 0x135   :  { %5878 = vmatprep.subr.bf16.mxu0 %v7996_v52  ;;  %v8077_v52 = vld [vmem:[#allocation10 + $0x254] ss:$8 sps:$4 sm:$0xff]  }
 0x137   :  { %2644 = vmatpush1.bf16.msra.mxu1 %v7991_v54  ;;  %v8075_v54 = vld [vmem:[#allocation10 + $0x250] ss:$8 sps:$4 sm:$0xff]  }
 0x138   :  { %5879 = vmatpush1.bf16.msra.mxu0 %v7994_v55  ;;  %2645 = vmatprep.subr.bf16.mxu1 %v7999_v56  ;;  %v8078_v55 = vld [vmem:[#allocation11 + $0x150] ss:$8 sps:$4 sm:$0xff]   ;;  %v8083_v56 = vld [vmem:[#allocation10 + $0x264] ss:$8 sps:$4 sm:$0xff]  }
 0x139   :  { %5880 = vmatprep.subr.bf16.mxu0 %v8002_v57  ;;  %v8086_v57 = vld [vmem:[#allocation11 + $0x164] ss:$8 sps:$4 sm:$0xff]  }
 0x13b   :  { %2646 = vmatpush1.bf16.msra.mxu1 %v7997_v58  ;;  %v8081_v58 = vld [vmem:[#allocation10 + $0x260] ss:$8 sps:$4 sm:$0xff]  }
 0x13c   :  { %5881 = vmatpush1.bf16.msra.mxu0 %v8000_v59  ;;  %2647 = vmatprep.subr.bf16.mxu1 %v8005_v60  ;;  %v8084_v59 = vld [vmem:[#allocation11 + $0x160] ss:$8 sps:$4 sm:$0xff]   ;;  %v8089_v60 = vld [vmem:[#allocation10 + $0x274] ss:$8 sps:$4 sm:$0xff]  }
 0x13d   :  { %5882 = vmatprep.subr.bf16.mxu0 %v8008_v61  ;;  %v8092_v61 = vld [vmem:[#allocation11 + $0x174] ss:$8 sps:$4 sm:$0xff]  }
 0x13f   :  { %2648 = vmatpush1.bf16.msra.mxu1 %v8003_v62  ;;  %v8087_v62 = vld [vmem:[#allocation10 + $0x270] ss:$8 sps:$4 sm:$0xff]  }
 0x140   :  { %5883 = vmatpush1.bf16.msra.mxu0 %v8006_v63  ;;  %2649 = vmatprep.subr.bf16.mxu1 %v8011_v0  ;;  %v8090_v63 = vld [vmem:[#allocation11 + $0x170] ss:$8 sps:$4 sm:$0xff]   ;;  %v8095_v0 = vld [vmem:[#allocation10 + $0x284] ss:$8 sps:$4 sm:$0xff]  }
 0x141   :  { %5884 = vmatprep.subr.bf16.mxu0 %v8014_v1  ;;  %v8098_v1 = vld [vmem:[#allocation11 + $0x184] ss:$8 sps:$4 sm:$0xff]  }
 0x143   :  { %2650 = vmatpush1.bf16.msra.mxu1 %v8009_v2  ;;  %v8093_v2 = vld [vmem:[#allocation10 + $0x280] ss:$8 sps:$4 sm:$0xff]  }
 0x144   :  { %5885 = vmatpush1.bf16.msra.mxu0 %v8012_v3  ;;  %2651 = vmatprep.subr.bf16.mxu1 %v8017_v4  ;;  %v8096_v3 = vld [vmem:[#allocation11 + $0x180] ss:$8 sps:$4 sm:$0xff]   ;;  %v8101_v4 = vld [vmem:[#allocation10 + $0x294] ss:$8 sps:$4 sm:$0xff]  }
 0x145   :  { %5886 = vmatprep.subr.bf16.mxu0 %v8020_v5  ;;  %v8104_v5 = vld [vmem:[#allocation11 + $0x194] ss:$8 sps:$4 sm:$0xff]  }
 0x147   :  { %2652 = vmatpush1.bf16.msra.mxu1 %v8015_v6  ;;  %v8099_v6 = vld [vmem:[#allocation10 + $0x290] ss:$8 sps:$4 sm:$0xff]  }
 0x148   :  { %5887 = vmatpush1.bf16.msra.mxu0 %v8018_v7  ;;  %2653 = vmatprep.subr.bf16.mxu1 %v8023_v8  ;;  %v8102_v7 = vld [vmem:[#allocation11 + $0x190] ss:$8 sps:$4 sm:$0xff]   ;;  %v8107_v8 = vld [vmem:[#allocation10 + $0x2a4] ss:$8 sps:$4 sm:$0xff]  }
 0x149   :  { %5888 = vmatprep.subr.bf16.mxu0 %v8026_v9  ;;  %v8110_v9 = vld [vmem:[#allocation11 + $0x1a4] ss:$8 sps:$4 sm:$0xff]  }
 0x14b   :  { %2654 = vmatpush1.bf16.msra.mxu1 %v8021_v10  ;;  %v8105_v10 = vld [vmem:[#allocation10 + $0x2a0] ss:$8 sps:$4 sm:$0xff]  }
 0x14c   :  { %5889 = vmatpush1.bf16.msra.mxu0 %v8024_v11  ;;  %2655 = vmatprep.subr.bf16.mxu1 %v8029_v12  ;;  %v8108_v11 = vld [vmem:[#allocation11 + $0x1a0] ss:$8 sps:$4 sm:$0xff]   ;;  %v8113_v12 = vld [vmem:[#allocation10 + $0x2b4] ss:$8 sps:$4 sm:$0xff]  }
 0x14d   :  { %5890 = vmatprep.subr.bf16.mxu0 %v8032_v13  ;;  %v8116_v13 = vld [vmem:[#allocation11 + $0x1b4] ss:$8 sps:$4 sm:$0xff]  }
 0x14f   :  { %2656 = vmatpush1.bf16.msra.mxu1 %v8027_v14  ;;  %v8111_v14 = vld [vmem:[#allocation10 + $0x2b0] ss:$8 sps:$4 sm:$0xff]  }
 0x150   :  { %5891 = vmatpush1.bf16.msra.mxu0 %v8030_v15  ;;  %2657 = vmatprep.subr.bf16.mxu1 %v8035_v16  ;;  %v8114_v15 = vld [vmem:[#allocation11 + $0x1b0] ss:$8 sps:$4 sm:$0xff]   ;;  %v8119_v16 = vld [vmem:[#allocation10 + $0x2c4] ss:$8 sps:$4 sm:$0xff]  }
 0x151   :  { %5892 = vmatprep.subr.bf16.mxu0 %v8038_v17  ;;  %v8122_v17 = vld [vmem:[#allocation11 + $0x1c4] ss:$8 sps:$4 sm:$0xff]  }
 0x153   :  { %2658 = vmatpush1.bf16.msra.mxu1 %v8033_v19  ;;  %v8117_v19 = vld [vmem:[#allocation10 + $0x2c0] ss:$8 sps:$4 sm:$0xff]  }
 0x154   :  { %5893 = vmatpush1.bf16.msra.mxu0 %v8036_v20  ;;  %2659 = vmatprep.subr.bf16.mxu1 %v8041_v21  ;;  %v8120_v20 = vld [vmem:[#allocation11 + $0x1c0] ss:$8 sps:$4 sm:$0xff]   ;;  %v8125_v21 = vld [vmem:[#allocation10 + $0x2d4] ss:$8 sps:$4 sm:$0xff]  }
 0x155   :  { %5894 = vmatprep.subr.bf16.mxu0 %v8044_v22  ;;  %v8128_v22 = vld [vmem:[#allocation11 + $0x1d4] ss:$8 sps:$4 sm:$0xff]  }
 0x157   :  { %2660 = vmatpush1.bf16.msra.mxu1 %v8039_v24  ;;  %v8126_v24 = vld [vmem:[#allocation11 + $0x1d0] ss:$8 sps:$4 sm:$0xff]  }
 0x158   :  { %5895 = vmatpush1.bf16.msra.mxu0 %v8042_v25  ;;  %2670 = vmatprep.subr.bf16.mxu1 %v8047_v26  ;;  %v8131_v25 = vld [vmem:[#allocation10 + $0x2e4] ss:$8 sps:$4 sm:$0xff]  }
 0x159   :  { %5905 = vmatprep.subr.bf16.mxu0 %v8050_v27  ;;  %v8134_v26 = vld [vmem:[#allocation11 + $0x1e4] ss:$8 sps:$4 sm:$0xff]   ;;  %v8129_v27 = vld [vmem:[#allocation10 + $0x2e0] ss:$8 sps:$4 sm:$0xff]  }
 0x15a   :  { %2662 = vmatmul.mubr.bf16.vlgmr.msra.gmra.mrb[0].mxu1 %v9677_v18  ;;  %v8065_v18 = vld [vmem:[#allocation10 + $0x234] ss:$8 sps:$4 sm:$0xff]  }
 0x15b   :  { %5897 = vmatmul.mubr.bf16.vlgmr.msra.gmra.mrb[4].mxu0 %v9686_v51  ;;  %2671 = vmatpush1.bf16.msra.mxu1 %v8045_v29  ;;  %v8072_v51 = vld [vmem:[#allocation11 + $0x140] ss:$8 sps:$4 sm:$0xff]  }
 0x15c   :  { %5906 = vmatpush1.bf16.msra.mxu0 %v8048_v30  ;;  %2672 = vmatprep.subr.bf16.mxu1 %v8053_v31  ;;  %v8132_v29 = vld [vmem:[#allocation11 + $0x1e0] ss:$8 sps:$4 sm:$0xff]   ;;  %v8137_v30 = vld [vmem:[#allocation10 + $0x2f4] ss:$8 sps:$4 sm:$0xff]  }
 0x15d   :  { %5907 = vmatprep.subr.bf16.mxu0 %v8056_v32  ;;  %2702 = vmatprep.mubr.bf16.mxu1 %v656_v40  ;;  %v8140_v31 = vld [vmem:[#allocation11 + $0x1f4] ss:$8 sps:$4 sm:$0xff]   ;;  %v641_v32 = vcombine.high %v9695_v33, %v9695_v33  ;;  %v8143_v40 = vld [vmem:[#allocation10 + $0x304] ss:$8 sps:$4 sm:$0xff]   ;;  %v8141_v33 = vld [vmem:[#allocation10 + $0x300] ss:$8 sps:$4 sm:$0xff]  }
 0x15e   :  { %5937 = vmatprep.mubr.bf16.mxu0 %v3834_v36  ;;  %v9709_v36 = vld [vmem:[#allocation7 + $0x8] sm:$0xff] }
 0x15f   :  { %2673 = vmatpush1.bf16.msra.mxu1 %v8051_v37  ;;  %v8135_v37 = vld [vmem:[#allocation10 + $0x2f0] ss:$8 sps:$4 sm:$0xff]  }
 0x160   :  { %5908 = vmatpush1.bf16.msra.mxu0 %v8054_v39  ;;  %2674 = vmatprep.subr.bf16.mxu1 %v8059_v41  ;;  %v8138_v39 = vld [vmem:[#allocation11 + $0x1f0] ss:$8 sps:$4 sm:$0xff]   ;;  %v8147_v41 = vld [vmem:[#allocation11 + $0x204] ss:$8 sps:$4 sm:$0xff]  }
 0x161   :  { %5909 = vmatprep.subr.bf16.mxu0 %v8062_v42  ;;  %v9712_v42 = vrot.slane %v641_v32, %v9671_v38  ;;  %v8220_v32 = vld [vmem:[#allocation10 + $0x3d0] ss:$8 sps:$4 sm:$0xff]  }
 0x163   :  { %2675 = vmatpush1.bf16.msra.mxu1 %v8057_v43  ;;  %v9716_v43 = vrot.slane %v9709_v36, %v9671_v38 }
 0x164   :  { %5910 = vmatpush1.bf16.msra.mxu0 %v8060_v44  ;;  %2676 = vmatprep.subr.bf16.mxu1 %v8065_v18  ;;  %v8145_v44 = vld [vmem:[#allocation11 + $0x200] ss:$8 sps:$4 sm:$0xff]   ;;  %v8150_v18 = vld [vmem:[#allocation10 + $0x314] ss:$8 sps:$4 sm:$0xff]  }
 0x165   :  { %5911 = vmatprep.subr.bf16.mxu0 %v8068_v45  ;;  %v8153_v45 = vld [vmem:[#allocation11 + $0x214] ss:$8 sps:$4 sm:$0xff]  }
 0x167   :  { %2677 = vmatpush1.bf16.msra.mxu1 %v8063_v46  ;;  %v657_v46 = vcombine.high %v9712_v42, %v9712_v42 }
 0x168   :  { %5912 = vmatpush1.bf16.msra.mxu0 %v8066_v47  ;;  %2678 = vmatprep.subr.bf16.mxu1 %v8071_v48  ;;  %v3850_v47 = vcombine.high %v9716_v43, %v9716_v43  ;;  %v8148_v48 = vld [vmem:[#allocation10 + $0x310] ss:$8 sps:$4 sm:$0xff]  }
 0x169   :  { %5913 = vmatprep.subr.bf16.mxu0 %v8074_v49  ;;  %v8151_v49 = vld [vmem:[#allocation11 + $0x210] ss:$8 sps:$4 sm:$0xff]  }
 0x16b   :  { %2679 = vmatpush1.bf16.msra.mxu1 %v8069_v50  ;;  %v8156_v50 = vld [vmem:[#allocation10 + $0x324] ss:$8 sps:$4 sm:$0xff]  }
 0x16c   :  { %5914 = vmatpush1.bf16.msra.mxu0 %v8072_v51  ;;  %2680 = vmatprep.subr.bf16.mxu1 %v8077_v52  ;;  %v8159_v51 = vld [vmem:[#allocation11 + $0x224] ss:$8 sps:$4 sm:$0xff]   ;;  %v8154_v52 = vld [vmem:[#allocation10 + $0x320] ss:$8 sps:$4 sm:$0xff]  }
 0x16d   :  { %5915 = vmatprep.subr.bf16.mxu0 %v8080_v53  ;;  %v8157_v53 = vld [vmem:[#allocation11 + $0x220] ss:$8 sps:$4 sm:$0xff]  }
 0x16f   :  { %2681 = vmatpush1.bf16.msra.mxu1 %v8075_v54  ;;  %v8162_v54 = vld [vmem:[#allocation10 + $0x334] ss:$8 sps:$4 sm:$0xff]  }
 0x170   :  { %5916 = vmatpush1.bf16.msra.mxu0 %v8078_v55  ;;  %2682 = vmatprep.subr.bf16.mxu1 %v8083_v56  ;;  %v8163_v55 = vld [vmem:[#allocation11 + $0x230] ss:$8 sps:$4 sm:$0xff]   ;;  %v8168_v56 = vld [vmem:[#allocation10 + $0x344] ss:$8 sps:$4 sm:$0xff]  }
 0x171   :  { %5917 = vmatprep.subr.bf16.mxu0 %v8086_v57  ;;  %v8171_v57 = vld [vmem:[#allocation11 + $0x244] ss:$8 sps:$4 sm:$0xff]  }
 0x173   :  { %2683 = vmatpush1.bf16.msra.mxu1 %v8081_v58  ;;  %v8166_v58 = vld [vmem:[#allocation10 + $0x340] ss:$8 sps:$4 sm:$0xff]  }
 0x174   :  { %5918 = vmatpush1.bf16.msra.mxu0 %v8084_v59  ;;  %2684 = vmatprep.subr.bf16.mxu1 %v8089_v60  ;;  %v8169_v59 = vld [vmem:[#allocation11 + $0x240] ss:$8 sps:$4 sm:$0xff]   ;;  %v8174_v60 = vld [vmem:[#allocation10 + $0x354] ss:$8 sps:$4 sm:$0xff]  }
 0x175   :  { %5919 = vmatprep.subr.bf16.mxu0 %v8092_v61  ;;  %v8177_v61 = vld [vmem:[#allocation11 + $0x254] ss:$8 sps:$4 sm:$0xff]  }
 0x177   :  { %2685 = vmatpush1.bf16.msra.mxu1 %v8087_v62  ;;  %v8172_v62 = vld [vmem:[#allocation10 + $0x350] ss:$8 sps:$4 sm:$0xff]  }
 0x178   :  { %5920 = vmatpush1.bf16.msra.mxu0 %v8090_v63  ;;  %2686 = vmatprep.subr.bf16.mxu1 %v8095_v0  ;;  %v8175_v63 = vld [vmem:[#allocation11 + $0x250] ss:$8 sps:$4 sm:$0xff]   ;;  %v8180_v0 = vld [vmem:[#allocation10 + $0x364] ss:$8 sps:$4 sm:$0xff]  }
 0x179   :  { %5921 = vmatprep.subr.bf16.mxu0 %v8098_v1  ;;  %v8183_v1 = vld [vmem:[#allocation11 + $0x264] ss:$8 sps:$4 sm:$0xff]  }
 0x17b   :  { %2687 = vmatpush1.bf16.msra.mxu1 %v8093_v2  ;;  %v8178_v2 = vld [vmem:[#allocation10 + $0x360] ss:$8 sps:$4 sm:$0xff]  }
 0x17c   :  { %5922 = vmatpush1.bf16.msra.mxu0 %v8096_v3  ;;  %2688 = vmatprep.subr.bf16.mxu1 %v8101_v4  ;;  %v8181_v3 = vld [vmem:[#allocation11 + $0x260] ss:$8 sps:$4 sm:$0xff]   ;;  %v8186_v4 = vld [vmem:[#allocation10 + $0x374] ss:$8 sps:$4 sm:$0xff]  }
 0x17d   :  { %5923 = vmatprep.subr.bf16.mxu0 %v8104_v5  ;;  %v8189_v5 = vld [vmem:[#allocation11 + $0x274] ss:$8 sps:$4 sm:$0xff]  }
 0x17f   :  { %2689 = vmatpush1.bf16.msra.mxu1 %v8099_v6  ;;  %v8184_v6 = vld [vmem:[#allocation10 + $0x370] ss:$8 sps:$4 sm:$0xff]  }
 0x180   :  { %5924 = vmatpush1.bf16.msra.mxu0 %v8102_v7  ;;  %2690 = vmatprep.subr.bf16.mxu1 %v8107_v8  ;;  %v8187_v7 = vld [vmem:[#allocation11 + $0x270] ss:$8 sps:$4 sm:$0xff]   ;;  %v8192_v8 = vld [vmem:[#allocation10 + $0x384] ss:$8 sps:$4 sm:$0xff]  }
 0x181   :  { %5925 = vmatprep.subr.bf16.mxu0 %v8110_v9  ;;  %v8195_v9 = vld [vmem:[#allocation11 + $0x284] ss:$8 sps:$4 sm:$0xff]  }
 0x183   :  { %2691 = vmatpush1.bf16.msra.mxu1 %v8105_v10  ;;  %v8190_v10 = vld [vmem:[#allocation10 + $0x380] ss:$8 sps:$4 sm:$0xff]  }
 0x184   :  { %5926 = vmatpush1.bf16.msra.mxu0 %v8108_v11  ;;  %2692 = vmatprep.subr.bf16.mxu1 %v8113_v12  ;;  %v8193_v11 = vld [vmem:[#allocation11 + $0x280] ss:$8 sps:$4 sm:$0xff]   ;;  %v8198_v12 = vld [vmem:[#allocation10 + $0x394] ss:$8 sps:$4 sm:$0xff]  }
 0x185   :  { %5927 = vmatprep.subr.bf16.mxu0 %v8116_v13  ;;  %v8201_v13 = vld [vmem:[#allocation11 + $0x294] ss:$8 sps:$4 sm:$0xff]  }
 0x187   :  { %2693 = vmatpush1.bf16.msra.mxu1 %v8111_v14  ;;  %v8196_v14 = vld [vmem:[#allocation10 + $0x390] ss:$8 sps:$4 sm:$0xff]  }
 0x188   :  { %5928 = vmatpush1.bf16.msra.mxu0 %v8114_v15  ;;  %2694 = vmatprep.subr.bf16.mxu1 %v8119_v16  ;;  %v8199_v15 = vld [vmem:[#allocation11 + $0x290] ss:$8 sps:$4 sm:$0xff]   ;;  %v8204_v16 = vld [vmem:[#allocation10 + $0x3a4] ss:$8 sps:$4 sm:$0xff]  }
 0x189   :  { %5929 = vmatprep.subr.bf16.mxu0 %v8122_v17  ;;  %v8207_v17 = vld [vmem:[#allocation11 + $0x2a4] ss:$8 sps:$4 sm:$0xff]  }
 0x18b   :  { %2695 = vmatpush1.bf16.msra.mxu1 %v8117_v19  ;;  %v8202_v19 = vld [vmem:[#allocation10 + $0x3a0] ss:$8 sps:$4 sm:$0xff]  }
 0x18c   :  { %5930 = vmatpush1.bf16.msra.mxu0 %v8120_v20  ;;  %2696 = vmatprep.subr.bf16.mxu1 %v8125_v21  ;;  %v8205_v20 = vld [vmem:[#allocation11 + $0x2a0] ss:$8 sps:$4 sm:$0xff]   ;;  %v8210_v21 = vld [vmem:[#allocation10 + $0x3b4] ss:$8 sps:$4 sm:$0xff]  }
 0x18d   :  { %5931 = vmatprep.subr.bf16.mxu0 %v8128_v22  ;;  %v8213_v22 = vld [vmem:[#allocation11 + $0x2b4] ss:$8 sps:$4 sm:$0xff]  }
 0x18f   :  { %2697 = vmatpush1.bf16.msra.mxu1 %v8123_v23  ;;  %v8208_v23 = vld [vmem:[#allocation10 + $0x3b0] ss:$8 sps:$4 sm:$0xff]  }
 0x190   :  { %5932 = vmatpush1.bf16.msra.mxu0 %v8126_v24  ;;  %2698 = vmatprep.subr.bf16.mxu1 %v8131_v25  ;;  %v8211_v24 = vld [vmem:[#allocation11 + $0x2b0] ss:$8 sps:$4 sm:$0xff]   ;;  %v8216_v25 = vld [vmem:[#allocation10 + $0x3c4] ss:$8 sps:$4 sm:$0xff]  }
 0x191   :  { %5933 = vmatprep.subr.bf16.mxu0 %v8134_v26  ;;  %v8219_v26 = vld [vmem:[#allocation11 + $0x2c4] ss:$8 sps:$4 sm:$0xff]  }
 0x193   :  { %2699 = vmatpush1.bf16.msra.mxu1 %v8129_v27  ;;  %v8214_v27 = vld [vmem:[#allocation10 + $0x3c0] ss:$8 sps:$4 sm:$0xff]  }
 0x194   :  { %5934 = vmatpush1.bf16.msra.mxu0 %v8132_v29  ;;  %2700 = vmatprep.subr.bf16.mxu1 %v8137_v30  ;;  %v8217_v29 = vld [vmem:[#allocation11 + $0x2c0] ss:$8 sps:$4 sm:$0xff]   ;;  %v8222_v30 = vld [vmem:[#allocation10 + $0x3d4] ss:$8 sps:$4 sm:$0xff]  }
 0x195   :  { %5935 = vmatprep.subr.bf16.mxu0 %v8140_v31  ;;  %v8225_v31 = vld [vmem:[#allocation11 + $0x2d4] ss:$8 sps:$4 sm:$0xff]  }
 0x197   :  { %2701 = vmatpush1.bf16.msra.mxu1 %v8135_v37  ;;  %v8223_v37 = vld [vmem:[#allocation11 + $0x2d0] ss:$8 sps:$4 sm:$0xff]  }
 0x198   :  { %5936 = vmatpush1.bf16.msra.mxu0 %v8138_v39  ;;  %2711 = vmatprep.subr.bf16.mxu1 %v8143_v40  ;;  %v8228_v39 = vld [vmem:[#allocation10 + $0x3e4] ss:$8 sps:$4 sm:$0xff]  }
 0x199   :  { %5946 = vmatprep.subr.bf16.mxu0 %v8147_v41  ;;  %v8231_v40 = vld [vmem:[#allocation11 + $0x2e4] ss:$8 sps:$4 sm:$0xff]  }
 0x19a   :  { %2703 = vmatmul.mubr.bf16.vlgmr.msra.gmra.mrb[0].mxu1 %v9699_v35  ;;  %v8165_v35 = vld [vmem:[#allocation11 + $0x234] ss:$8 sps:$4 sm:$0xff]  }
 0x19b   :  { %5938 = vmatmul.mubr.bf16.vlgmr.msra.gmra.mrb[4].mxu0 %v9693_v28  ;;  %2712 = vmatpush1.bf16.msra.mxu1 %v8141_v33  ;;  %v8160_v28 = vld [vmem:[#allocation10 + $0x330] ss:$8 sps:$4 sm:$0xff]  }
 0x19c   :  { %5947 = vmatpush1.bf16.msra.mxu0 %v8145_v44  ;;  %2713 = vmatprep.subr.bf16.mxu1 %v8150_v18  ;;  %v8226_v44 = vld [vmem:[#allocation10 + $0x3e0] ss:$8 sps:$4 sm:$0xff]  }
 0x19d   :  { %5948 = vmatprep.subr.bf16.mxu0 %v8153_v45  ;;  %2743 = vmatprep.mubr.bf16.mxu1 %v657_v46  ;;  %v8229_v45 = vld [vmem:[#allocation11 + $0x2e0] ss:$8 sps:$4 sm:$0xff]   ;;  %v8234_v46 = vld [vmem:[#allocation10 + $0x3f4] ss:$8 sps:$4 sm:$0xff]  }
 0x19e   :  { %5978 = vmatprep.mubr.bf16.mxu0 %v3850_v47 }
 0x19f   :  { %2714 = vmatpush1.bf16.msra.mxu1 %v8148_v48  ;;  %v8237_v48 = vld [vmem:[#allocation11 + $0x2f4] ss:$8 sps:$4 sm:$0xff]  }
 0x1a0   :  { %5949 = vmatpush1.bf16.msra.mxu0 %v8151_v49  ;;  %2715 = vmatprep.subr.bf16.mxu1 %v8156_v50  ;;  %v3835_v49 = vcombine.high %v9709_v36, %v9709_v36  ;;  %v8232_v50 = vld [vmem:[#allocation10 + $0x3f0] ss:$8 sps:$4 sm:$0xff]   ;;  %v8242_v36 = vld [vmem:[#allocation11 + $0x300] ss:$8 sps:$4 sm:$0xff]  }
 0x1a1   :  { %5950 = vmatprep.subr.bf16.mxu0 %v8159_v51  ;;  %v9730_v51 = vld [vmem:[#allocation5 + $0x10] sm:$0xff] }
 0x1a3   :  { %2716 = vmatpush1.bf16.msra.mxu1 %v8154_v52  ;;  %v8235_v52 = vld [vmem:[#allocation11 + $0x2f0] ss:$8 sps:$4 sm:$0xff]  }
 0x1a4   :  { %5951 = vmatpush1.bf16.msra.mxu0 %v8157_v53  ;;  %2717 = vmatprep.subr.bf16.mxu1 %v8162_v54  ;;  %v8241_v53 = vld [vmem:[#allocation10 + $0x404] ss:$8 sps:$4 sm:$0xff]  }
 0x1a5   :  { %5952 = vmatprep.subr.bf16.mxu0 %v8165_v35  ;;  %v8244_v54 = vld [vmem:[#allocation11 + $0x304] ss:$8 sps:$4 sm:$0xff]   ;;  %v9734_v35 = vrot.slane %v9730_v51, %v9671_v38 }
 0x1a7   :  { %2718 = vmatpush1.bf16.msra.mxu1 %v8160_v28  ;;  %v9737_v28 = vrot.slane %v3835_v49, %v9671_v38  ;;  %v8319_v49 = vld [vmem:[#allocation10 + $0x4d4] ss:$8 sps:$4 sm:$0xff]  }
 0x1a8   :  { %5953 = vmatpush1.bf16.msra.mxu0 %v8163_v55  ;;  %2719 = vmatprep.subr.bf16.mxu1 %v8168_v56  ;;  %v8239_v55 = vld [vmem:[#allocation10 + $0x400] ss:$8 sps:$4 sm:$0xff]   ;;  %v8247_v56 = vld [vmem:[#allocation10 + $0x414] ss:$8 sps:$4 sm:$0xff]  }
 0x1a9   :  { %5954 = vmatprep.subr.bf16.mxu0 %v8171_v57  ;;  %v8250_v57 = vld [vmem:[#allocation11 + $0x314] ss:$8 sps:$4 sm:$0xff]  }
 0x1ab   :  { %2720 = vmatpush1.bf16.msra.mxu1 %v8166_v58  ;;  %v673_v58 = vcombine.high %v9734_v35, %v9734_v35 }
 0x1ac   :  { %5955 = vmatpush1.bf16.msra.mxu0 %v8169_v59  ;;  %2721 = vmatprep.subr.bf16.mxu1 %v8174_v60  ;;  %v3851_v59 = vcombine.high %v9737_v28, %v9737_v28  ;;  %v8245_v60 = vld [vmem:[#allocation10 + $0x410] ss:$8 sps:$4 sm:$0xff]  }
 0x1ad   :  { %5956 = vmatprep.subr.bf16.mxu0 %v8177_v61  ;;  %v8248_v61 = vld [vmem:[#allocation11 + $0x310] ss:$8 sps:$4 sm:$0xff]  }
 0x1af   :  { %2722 = vmatpush1.bf16.msra.mxu1 %v8172_v62  ;;  %v8253_v62 = vld [vmem:[#allocation10 + $0x424] ss:$8 sps:$4 sm:$0xff]  }
 0x1b0   :  { %5957 = vmatpush1.bf16.msra.mxu0 %v8175_v63  ;;  %2723 = vmatprep.subr.bf16.mxu1 %v8180_v0  ;;  %v8256_v63 = vld [vmem:[#allocation11 + $0x324] ss:$8 sps:$4 sm:$0xff]   ;;  %v8251_v0 = vld [vmem:[#allocation10 + $0x420] ss:$8 sps:$4 sm:$0xff]  }
 0x1b1   :  { %5958 = vmatprep.subr.bf16.mxu0 %v8183_v1  ;;  %v8254_v1 = vld [vmem:[#allocation11 + $0x320] ss:$8 sps:$4 sm:$0xff]  }
 0x1b3   :  { %2724 = vmatpush1.bf16.msra.mxu1 %v8178_v2  ;;  %v8259_v2 = vld [vmem:[#allocation10 + $0x434] ss:$8 sps:$4 sm:$0xff]  }
 0x1b4   :  { %5959 = vmatpush1.bf16.msra.mxu0 %v8181_v3  ;;  %2725 = vmatprep.subr.bf16.mxu1 %v8186_v4  ;;  %v8260_v3 = vld [vmem:[#allocation11 + $0x330] ss:$8 sps:$4 sm:$0xff]   ;;  %v8265_v4 = vld [vmem:[#allocation10 + $0x444] ss:$8 sps:$4 sm:$0xff]  }
 0x1b5   :  { %5960 = vmatprep.subr.bf16.mxu0 %v8189_v5  ;;  %v8268_v5 = vld [vmem:[#allocation11 + $0x344] ss:$8 sps:$4 sm:$0xff]  }
 0x1b7   :  { %2726 = vmatpush1.bf16.msra.mxu1 %v8184_v6  ;;  %v8263_v6 = vld [vmem:[#allocation10 + $0x440] ss:$8 sps:$4 sm:$0xff]  }
 0x1b8   :  { %5961 = vmatpush1.bf16.msra.mxu0 %v8187_v7  ;;  %2727 = vmatprep.subr.bf16.mxu1 %v8192_v8  ;;  %v8266_v7 = vld [vmem:[#allocation11 + $0x340] ss:$8 sps:$4 sm:$0xff]   ;;  %v8271_v8 = vld [vmem:[#allocation10 + $0x454] ss:$8 sps:$4 sm:$0xff]  }
 0x1b9   :  { %5962 = vmatprep.subr.bf16.mxu0 %v8195_v9  ;;  %v8274_v9 = vld [vmem:[#allocation11 + $0x354] ss:$8 sps:$4 sm:$0xff]  }
 0x1bb   :  { %2728 = vmatpush1.bf16.msra.mxu1 %v8190_v10  ;;  %v8269_v10 = vld [vmem:[#allocation10 + $0x450] ss:$8 sps:$4 sm:$0xff]  }
 0x1bc   :  { %5963 = vmatpush1.bf16.msra.mxu0 %v8193_v11  ;;  %2729 = vmatprep.subr.bf16.mxu1 %v8198_v12  ;;  %v8272_v11 = vld [vmem:[#allocation11 + $0x350] ss:$8 sps:$4 sm:$0xff]   ;;  %v8277_v12 = vld [vmem:[#allocation10 + $0x464] ss:$8 sps:$4 sm:$0xff]  }
 0x1bd   :  { %5964 = vmatprep.subr.bf16.mxu0 %v8201_v13  ;;  %v8280_v13 = vld [vmem:[#allocation11 + $0x364] ss:$8 sps:$4 sm:$0xff]  }
 0x1bf   :  { %2730 = vmatpush1.bf16.msra.mxu1 %v8196_v14  ;;  %v8275_v14 = vld [vmem:[#allocation10 + $0x460] ss:$8 sps:$4 sm:$0xff]  }
 0x1c0   :  { %5965 = vmatpush1.bf16.msra.mxu0 %v8199_v15  ;;  %2731 = vmatprep.subr.bf16.mxu1 %v8204_v16  ;;  %v8278_v15 = vld [vmem:[#allocation11 + $0x360] ss:$8 sps:$4 sm:$0xff]   ;;  %v8283_v16 = vld [vmem:[#allocation10 + $0x474] ss:$8 sps:$4 sm:$0xff]  }
 0x1c1   :  { %5966 = vmatprep.subr.bf16.mxu0 %v8207_v17  ;;  %v8286_v17 = vld [vmem:[#allocation11 + $0x374] ss:$8 sps:$4 sm:$0xff]  }
 0x1c3   :  { %2732 = vmatpush1.bf16.msra.mxu1 %v8202_v19  ;;  %v8281_v19 = vld [vmem:[#allocation10 + $0x470] ss:$8 sps:$4 sm:$0xff]  }
 0x1c4   :  { %5967 = vmatpush1.bf16.msra.mxu0 %v8205_v20  ;;  %2733 = vmatprep.subr.bf16.mxu1 %v8210_v21  ;;  %v8284_v20 = vld [vmem:[#allocation11 + $0x370] ss:$8 sps:$4 sm:$0xff]   ;;  %v8289_v21 = vld [vmem:[#allocation10 + $0x484] ss:$8 sps:$4 sm:$0xff]  }
 0x1c5   :  { %5968 = vmatprep.subr.bf16.mxu0 %v8213_v22  ;;  %v8292_v22 = vld [vmem:[#allocation11 + $0x384] ss:$8 sps:$4 sm:$0xff]  }
 0x1c7   :  { %2734 = vmatpush1.bf16.msra.mxu1 %v8208_v23  ;;  %v8287_v23 = vld [vmem:[#allocation10 + $0x480] ss:$8 sps:$4 sm:$0xff]  }
 0x1c8   :  { %5969 = vmatpush1.bf16.msra.mxu0 %v8211_v24  ;;  %2735 = vmatprep.subr.bf16.mxu1 %v8216_v25  ;;  %v8290_v24 = vld [vmem:[#allocation11 + $0x380] ss:$8 sps:$4 sm:$0xff]   ;;  %v8295_v25 = vld [vmem:[#allocation10 + $0x494] ss:$8 sps:$4 sm:$0xff]  }
 0x1c9   :  { %5970 = vmatprep.subr.bf16.mxu0 %v8219_v26  ;;  %v8298_v26 = vld [vmem:[#allocation11 + $0x394] ss:$8 sps:$4 sm:$0xff]  }
 0x1cb   :  { %2736 = vmatpush1.bf16.msra.mxu1 %v8214_v27  ;;  %v8293_v27 = vld [vmem:[#allocation10 + $0x490] ss:$8 sps:$4 sm:$0xff]  }
 0x1cc   :  { %5971 = vmatpush1.bf16.msra.mxu0 %v8217_v29  ;;  %2737 = vmatprep.subr.bf16.mxu1 %v8222_v30  ;;  %v8296_v29 = vld [vmem:[#allocation11 + $0x390] ss:$8 sps:$4 sm:$0xff]   ;;  %v8301_v30 = vld [vmem:[#allocation10 + $0x4a4] ss:$8 sps:$4 sm:$0xff]  }
 0x1cd   :  { %5972 = vmatprep.subr.bf16.mxu0 %v8225_v31  ;;  %v8304_v31 = vld [vmem:[#allocation11 + $0x3a4] ss:$8 sps:$4 sm:$0xff]  }
 0x1ce   :  { %v9724_v41 = vpop.f32.mrb[0].mxu0 }
 0x1cf   :  { %v9726_v33 = vpop.f32.mrb[1].mxu0  ;;  %2738 = vmatpush1.bf16.msra.mxu1 %v8220_v32  ;;  %v8299_v32 = vld [vmem:[#allocation10 + $0x4a0] ss:$8 sps:$4 sm:$0xff]  }
 0x1d0   :  { %v3077_v18 = vpop.f32.mrb[2].mxu0  ;;  %5973 = vmatpush1.bf16.msra.mxu0 %v8223_v37  ;;  %2739 = vmatprep.subr.bf16.mxu1 %v8228_v39  ;;  %v8302_v37 = vld [vmem:[#allocation11 + $0x3a0] ss:$8 sps:$4 sm:$0xff]   ;;  %v8307_v39 = vld [vmem:[#allocation10 + $0x4b4] ss:$8 sps:$4 sm:$0xff]  }
 0x1d1   :  { %v3078_v47 = vpop.f32.mrb[3].mxu0  ;;  %5974 = vmatprep.subr.bf16.mxu0 %v8231_v40  ;;  %v8310_v40 = vld [vmem:[#allocation11 + $0x3b4] ss:$8 sps:$4 sm:$0xff]   ;;  %v8308_v18 = vld [vmem:[#allocation11 + $0x3b0] ss:$8 sps:$4 sm:$0xff]  }
 0x1d2   :  { %v8311_v47 = vld [vmem:[#allocation10 + $0x4c0] ss:$8 sps:$4 sm:$0xff]  }
 0x1d3   :  { %2740 = vmatpush1.bf16.msra.mxu1 %v8226_v44  ;;  %v8305_v44 = vld [vmem:[#allocation10 + $0x4b0] ss:$8 sps:$4 sm:$0xff]  }
 0x1d4   :  { %5975 = vmatpush1.bf16.msra.mxu0 %v8229_v45  ;;  %2741 = vmatprep.subr.bf16.mxu1 %v8234_v46  ;;  %v8313_v45 = vld [vmem:[#allocation10 + $0x4c4] ss:$8 sps:$4 sm:$0xff]  }
 0x1d5   :  { %5976 = vmatprep.subr.bf16.mxu0 %v8237_v48  ;;  %v8316_v46 = vld [vmem:[#allocation11 + $0x3c4] ss:$8 sps:$4 sm:$0xff]   ;;  %v8314_v48 = vld [vmem:[#allocation11 + $0x3c0] ss:$8 sps:$4 sm:$0xff]  }
 0x1d7   :  { %2742 = vmatpush1.bf16.msra.mxu1 %v8232_v50  ;;  %v8322_v50 = vld [vmem:[#allocation11 + $0x3d4] ss:$8 sps:$4 sm:$0xff]  }
 0x1d8   :  { %5977 = vmatpush1.bf16.msra.mxu0 %v8235_v52  ;;  %2752 = vmatprep.subr.bf16.mxu1 %v8241_v53  ;;  %v8317_v52 = vld [vmem:[#allocation10 + $0x4d0] ss:$8 sps:$4 sm:$0xff]  }
 0x1d9   :  { %5987 = vmatprep.subr.bf16.mxu0 %v8244_v54  ;;  %v8320_v53 = vld [vmem:[#allocation11 + $0x3d0] ss:$8 sps:$4 sm:$0xff]   ;;  %v8325_v54 = vld [vmem:[#allocation10 + $0x4e4] ss:$8 sps:$4 sm:$0xff]  }
 0x1da   :  { %2744 = vmatmul.mubr.bf16.vlgmr.msra.gmra.mrb[0].mxu1 %v9712_v42  ;;  %v8262_v42 = vld [vmem:[#allocation11 + $0x334] ss:$8 sps:$4 sm:$0xff]  }
 0x1db   :  { %5979 = vmatmul.mubr.bf16.vlgmr.msra.gmra.mrb[4].mxu0 %v9716_v43  ;;  %2753 = vmatpush1.bf16.msra.mxu1 %v8239_v55  ;;  %v8257_v43 = vld [vmem:[#allocation10 + $0x430] ss:$8 sps:$4 sm:$0xff]   ;;  %v8328_v55 = vld [vmem:[#allocation11 + $0x3e4] ss:$8 sps:$4 sm:$0xff]  }
 0x1dc   :  { %5988 = vmatpush1.bf16.msra.mxu0 %v8242_v36  ;;  %2754 = vmatprep.subr.bf16.mxu1 %v8247_v56  ;;  %v8323_v36 = vld [vmem:[#allocation10 + $0x4e0] ss:$8 sps:$4 sm:$0xff]  }
 0x1dd   :  { %5989 = vmatprep.subr.bf16.mxu0 %v8250_v57  ;;  %2784 = vmatprep.mubr.bf16.mxu1 %v673_v58  ;;  %v8326_v56 = vld [vmem:[#allocation11 + $0x3e0] ss:$8 sps:$4 sm:$0xff]   ;;  %v8331_v57 = vld [vmem:[#allocation10 + $0x4f4] ss:$8 sps:$4 sm:$0xff]  }
 0x1de   :  { %6019 = vmatprep.mubr.bf16.mxu0 %v3851_v59  ;;  %v8334_v58 = vld [vmem:[#allocation11 + $0x3f4] ss:$8 sps:$4 sm:$0xff]   ;;  %v9745_v59 = vld [vmem:[#allocation7 + $0x10] sm:$0xff] }
 0x1df   :  { %2755 = vmatpush1.bf16.msra.mxu1 %v8245_v60  ;;  %v658_v60 = vcombine.high %v9730_v51, %v9730_v51  ;;  %v8344_v51 = vld [vmem:[#allocation10 + $0x514] ss:$8 sps:$4 sm:$0xff]  }
 0x1e0   :  { %5990 = vmatpush1.bf16.msra.mxu0 %v8248_v61  ;;  %2756 = vmatprep.subr.bf16.mxu1 %v8253_v62  ;;  %v8329_v61 = vld [vmem:[#allocation10 + $0x4f0] ss:$8 sps:$4 sm:$0xff]  }
 0x1e1   :  { %5991 = vmatprep.subr.bf16.mxu0 %v8256_v63  ;;  %v8332_v62 = vld [vmem:[#allocation11 + $0x3f0] ss:$8 sps:$4 sm:$0xff]   ;;  %v8337_v63 = vld [vmem:[#allocation10 + $0x504] ss:$8 sps:$4 sm:$0xff]  }
 0x1e3   :  { %2757 = vmatpush1.bf16.msra.mxu1 %v8251_v0  ;;  %v8341_v0 = vld [vmem:[#allocation11 + $0x404] ss:$8 sps:$4 sm:$0xff]  }
 0x1e4   :  { %5992 = vmatpush1.bf16.msra.mxu0 %v8254_v1  ;;  %2758 = vmatprep.subr.bf16.mxu1 %v8259_v2  ;;  %v9750_v1 = vrot.slane %v658_v60, %v9671_v38  ;;  %v9754_v2 = vrot.slane %v9745_v59, %v9671_v38  ;;  %v8416_v60 = vld [vmem:[#allocation10 + $0x5d4] ss:$8 sps:$4 sm:$0xff]  }
 0x1e5   :  { %5993 = vmatprep.subr.bf16.mxu0 %v8262_v42  ;;  %v8335_v42 = vld [vmem:[#allocation10 + $0x500] ss:$8 sps:$4 sm:$0xff]  }
 0x1e7   :  { %2759 = vmatpush1.bf16.msra.mxu1 %v8257_v43  ;;  %v8339_v43 = vld [vmem:[#allocation11 + $0x400] ss:$8 sps:$4 sm:$0xff]  }
 0x1e8   :  { %5994 = vmatpush1.bf16.msra.mxu0 %v8260_v3  ;;  %2760 = vmatprep.subr.bf16.mxu1 %v8265_v4  ;;  %v8347_v3 = vld [vmem:[#allocation11 + $0x414] ss:$8 sps:$4 sm:$0xff]   ;;  %v674_v4 = vcombine.high %v9750_v1, %v9750_v1 }
 0x1e9   :  { %5995 = vmatprep.subr.bf16.mxu0 %v8268_v5  ;;  %v3867_v5 = vcombine.high %v9754_v2, %v9754_v2 }
 0x1eb   :  { %2761 = vmatpush1.bf16.msra.mxu1 %v8263_v6  ;;  %v8342_v6 = vld [vmem:[#allocation10 + $0x510] ss:$8 sps:$4 sm:$0xff]  }
 0x1ec   :  { %5996 = vmatpush1.bf16.msra.mxu0 %v8266_v7  ;;  %2762 = vmatprep.subr.bf16.mxu1 %v8271_v8  ;;  %v8345_v7 = vld [vmem:[#allocation11 + $0x410] ss:$8 sps:$4 sm:$0xff]   ;;  %v8350_v8 = vld [vmem:[#allocation10 + $0x524] ss:$8 sps:$4 sm:$0xff]  }
 0x1ed   :  { %5997 = vmatprep.subr.bf16.mxu0 %v8274_v9  ;;  %v8353_v9 = vld [vmem:[#allocation11 + $0x424] ss:$8 sps:$4 sm:$0xff]  }
 0x1ef   :  { %2763 = vmatpush1.bf16.msra.mxu1 %v8269_v10  ;;  %v8348_v10 = vld [vmem:[#allocation10 + $0x520] ss:$8 sps:$4 sm:$0xff]  }
 0x1f0   :  { %5998 = vmatpush1.bf16.msra.mxu0 %v8272_v11  ;;  %2764 = vmatprep.subr.bf16.mxu1 %v8277_v12  ;;  %v8351_v11 = vld [vmem:[#allocation11 + $0x420] ss:$8 sps:$4 sm:$0xff]   ;;  %v8356_v12 = vld [vmem:[#allocation10 + $0x534] ss:$8 sps:$4 sm:$0xff]  }
 0x1f1   :  { %5999 = vmatprep.subr.bf16.mxu0 %v8280_v13  ;;  %v8357_v13 = vld [vmem:[#allocation11 + $0x430] ss:$8 sps:$4 sm:$0xff]  }
 0x1f3   :  { %2765 = vmatpush1.bf16.msra.mxu1 %v8275_v14  ;;  %v8362_v14 = vld [vmem:[#allocation10 + $0x544] ss:$8 sps:$4 sm:$0xff]  }
 0x1f4   :  { %6000 = vmatpush1.bf16.msra.mxu0 %v8278_v15  ;;  %2766 = vmatprep.subr.bf16.mxu1 %v8283_v16  ;;  %v8365_v15 = vld [vmem:[#allocation11 + $0x444] ss:$8 sps:$4 sm:$0xff]   ;;  %v8360_v16 = vld [vmem:[#allocation10 + $0x540] ss:$8 sps:$4 sm:$0xff]  }
 0x1f5   :  { %6001 = vmatprep.subr.bf16.mxu0 %v8286_v17  ;;  %v8363_v17 = vld [vmem:[#allocation11 + $0x440] ss:$8 sps:$4 sm:$0xff]  }
 0x1f7   :  { %2767 = vmatpush1.bf16.msra.mxu1 %v8281_v19  ;;  %v8368_v19 = vld [vmem:[#allocation10 + $0x554] ss:$8 sps:$4 sm:$0xff]  }
 0x1f8   :  { %6002 = vmatpush1.bf16.msra.mxu0 %v8284_v20  ;;  %2768 = vmatprep.subr.bf16.mxu1 %v8289_v21  ;;  %v8371_v20 = vld [vmem:[#allocation11 + $0x454] ss:$8 sps:$4 sm:$0xff]   ;;  %v8366_v21 = vld [vmem:[#allocation10 + $0x550] ss:$8 sps:$4 sm:$0xff]  }
 0x1f9   :  { %6003 = vmatprep.subr.bf16.mxu0 %v8292_v22  ;;  %v8369_v22 = vld [vmem:[#allocation11 + $0x450] ss:$8 sps:$4 sm:$0xff]  }
 0x1fb   :  { %2769 = vmatpush1.bf16.msra.mxu1 %v8287_v23  ;;  %v8374_v23 = vld [vmem:[#allocation10 + $0x564] ss:$8 sps:$4 sm:$0xff]  }
 0x1fc   :  { %6004 = vmatpush1.bf16.msra.mxu0 %v8290_v24  ;;  %2770 = vmatprep.subr.bf16.mxu1 %v8295_v25  ;;  %v8377_v24 = vld [vmem:[#allocation11 + $0x464] ss:$8 sps:$4 sm:$0xff]   ;;  %v8372_v25 = vld [vmem:[#allocation10 + $0x560] ss:$8 sps:$4 sm:$0xff]  }
 0x1fd   :  { %6005 = vmatprep.subr.bf16.mxu0 %v8298_v26  ;;  %v8375_v26 = vld [vmem:[#allocation11 + $0x460] ss:$8 sps:$4 sm:$0xff]  }
 0x1ff   :  { %2771 = vmatpush1.bf16.msra.mxu1 %v8293_v27  ;;  %v8380_v27 = vld [vmem:[#allocation10 + $0x574] ss:$8 sps:$4 sm:$0xff]  }
 0x200   :  { %6006 = vmatpush1.bf16.msra.mxu0 %v8296_v29  ;;  %2772 = vmatprep.subr.bf16.mxu1 %v8301_v30  ;;  %v8383_v29 = vld [vmem:[#allocation11 + $0x474] ss:$8 sps:$4 sm:$0xff]   ;;  %v8378_v30 = vld [vmem:[#allocation10 + $0x570] ss:$8 sps:$4 sm:$0xff]  }
 0x201   :  { %6007 = vmatprep.subr.bf16.mxu0 %v8304_v31  ;;  %v8381_v31 = vld [vmem:[#allocation11 + $0x470] ss:$8 sps:$4 sm:$0xff]  }
 0x203   :  { %2773 = vmatpush1.bf16.msra.mxu1 %v8299_v32  ;;  %v8386_v32 = vld [vmem:[#allocation10 + $0x584] ss:$8 sps:$4 sm:$0xff]  }
 0x204   :  { %6008 = vmatpush1.bf16.msra.mxu0 %v8302_v37  ;;  %2774 = vmatprep.subr.bf16.mxu1 %v8307_v39  ;;  %v8389_v37 = vld [vmem:[#allocation11 + $0x484] ss:$8 sps:$4 sm:$0xff]   ;;  %v8384_v39 = vld [vmem:[#allocation10 + $0x580] ss:$8 sps:$4 sm:$0xff]  }
 0x205   :  { %6009 = vmatprep.subr.bf16.mxu0 %v8310_v40  ;;  %v8387_v40 = vld [vmem:[#allocation11 + $0x480] ss:$8 sps:$4 sm:$0xff]  }
 0x207   :  { %2775 = vmatpush1.bf16.msra.mxu1 %v8305_v44  ;;  %v8392_v44 = vld [vmem:[#allocation10 + $0x594] ss:$8 sps:$4 sm:$0xff]  }
 0x208   :  { %6010 = vmatpush1.bf16.msra.mxu0 %v8308_v18  ;;  %2776 = vmatprep.subr.bf16.mxu1 %v8313_v45  ;;  %v8395_v18 = vld [vmem:[#allocation11 + $0x494] ss:$8 sps:$4 sm:$0xff]   ;;  %v8390_v45 = vld [vmem:[#allocation10 + $0x590] ss:$8 sps:$4 sm:$0xff]  }
 0x209   :  { %6011 = vmatprep.subr.bf16.mxu0 %v8316_v46  ;;  %v8393_v46 = vld [vmem:[#allocation11 + $0x490] ss:$8 sps:$4 sm:$0xff]  }
 0x20b   :  { %2777 = vmatpush1.bf16.msra.mxu1 %v8311_v47  ;;  %v8398_v47 = vld [vmem:[#allocation10 + $0x5a4] ss:$8 sps:$4 sm:$0xff]  }
 0x20c   :  { %6012 = vmatpush1.bf16.msra.mxu0 %v8314_v48  ;;  %2778 = vmatprep.subr.bf16.mxu1 %v8319_v49  ;;  %v8401_v48 = vld [vmem:[#allocation11 + $0x4a4] ss:$8 sps:$4 sm:$0xff]   ;;  %v8396_v49 = vld [vmem:[#allocation10 + $0x5a0] ss:$8 sps:$4 sm:$0xff]  }
 0x20d   :  { %6013 = vmatprep.subr.bf16.mxu0 %v8322_v50  ;;  %v8399_v50 = vld [vmem:[#allocation11 + $0x4a0] ss:$8 sps:$4 sm:$0xff]  }
 0x20f   :  { %2779 = vmatpush1.bf16.msra.mxu1 %v8317_v52  ;;  %v8404_v52 = vld [vmem:[#allocation10 + $0x5b4] ss:$8 sps:$4 sm:$0xff]  }
 0x210   :  { %6014 = vmatpush1.bf16.msra.mxu0 %v8320_v53  ;;  %2780 = vmatprep.subr.bf16.mxu1 %v8325_v54  ;;  %v8407_v53 = vld [vmem:[#allocation11 + $0x4b4] ss:$8 sps:$4 sm:$0xff]   ;;  %v8402_v54 = vld [vmem:[#allocation10 + $0x5b0] ss:$8 sps:$4 sm:$0xff]  }
 0x211   :  { %6015 = vmatprep.subr.bf16.mxu0 %v8328_v55  ;;  %v8405_v55 = vld [vmem:[#allocation11 + $0x4b0] ss:$8 sps:$4 sm:$0xff]  }
 0x213   :  { %2781 = vmatpush1.bf16.msra.mxu1 %v8323_v36  ;;  %v8410_v36 = vld [vmem:[#allocation10 + $0x5c4] ss:$8 sps:$4 sm:$0xff]  }
 0x214   :  { %6016 = vmatpush1.bf16.msra.mxu0 %v8326_v56  ;;  %2782 = vmatprep.subr.bf16.mxu1 %v8331_v57  ;;  %v8413_v56 = vld [vmem:[#allocation11 + $0x4c4] ss:$8 sps:$4 sm:$0xff]   ;;  %v8408_v57 = vld [vmem:[#allocation10 + $0x5c0] ss:$8 sps:$4 sm:$0xff]  }
 0x215   :  { %6017 = vmatprep.subr.bf16.mxu0 %v8334_v58  ;;  %v8411_v58 = vld [vmem:[#allocation11 + $0x4c0] ss:$8 sps:$4 sm:$0xff]  }
 0x217   :  { %2783 = vmatpush1.bf16.msra.mxu1 %v8329_v61  ;;  %v8419_v61 = vld [vmem:[#allocation11 + $0x4d4] ss:$8 sps:$4 sm:$0xff]  }
 0x218   :  { %6018 = vmatpush1.bf16.msra.mxu0 %v8332_v62  ;;  %2793 = vmatprep.subr.bf16.mxu1 %v8337_v63  ;;  %v8414_v62 = vld [vmem:[#allocation10 + $0x5d0] ss:$8 sps:$4 sm:$0xff]  }
 0x219   :  { %6028 = vmatprep.subr.bf16.mxu0 %v8341_v0  ;;  %v8417_v63 = vld [vmem:[#allocation11 + $0x4d0] ss:$8 sps:$4 sm:$0xff]   ;;  %v8422_v0 = vld [vmem:[#allocation10 + $0x5e4] ss:$8 sps:$4 sm:$0xff]  }
 0x21a   :  { %2785 = vmatmul.mubr.bf16.vlgmr.msra.gmra.mrb[0].mxu1 %v9734_v35  ;;  %v8359_v35 = vld [vmem:[#allocation11 + $0x434] ss:$8 sps:$4 sm:$0xff]  }
 0x21b   :  { %6020 = vmatmul.mubr.bf16.vlgmr.msra.gmra.mrb[4].mxu0 %v9737_v28  ;;  %2794 = vmatpush1.bf16.msra.mxu1 %v8335_v42  ;;  %v8354_v28 = vld [vmem:[#allocation10 + $0x530] ss:$8 sps:$4 sm:$0xff]   ;;  %v8425_v42 = vld [vmem:[#allocation11 + $0x4e4] ss:$8 sps:$4 sm:$0xff]  }
 0x21c   :  { %6029 = vmatpush1.bf16.msra.mxu0 %v8339_v43  ;;  %2795 = vmatprep.subr.bf16.mxu1 %v8344_v51  ;;  %v8420_v43 = vld [vmem:[#allocation10 + $0x5e0] ss:$8 sps:$4 sm:$0xff]  }
 0x21d   :  { %6030 = vmatprep.subr.bf16.mxu0 %v8347_v3  ;;  %2825 = vmatprep.mubr.bf16.mxu1 %v674_v4  ;;  %v8423_v51 = vld [vmem:[#allocation11 + $0x4e0] ss:$8 sps:$4 sm:$0xff]   ;;  %v8428_v3 = vld [vmem:[#allocation10 + $0x5f4] ss:$8 sps:$4 sm:$0xff]  }
 0x21e   :  { %6060 = vmatprep.mubr.bf16.mxu0 %v3867_v5  ;;  %v8431_v4 = vld [vmem:[#allocation11 + $0x4f4] ss:$8 sps:$4 sm:$0xff]  }
 0x21f   :  { %2796 = vmatpush1.bf16.msra.mxu1 %v8342_v6  ;;  %v9762_v5 = vld [vmem:[#allocation5 + $0x18] sm:$0xff]  ;;  %v3852_v6 = vcombine.high %v9745_v59, %v9745_v59 }
 0x220   :  { %6031 = vmatpush1.bf16.msra.mxu0 %v8345_v7  ;;  %2797 = vmatprep.subr.bf16.mxu1 %v8350_v8  ;;  %v8426_v7 = vld [vmem:[#allocation10 + $0x5f0] ss:$8 sps:$4 sm:$0xff]   ;;  %v8441_v59 = vld [vmem:[#allocation10 + $0x614] ss:$8 sps:$4 sm:$0xff]  }
 0x221   :  { %6032 = vmatprep.subr.bf16.mxu0 %v8353_v9  ;;  %v8429_v8 = vld [vmem:[#allocation11 + $0x4f0] ss:$8 sps:$4 sm:$0xff]   ;;  %v8435_v9 = vld [vmem:[#allocation10 + $0x604] ss:$8 sps:$4 sm:$0xff]  }
 0x223   :  { %2798 = vmatpush1.bf16.msra.mxu1 %v8348_v10  ;;  %v8438_v10 = vld [vmem:[#allocation11 + $0x504] ss:$8 sps:$4 sm:$0xff]  }
 0x224   :  { %6033 = vmatpush1.bf16.msra.mxu0 %v8351_v11  ;;  %2799 = vmatprep.subr.bf16.mxu1 %v8356_v12  ;;  %v9768_v11 = vrot.slane %v9762_v5, %v9671_v38  ;;  %v9771_v12 = vrot.slane %v3852_v6, %v9671_v38  ;;  %v8513_v6 = vld [vmem:[#allocation10 + $0x6d4] ss:$8 sps:$4 sm:$0xff]  }
 0x225   :  { %6034 = vmatprep.subr.bf16.mxu0 %v8359_v35  ;;  %v8433_v35 = vld [vmem:[#allocation10 + $0x600] ss:$8 sps:$4 sm:$0xff]  }
 0x227   :  { %2800 = vmatpush1.bf16.msra.mxu1 %v8354_v28  ;;  %v8436_v28 = vld [vmem:[#allocation11 + $0x500] ss:$8 sps:$4 sm:$0xff]  }
 0x228   :  { %6035 = vmatpush1.bf16.msra.mxu0 %v8357_v13  ;;  %2801 = vmatprep.subr.bf16.mxu1 %v8362_v14  ;;  %v8444_v13 = vld [vmem:[#allocation11 + $0x514] ss:$8 sps:$4 sm:$0xff]   ;;  %v690_v14 = vcombine.high %v9768_v11, %v9768_v11 }
 0x229   :  { %6036 = vmatprep.subr.bf16.mxu0 %v8365_v15  ;;  %v3868_v15 = vcombine.high %v9771_v12, %v9771_v12 }
 0x22b   :  { %2802 = vmatpush1.bf16.msra.mxu1 %v8360_v16  ;;  %v8439_v16 = vld [vmem:[#allocation10 + $0x610] ss:$8 sps:$4 sm:$0xff]  }
 0x22c   :  { %6037 = vmatpush1.bf16.msra.mxu0 %v8363_v17  ;;  %2803 = vmatprep.subr.bf16.mxu1 %v8368_v19  ;;  %v8442_v17 = vld [vmem:[#allocation11 + $0x510] ss:$8 sps:$4 sm:$0xff]   ;;  %v8447_v19 = vld [vmem:[#allocation10 + $0x624] ss:$8 sps:$4 sm:$0xff]  }
 0x22d   :  { %6038 = vmatprep.subr.bf16.mxu0 %v8371_v20  ;;  %v8450_v20 = vld [vmem:[#allocation11 + $0x524] ss:$8 sps:$4 sm:$0xff]  }
 0x22f   :  { %2804 = vmatpush1.bf16.msra.mxu1 %v8366_v21  ;;  %v8445_v21 = vld [vmem:[#allocation10 + $0x620] ss:$8 sps:$4 sm:$0xff]  }
 0x230   :  { %6039 = vmatpush1.bf16.msra.mxu0 %v8369_v22  ;;  %2805 = vmatprep.subr.bf16.mxu1 %v8374_v23  ;;  %v8448_v22 = vld [vmem:[#allocation11 + $0x520] ss:$8 sps:$4 sm:$0xff]   ;;  %v8453_v23 = vld [vmem:[#allocation10 + $0x634] ss:$8 sps:$4 sm:$0xff]  }
 0x231   :  { %6040 = vmatprep.subr.bf16.mxu0 %v8377_v24  ;;  %v8454_v24 = vld [vmem:[#allocation11 + $0x530] ss:$8 sps:$4 sm:$0xff]  }
 0x233   :  { %2806 = vmatpush1.bf16.msra.mxu1 %v8372_v25  ;;  %v8459_v25 = vld [vmem:[#allocation10 + $0x644] ss:$8 sps:$4 sm:$0xff]  }
 0x234   :  { %6041 = vmatpush1.bf16.msra.mxu0 %v8375_v26  ;;  %2807 = vmatprep.subr.bf16.mxu1 %v8380_v27  ;;  %v8462_v26 = vld [vmem:[#allocation11 + $0x544] ss:$8 sps:$4 sm:$0xff]   ;;  %v8457_v27 = vld [vmem:[#allocation10 + $0x640] ss:$8 sps:$4 sm:$0xff]  }
 0x235   :  { %6042 = vmatprep.subr.bf16.mxu0 %v8383_v29  ;;  %v8460_v29 = vld [vmem:[#allocation11 + $0x540] ss:$8 sps:$4 sm:$0xff]  }
 0x237   :  { %2808 = vmatpush1.bf16.msra.mxu1 %v8378_v30  ;;  %v8465_v30 = vld [vmem:[#allocation10 + $0x654] ss:$8 sps:$4 sm:$0xff]  }
 0x238   :  { %6043 = vmatpush1.bf16.msra.mxu0 %v8381_v31  ;;  %2809 = vmatprep.subr.bf16.mxu1 %v8386_v32  ;;  %v8468_v31 = vld [vmem:[#allocation11 + $0x554] ss:$8 sps:$4 sm:$0xff]   ;;  %v8463_v32 = vld [vmem:[#allocation10 + $0x650] ss:$8 sps:$4 sm:$0xff]  }
 0x239   :  { %6044 = vmatprep.subr.bf16.mxu0 %v8389_v37  ;;  %v8466_v37 = vld [vmem:[#allocation11 + $0x550] ss:$8 sps:$4 sm:$0xff]  }
 0x23b   :  { %2810 = vmatpush1.bf16.msra.mxu1 %v8384_v39  ;;  %v8471_v39 = vld [vmem:[#allocation10 + $0x664] ss:$8 sps:$4 sm:$0xff]  }
 0x23c   :  { %6045 = vmatpush1.bf16.msra.mxu0 %v8387_v40  ;;  %2811 = vmatprep.subr.bf16.mxu1 %v8392_v44  ;;  %v8474_v40 = vld [vmem:[#allocation11 + $0x564] ss:$8 sps:$4 sm:$0xff]   ;;  %v8469_v44 = vld [vmem:[#allocation10 + $0x660] ss:$8 sps:$4 sm:$0xff]  }
 0x23d   :  { %6046 = vmatprep.subr.bf16.mxu0 %v8395_v18  ;;  %v8472_v18 = vld [vmem:[#allocation11 + $0x560] ss:$8 sps:$4 sm:$0xff]  }
 0x23f   :  { %2812 = vmatpush1.bf16.msra.mxu1 %v8390_v45  ;;  %v8477_v45 = vld [vmem:[#allocation10 + $0x674] ss:$8 sps:$4 sm:$0xff]  }
 0x240   :  { %6047 = vmatpush1.bf16.msra.mxu0 %v8393_v46  ;;  %2813 = vmatprep.subr.bf16.mxu1 %v8398_v47  ;;  %v8480_v46 = vld [vmem:[#allocation11 + $0x574] ss:$8 sps:$4 sm:$0xff]   ;;  %v8475_v47 = vld [vmem:[#allocation10 + $0x670] ss:$8 sps:$4 sm:$0xff]  }
 0x241   :  { %6048 = vmatprep.subr.bf16.mxu0 %v8401_v48  ;;  %v8478_v48 = vld [vmem:[#allocation11 + $0x570] ss:$8 sps:$4 sm:$0xff]  }
 0x243   :  { %2814 = vmatpush1.bf16.msra.mxu1 %v8396_v49  ;;  %v8483_v49 = vld [vmem:[#allocation10 + $0x684] ss:$8 sps:$4 sm:$0xff]  }
 0x244   :  { %6049 = vmatpush1.bf16.msra.mxu0 %v8399_v50  ;;  %2815 = vmatprep.subr.bf16.mxu1 %v8404_v52  ;;  %v8486_v50 = vld [vmem:[#allocation11 + $0x584] ss:$8 sps:$4 sm:$0xff]   ;;  %v8481_v52 = vld [vmem:[#allocation10 + $0x680] ss:$8 sps:$4 sm:$0xff]  }
 0x245   :  { %6050 = vmatprep.subr.bf16.mxu0 %v8407_v53  ;;  %v8484_v53 = vld [vmem:[#allocation11 + $0x580] ss:$8 sps:$4 sm:$0xff]  }
 0x247   :  { %2816 = vmatpush1.bf16.msra.mxu1 %v8402_v54  ;;  %v8489_v54 = vld [vmem:[#allocation10 + $0x694] ss:$8 sps:$4 sm:$0xff]  }
 0x248   :  { %6051 = vmatpush1.bf16.msra.mxu0 %v8405_v55  ;;  %2817 = vmatprep.subr.bf16.mxu1 %v8410_v36  ;;  %v8492_v55 = vld [vmem:[#allocation11 + $0x594] ss:$8 sps:$4 sm:$0xff]   ;;  %v8487_v36 = vld [vmem:[#allocation10 + $0x690] ss:$8 sps:$4 sm:$0xff]  }
 0x249   :  { %6052 = vmatprep.subr.bf16.mxu0 %v8413_v56  ;;  %v8490_v56 = vld [vmem:[#allocation11 + $0x590] ss:$8 sps:$4 sm:$0xff]  }
 0x24b   :  { %2818 = vmatpush1.bf16.msra.mxu1 %v8408_v57  ;;  %v8495_v57 = vld [vmem:[#allocation10 + $0x6a4] ss:$8 sps:$4 sm:$0xff]  }
 0x24c   :  { %6053 = vmatpush1.bf16.msra.mxu0 %v8411_v58  ;;  %2819 = vmatprep.subr.bf16.mxu1 %v8416_v60  ;;  %v8498_v58 = vld [vmem:[#allocation11 + $0x5a4] ss:$8 sps:$4 sm:$0xff]   ;;  %v8493_v60 = vld [vmem:[#allocation10 + $0x6a0] ss:$8 sps:$4 sm:$0xff]  }
 0x24d   :  { %6054 = vmatprep.subr.bf16.mxu0 %v8419_v61  ;;  %v8496_v61 = vld [vmem:[#allocation11 + $0x5a0] ss:$8 sps:$4 sm:$0xff]  }
 0x24f   :  { %2820 = vmatpush1.bf16.msra.mxu1 %v8414_v62  ;;  %v8501_v62 = vld [vmem:[#allocation10 + $0x6b4] ss:$8 sps:$4 sm:$0xff]  }
 0x250   :  { %6055 = vmatpush1.bf16.msra.mxu0 %v8417_v63  ;;  %2821 = vmatprep.subr.bf16.mxu1 %v8422_v0  ;;  %v8504_v63 = vld [vmem:[#allocation11 + $0x5b4] ss:$8 sps:$4 sm:$0xff]   ;;  %v8499_v0 = vld [vmem:[#allocation10 + $0x6b0] ss:$8 sps:$4 sm:$0xff]  }
 0x251   :  { %6056 = vmatprep.subr.bf16.mxu0 %v8425_v42  ;;  %v8502_v42 = vld [vmem:[#allocation11 + $0x5b0] ss:$8 sps:$4 sm:$0xff]  }
 0x253   :  { %2822 = vmatpush1.bf16.msra.mxu1 %v8420_v43  ;;  %v8507_v43 = vld [vmem:[#allocation10 + $0x6c4] ss:$8 sps:$4 sm:$0xff]  }
 0x254   :  { %6057 = vmatpush1.bf16.msra.mxu0 %v8423_v51  ;;  %2823 = vmatprep.subr.bf16.mxu1 %v8428_v3  ;;  %v8510_v51 = vld [vmem:[#allocation11 + $0x5c4] ss:$8 sps:$4 sm:$0xff]   ;;  %v8505_v3 = vld [vmem:[#allocation10 + $0x6c0] ss:$8 sps:$4 sm:$0xff]  }
 0x255   :  { %6058 = vmatprep.subr.bf16.mxu0 %v8431_v4  ;;  %v8508_v4 = vld [vmem:[#allocation11 + $0x5c0] ss:$8 sps:$4 sm:$0xff]  }
 0x257   :  { %2824 = vmatpush1.bf16.msra.mxu1 %v8426_v7  ;;  %v8516_v7 = vld [vmem:[#allocation11 + $0x5d4] ss:$8 sps:$4 sm:$0xff]  }
 0x258   :  { %6059 = vmatpush1.bf16.msra.mxu0 %v8429_v8  ;;  %2834 = vmatprep.subr.bf16.mxu1 %v8435_v9  ;;  %v8511_v8 = vld [vmem:[#allocation10 + $0x6d0] ss:$8 sps:$4 sm:$0xff]  }
 0x259   :  { %6069 = vmatprep.subr.bf16.mxu0 %v8438_v10  ;;  %v8514_v9 = vld [vmem:[#allocation11 + $0x5d0] ss:$8 sps:$4 sm:$0xff]   ;;  %v8519_v10 = vld [vmem:[#allocation10 + $0x6e4] ss:$8 sps:$4 sm:$0xff]  }
 0x25a   :  { %2826 = vmatmul.mubr.bf16.vlgmr.msra.gmra.mrb[0].mxu1 %v9750_v1  ;;  %v8456_v1 = vld [vmem:[#allocation11 + $0x534] ss:$8 sps:$4 sm:$0xff]  }
 0x25b   :  { %6061 = vmatmul.mubr.bf16.vlgmr.msra.gmra.mrb[4].mxu0 %v9754_v2  ;;  %2835 = vmatpush1.bf16.msra.mxu1 %v8433_v35  ;;  %v8451_v2 = vld [vmem:[#allocation10 + $0x630] ss:$8 sps:$4 sm:$0xff]   ;;  %v8522_v35 = vld [vmem:[#allocation11 + $0x5e4] ss:$8 sps:$4 sm:$0xff]  }
 0x25c   :  { %6070 = vmatpush1.bf16.msra.mxu0 %v8436_v28  ;;  %2836 = vmatprep.subr.bf16.mxu1 %v8441_v59  ;;  %v8517_v28 = vld [vmem:[#allocation10 + $0x6e0] ss:$8 sps:$4 sm:$0xff]  }
 0x25d   :  { %6071 = vmatprep.subr.bf16.mxu0 %v8444_v13  ;;  %2866 = vmatprep.mubr.bf16.mxu1 %v690_v14  ;;  %v8520_v59 = vld [vmem:[#allocation11 + $0x5e0] ss:$8 sps:$4 sm:$0xff]   ;;  %v8525_v13 = vld [vmem:[#allocation10 + $0x6f4] ss:$8 sps:$4 sm:$0xff]  }
 0x25e   :  { %6101 = vmatprep.mubr.bf16.mxu0 %v3868_v15  ;;  %v8528_v14 = vld [vmem:[#allocation11 + $0x5f4] ss:$8 sps:$4 sm:$0xff]   ;;  %v9779_v15 = vld [vmem:[#allocation7 + $0x18] sm:$0xff] }
 0x25f   :  { %2837 = vmatpush1.bf16.msra.mxu1 %v8439_v16  ;;  %v675_v16 = vcombine.high %v9762_v5, %v9762_v5  ;;  %v8538_v5 = vld [vmem:[#allocation10 + $0x714] ss:$8 sps:$4 sm:$0xff]  }
 0x260   :  { %6072 = vmatpush1.bf16.msra.mxu0 %v8442_v17  ;;  %2838 = vmatprep.subr.bf16.mxu1 %v8447_v19  ;;  %v8523_v17 = vld [vmem:[#allocation10 + $0x6f0] ss:$8 sps:$4 sm:$0xff]  }
 0x261   :  { %6073 = vmatprep.subr.bf16.mxu0 %v8450_v20  ;;  %v8526_v19 = vld [vmem:[#allocation11 + $0x5f0] ss:$8 sps:$4 sm:$0xff]   ;;  %v8531_v20 = vld [vmem:[#allocation10 + $0x704] ss:$8 sps:$4 sm:$0xff]  }
 0x263   :  { %2839 = vmatpush1.bf16.msra.mxu1 %v8445_v21  ;;  %v8535_v21 = vld [vmem:[#allocation11 + $0x604] ss:$8 sps:$4 sm:$0xff]  }
 0x264   :  { %6074 = vmatpush1.bf16.msra.mxu0 %v8448_v22  ;;  %2840 = vmatprep.subr.bf16.mxu1 %v8453_v23  ;;  %v9784_v22 = vrot.slane %v675_v16, %v9671_v38  ;;  %v9788_v23 = vrot.slane %v9779_v15, %v9671_v38  ;;  %v8610_v16 = vld [vmem:[#allocation10 + $0x7d4] ss:$8 sps:$4 sm:$0xff]  }
 0x265   :  { %6075 = vmatprep.subr.bf16.mxu0 %v8456_v1  ;;  %v8529_v1 = vld [vmem:[#allocation10 + $0x700] ss:$8 sps:$4 sm:$0xff]  }
 0x267   :  { %2841 = vmatpush1.bf16.msra.mxu1 %v8451_v2  ;;  %v8533_v2 = vld [vmem:[#allocation11 + $0x600] ss:$8 sps:$4 sm:$0xff]  }
 0x268   :  { %6076 = vmatpush1.bf16.msra.mxu0 %v8454_v24  ;;  %2842 = vmatprep.subr.bf16.mxu1 %v8459_v25  ;;  %v8541_v24 = vld [vmem:[#allocation11 + $0x614] ss:$8 sps:$4 sm:$0xff]   ;;  %v691_v25 = vcombine.high %v9784_v22, %v9784_v22 }
 0x269   :  { %6077 = vmatprep.subr.bf16.mxu0 %v8462_v26  ;;  %v3884_v26 = vcombine.high %v9788_v23, %v9788_v23 }
 0x26b   :  { %2843 = vmatpush1.bf16.msra.mxu1 %v8457_v27  ;;  %v8536_v27 = vld [vmem:[#allocation10 + $0x710] ss:$8 sps:$4 sm:$0xff]  }
 0x26c   :  { %6078 = vmatpush1.bf16.msra.mxu0 %v8460_v29  ;;  %2844 = vmatprep.subr.bf16.mxu1 %v8465_v30  ;;  %v8539_v29 = vld [vmem:[#allocation11 + $0x610] ss:$8 sps:$4 sm:$0xff]   ;;  %v8544_v30 = vld [vmem:[#allocation10 + $0x724] ss:$8 sps:$4 sm:$0xff]  }
 0x26d   :  { %6079 = vmatprep.subr.bf16.mxu0 %v8468_v31  ;;  %v8547_v31 = vld [vmem:[#allocation11 + $0x624] ss:$8 sps:$4 sm:$0xff]  }
 0x26f   :  { %2845 = vmatpush1.bf16.msra.mxu1 %v8463_v32  ;;  %v8542_v32 = vld [vmem:[#allocation10 + $0x720] ss:$8 sps:$4 sm:$0xff]  }
 0x270   :  { %6080 = vmatpush1.bf16.msra.mxu0 %v8466_v37  ;;  %2846 = vmatprep.subr.bf16.mxu1 %v8471_v39  ;;  %v8545_v37 = vld [vmem:[#allocation11 + $0x620] ss:$8 sps:$4 sm:$0xff]   ;;  %v8550_v39 = vld [vmem:[#allocation10 + $0x734] ss:$8 sps:$4 sm:$0xff]  }
 0x271   :  { %6081 = vmatprep.subr.bf16.mxu0 %v8474_v40  ;;  %v8551_v40 = vld [vmem:[#allocation11 + $0x630] ss:$8 sps:$4 sm:$0xff]  }
 0x273   :  { %2847 = vmatpush1.bf16.msra.mxu1 %v8469_v44  ;;  %v8556_v44 = vld [vmem:[#allocation10 + $0x744] ss:$8 sps:$4 sm:$0xff]  }
 0x274   :  { %6082 = vmatpush1.bf16.msra.mxu0 %v8472_v18  ;;  %2848 = vmatprep.subr.bf16.mxu1 %v8477_v45  ;;  %v8559_v18 = vld [vmem:[#allocation11 + $0x644] ss:$8 sps:$4 sm:$0xff]   ;;  %v8554_v45 = vld [vmem:[#allocation10 + $0x740] ss:$8 sps:$4 sm:$0xff]  }
 0x275   :  { %6083 = vmatprep.subr.bf16.mxu0 %v8480_v46  ;;  %v8557_v46 = vld [vmem:[#allocation11 + $0x640] ss:$8 sps:$4 sm:$0xff]  }
 0x277   :  { %2849 = vmatpush1.bf16.msra.mxu1 %v8475_v47  ;;  %v8562_v47 = vld [vmem:[#allocation10 + $0x754] ss:$8 sps:$4 sm:$0xff]  }
 0x278   :  { %6084 = vmatpush1.bf16.msra.mxu0 %v8478_v48  ;;  %2850 = vmatprep.subr.bf16.mxu1 %v8483_v49  ;;  %v8565_v48 = vld [vmem:[#allocation11 + $0x654] ss:$8 sps:$4 sm:$0xff]   ;;  %v8560_v49 = vld [vmem:[#allocation10 + $0x750] ss:$8 sps:$4 sm:$0xff]  }
 0x279   :  { %6085 = vmatprep.subr.bf16.mxu0 %v8486_v50  ;;  %v8563_v50 = vld [vmem:[#allocation11 + $0x650] ss:$8 sps:$4 sm:$0xff]  }
 0x27b   :  { %2851 = vmatpush1.bf16.msra.mxu1 %v8481_v52  ;;  %v8568_v52 = vld [vmem:[#allocation10 + $0x764] ss:$8 sps:$4 sm:$0xff]  }
 0x27c   :  { %6086 = vmatpush1.bf16.msra.mxu0 %v8484_v53  ;;  %2852 = vmatprep.subr.bf16.mxu1 %v8489_v54  ;;  %v8571_v53 = vld [vmem:[#allocation11 + $0x664] ss:$8 sps:$4 sm:$0xff]   ;;  %v8566_v54 = vld [vmem:[#allocation10 + $0x760] ss:$8 sps:$4 sm:$0xff]  }
 0x27d   :  { %6087 = vmatprep.subr.bf16.mxu0 %v8492_v55  ;;  %v8569_v55 = vld [vmem:[#allocation11 + $0x660] ss:$8 sps:$4 sm:$0xff]  }
 0x27f   :  { %2853 = vmatpush1.bf16.msra.mxu1 %v8487_v36  ;;  %v8574_v36 = vld [vmem:[#allocation10 + $0x774] ss:$8 sps:$4 sm:$0xff]  }
 0x280   :  { %6088 = vmatpush1.bf16.msra.mxu0 %v8490_v56  ;;  %2854 = vmatprep.subr.bf16.mxu1 %v8495_v57  ;;  %v8577_v56 = vld [vmem:[#allocation11 + $0x674] ss:$8 sps:$4 sm:$0xff]   ;;  %v8572_v57 = vld [vmem:[#allocation10 + $0x770] ss:$8 sps:$4 sm:$0xff]  }
 0x281   :  { %6089 = vmatprep.subr.bf16.mxu0 %v8498_v58  ;;  %v8575_v58 = vld [vmem:[#allocation11 + $0x670] ss:$8 sps:$4 sm:$0xff]  }
 0x283   :  { %2855 = vmatpush1.bf16.msra.mxu1 %v8493_v60  ;;  %v8580_v60 = vld [vmem:[#allocation10 + $0x784] ss:$8 sps:$4 sm:$0xff]  }
 0x284   :  { %6090 = vmatpush1.bf16.msra.mxu0 %v8496_v61  ;;  %2856 = vmatprep.subr.bf16.mxu1 %v8501_v62  ;;  %v8583_v61 = vld [vmem:[#allocation11 + $0x684] ss:$8 sps:$4 sm:$0xff]   ;;  %v8578_v62 = vld [vmem:[#allocation10 + $0x780] ss:$8 sps:$4 sm:$0xff]  }
 0x285   :  { %6091 = vmatprep.subr.bf16.mxu0 %v8504_v63  ;;  %v8581_v63 = vld [vmem:[#allocation11 + $0x680] ss:$8 sps:$4 sm:$0xff]  }
 0x287   :  { %2857 = vmatpush1.bf16.msra.mxu1 %v8499_v0  ;;  %v8586_v0 = vld [vmem:[#allocation10 + $0x794] ss:$8 sps:$4 sm:$0xff]  }
 0x288   :  { %6092 = vmatpush1.bf16.msra.mxu0 %v8502_v42  ;;  %2858 = vmatprep.subr.bf16.mxu1 %v8507_v43  ;;  %v8589_v42 = vld [vmem:[#allocation11 + $0x694] ss:$8 sps:$4 sm:$0xff]   ;;  %v8584_v43 = vld [vmem:[#allocation10 + $0x790] ss:$8 sps:$4 sm:$0xff]  }
 0x289   :  { %6093 = vmatprep.subr.bf16.mxu0 %v8510_v51  ;;  %v8587_v51 = vld [vmem:[#allocation11 + $0x690] ss:$8 sps:$4 sm:$0xff]  }
 0x28b   :  { %2859 = vmatpush1.bf16.msra.mxu1 %v8505_v3  ;;  %v8592_v3 = vld [vmem:[#allocation10 + $0x7a4] ss:$8 sps:$4 sm:$0xff]  }
 0x28c   :  { %6094 = vmatpush1.bf16.msra.mxu0 %v8508_v4  ;;  %2860 = vmatprep.subr.bf16.mxu1 %v8513_v6  ;;  %v8595_v4 = vld [vmem:[#allocation11 + $0x6a4] ss:$8 sps:$4 sm:$0xff]   ;;  %v8590_v6 = vld [vmem:[#allocation10 + $0x7a0] ss:$8 sps:$4 sm:$0xff]  }
 0x28d   :  { %6095 = vmatprep.subr.bf16.mxu0 %v8516_v7  ;;  %v8593_v7 = vld [vmem:[#allocation11 + $0x6a0] ss:$8 sps:$4 sm:$0xff]  }
 0x28f   :  { %2861 = vmatpush1.bf16.msra.mxu1 %v8511_v8  ;;  %v8598_v8 = vld [vmem:[#allocation10 + $0x7b4] ss:$8 sps:$4 sm:$0xff]  }
 0x290   :  { %6096 = vmatpush1.bf16.msra.mxu0 %v8514_v9  ;;  %2862 = vmatprep.subr.bf16.mxu1 %v8519_v10  ;;  %v8601_v9 = vld [vmem:[#allocation11 + $0x6b4] ss:$8 sps:$4 sm:$0xff]   ;;  %v8596_v10 = vld [vmem:[#allocation10 + $0x7b0] ss:$8 sps:$4 sm:$0xff]  }
 0x291   :  { %6097 = vmatprep.subr.bf16.mxu0 %v8522_v35  ;;  %v8599_v35 = vld [vmem:[#allocation11 + $0x6b0] ss:$8 sps:$4 sm:$0xff]  }
 0x293   :  { %2863 = vmatpush1.bf16.msra.mxu1 %v8517_v28  ;;  %v8604_v28 = vld [vmem:[#allocation10 + $0x7c4] ss:$8 sps:$4 sm:$0xff]  }
 0x294   :  { %6098 = vmatpush1.bf16.msra.mxu0 %v8520_v59  ;;  %2864 = vmatprep.subr.bf16.mxu1 %v8525_v13  ;;  %v8607_v59 = vld [vmem:[#allocation11 + $0x6c4] ss:$8 sps:$4 sm:$0xff]   ;;  %v8602_v13 = vld [vmem:[#allocation10 + $0x7c0] ss:$8 sps:$4 sm:$0xff]  }
 0x295   :  { %6099 = vmatprep.subr.bf16.mxu0 %v8528_v14  ;;  %v8605_v14 = vld [vmem:[#allocation11 + $0x6c0] ss:$8 sps:$4 sm:$0xff]  }
 0x297   :  { %2865 = vmatpush1.bf16.msra.mxu1 %v8523_v17  ;;  %v8613_v17 = vld [vmem:[#allocation11 + $0x6d4] ss:$8 sps:$4 sm:$0xff]  }
 0x298   :  { %6100 = vmatpush1.bf16.msra.mxu0 %v8526_v19  ;;  %2875 = vmatprep.subr.bf16.mxu1 %v8531_v20  ;;  %v8608_v19 = vld [vmem:[#allocation10 + $0x7d0] ss:$8 sps:$4 sm:$0xff]  }
 0x299   :  { %6110 = vmatprep.subr.bf16.mxu0 %v8535_v21  ;;  %v8611_v20 = vld [vmem:[#allocation11 + $0x6d0] ss:$8 sps:$4 sm:$0xff]   ;;  %v8616_v21 = vld [vmem:[#allocation10 + $0x7e4] ss:$8 sps:$4 sm:$0xff]  }
 0x29a   :  { %2867 = vmatmul.mubr.bf16.vlgmr.msra.gmra.mrb[0].mxu1 %v9768_v11  ;;  %v8553_v11 = vld [vmem:[#allocation11 + $0x634] ss:$8 sps:$4 sm:$0xff]  }
 0x29b   :  { %6102 = vmatmul.mubr.bf16.vlgmr.msra.gmra.mrb[4].mxu0 %v9771_v12  ;;  %2876 = vmatpush1.bf16.msra.mxu1 %v8529_v1  ;;  %v8548_v12 = vld [vmem:[#allocation10 + $0x730] ss:$8 sps:$4 sm:$0xff]   ;;  %v8619_v1 = vld [vmem:[#allocation11 + $0x6e4] ss:$8 sps:$4 sm:$0xff]  }
 0x29c   :  { %6111 = vmatpush1.bf16.msra.mxu0 %v8533_v2  ;;  %2877 = vmatprep.subr.bf16.mxu1 %v8538_v5  ;;  %v8614_v2 = vld [vmem:[#allocation10 + $0x7e0] ss:$8 sps:$4 sm:$0xff]  }
 0x29d   :  { %6112 = vmatprep.subr.bf16.mxu0 %v8541_v24  ;;  %2907 = vmatprep.mubr.bf16.mxu1 %v691_v25  ;;  %v8617_v5 = vld [vmem:[#allocation11 + $0x6e0] ss:$8 sps:$4 sm:$0xff]   ;;  %v8622_v24 = vld [vmem:[#allocation10 + $0x7f4] ss:$8 sps:$4 sm:$0xff]  }
 0x29e   :  { %6142 = vmatprep.mubr.bf16.mxu0 %v3884_v26  ;;  %v8625_v25 = vld [vmem:[#allocation11 + $0x6f4] ss:$8 sps:$4 sm:$0xff]   ;;  %v3869_v26 = vcombine.high %v9779_v15, %v9779_v15  ;;  %v8627_v15 = vld [vmem:[#allocation10 + $0x800] ss:$8 sps:$4 sm:$0xff]  }
 0x29f   :  { %2878 = vmatpush1.bf16.msra.mxu1 %v8536_v27  ;;  %v9798_v27 = vld [vmem:[#allocation5 + $0x20] sm:$0xff] }
 0x2a0   :  { %6113 = vmatpush1.bf16.msra.mxu0 %v8539_v29  ;;  %2879 = vmatprep.subr.bf16.mxu1 %v8544_v30  ;;  %v8620_v29 = vld [vmem:[#allocation10 + $0x7f0] ss:$8 sps:$4 sm:$0xff]  }
 0x2a1   :  { %6114 = vmatprep.subr.bf16.mxu0 %v8547_v31  ;;  %v8623_v30 = vld [vmem:[#allocation11 + $0x6f0] ss:$8 sps:$4 sm:$0xff]   ;;  %v8629_v31 = vld [vmem:[#allocation10 + $0x804] ss:$8 sps:$4 sm:$0xff]  }
 0x2a3   :  { %2880 = vmatpush1.bf16.msra.mxu1 %v8542_v32  ;;  %v8632_v32 = vld [vmem:[#allocation11 + $0x704] ss:$8 sps:$4 sm:$0xff]  }
 0x2a4   :  { %6115 = vmatpush1.bf16.msra.mxu0 %v8545_v37  ;;  %2881 = vmatprep.subr.bf16.mxu1 %v8550_v39  ;;  %v9802_v37 = vrot.slane %v9798_v27, %v9671_v38  ;;  %v9805_v39 = vrot.slane %v3869_v26, %v9671_v38  ;;  %v8707_v26 = vld [vmem:[#allocation10 + $0x8d4] ss:$8 sps:$4 sm:$0xff]  }
 0x2a5   :  { %6116 = vmatprep.subr.bf16.mxu0 %v8553_v11  ;;  %v8630_v11 = vld [vmem:[#allocation11 + $0x700] ss:$8 sps:$4 sm:$0xff]  }
 0x2a7   :  { %2882 = vmatpush1.bf16.msra.mxu1 %v8548_v12  ;;  %v8635_v12 = vld [vmem:[#allocation10 + $0x814] ss:$8 sps:$4 sm:$0xff]  }
 0x2a8   :  { %6117 = vmatpush1.bf16.msra.mxu0 %v8551_v40  ;;  %2883 = vmatprep.subr.bf16.mxu1 %v8556_v44  ;;  %v8638_v40 = vld [vmem:[#allocation11 + $0x714] ss:$8 sps:$4 sm:$0xff]   ;;  %v707_v44 = vcombine.high %v9802_v37, %v9802_v37 }
 0x2a9   :  { %6118 = vmatprep.subr.bf16.mxu0 %v8559_v18  ;;  %v3885_v18 = vcombine.high %v9805_v39, %v9805_v39 }
 0x2ab   :  { %2884 = vmatpush1.bf16.msra.mxu1 %v8554_v45  ;;  %v8633_v45 = vld [vmem:[#allocation10 + $0x810] ss:$8 sps:$4 sm:$0xff]  }
 0x2ac   :  { %6119 = vmatpush1.bf16.msra.mxu0 %v8557_v46  ;;  %2885 = vmatprep.subr.bf16.mxu1 %v8562_v47  ;;  %v8636_v46 = vld [vmem:[#allocation11 + $0x710] ss:$8 sps:$4 sm:$0xff]   ;;  %v8641_v47 = vld [vmem:[#allocation10 + $0x824] ss:$8 sps:$4 sm:$0xff]  }
 0x2ad   :  { %6120 = vmatprep.subr.bf16.mxu0 %v8565_v48  ;;  %v8644_v48 = vld [vmem:[#allocation11 + $0x724] ss:$8 sps:$4 sm:$0xff]  }
 0x2af   :  { %2886 = vmatpush1.bf16.msra.mxu1 %v8560_v49  ;;  %v8639_v49 = vld [vmem:[#allocation10 + $0x820] ss:$8 sps:$4 sm:$0xff]  }
 0x2b0   :  { %6121 = vmatpush1.bf16.msra.mxu0 %v8563_v50  ;;  %2887 = vmatprep.subr.bf16.mxu1 %v8568_v52  ;;  %v8642_v50 = vld [vmem:[#allocation11 + $0x720] ss:$8 sps:$4 sm:$0xff]   ;;  %v8647_v52 = vld [vmem:[#allocation10 + $0x834] ss:$8 sps:$4 sm:$0xff]  }
 0x2b1   :  { %6122 = vmatprep.subr.bf16.mxu0 %v8571_v53  ;;  %v8648_v53 = vld [vmem:[#allocation11 + $0x730] ss:$8 sps:$4 sm:$0xff]  }
 0x2b3   :  { %2888 = vmatpush1.bf16.msra.mxu1 %v8566_v54  ;;  %v8653_v54 = vld [vmem:[#allocation10 + $0x844] ss:$8 sps:$4 sm:$0xff]  }
 0x2b4   :  { %6123 = vmatpush1.bf16.msra.mxu0 %v8569_v55  ;;  %2889 = vmatprep.subr.bf16.mxu1 %v8574_v36  ;;  %v8656_v55 = vld [vmem:[#allocation11 + $0x744] ss:$8 sps:$4 sm:$0xff]   ;;  %v8651_v36 = vld [vmem:[#allocation10 + $0x840] ss:$8 sps:$4 sm:$0xff]  }
 0x2b5   :  { %6124 = vmatprep.subr.bf16.mxu0 %v8577_v56  ;;  %v8654_v56 = vld [vmem:[#allocation11 + $0x740] ss:$8 sps:$4 sm:$0xff]  }
 0x2b7   :  { %2890 = vmatpush1.bf16.msra.mxu1 %v8572_v57  ;;  %v8659_v57 = vld [vmem:[#allocation10 + $0x854] ss:$8 sps:$4 sm:$0xff]  }
 0x2b8   :  { %6125 = vmatpush1.bf16.msra.mxu0 %v8575_v58  ;;  %2891 = vmatprep.subr.bf16.mxu1 %v8580_v60  ;;  %v8662_v58 = vld [vmem:[#allocation11 + $0x754] ss:$8 sps:$4 sm:$0xff]   ;;  %v8657_v60 = vld [vmem:[#allocation10 + $0x850] ss:$8 sps:$4 sm:$0xff]  }
 0x2b9   :  { %6126 = vmatprep.subr.bf16.mxu0 %v8583_v61  ;;  %v8660_v61 = vld [vmem:[#allocation11 + $0x750] ss:$8 sps:$4 sm:$0xff]  }
 0x2bb   :  { %2892 = vmatpush1.bf16.msra.mxu1 %v8578_v62  ;;  %v8665_v62 = vld [vmem:[#allocation10 + $0x864] ss:$8 sps:$4 sm:$0xff]  }
 0x2bc   :  { %6127 = vmatpush1.bf16.msra.mxu0 %v8581_v63  ;;  %2893 = vmatprep.subr.bf16.mxu1 %v8586_v0  ;;  %v8668_v63 = vld [vmem:[#allocation11 + $0x764] ss:$8 sps:$4 sm:$0xff]   ;;  %v8663_v0 = vld [vmem:[#allocation10 + $0x860] ss:$8 sps:$4 sm:$0xff]  }
 0x2bd   :  { %6128 = vmatprep.subr.bf16.mxu0 %v8589_v42  ;;  %v8666_v42 = vld [vmem:[#allocation11 + $0x760] ss:$8 sps:$4 sm:$0xff]  }
 0x2bf   :  { %2894 = vmatpush1.bf16.msra.mxu1 %v8584_v43  ;;  %v8671_v43 = vld [vmem:[#allocation10 + $0x874] ss:$8 sps:$4 sm:$0xff]  }
 0x2c0   :  { %6129 = vmatpush1.bf16.msra.mxu0 %v8587_v51  ;;  %2895 = vmatprep.subr.bf16.mxu1 %v8592_v3  ;;  %v8674_v51 = vld [vmem:[#allocation11 + $0x774] ss:$8 sps:$4 sm:$0xff]   ;;  %v8669_v3 = vld [vmem:[#allocation10 + $0x870] ss:$8 sps:$4 sm:$0xff]  }
 0x2c1   :  { %6130 = vmatprep.subr.bf16.mxu0 %v8595_v4  ;;  %v8672_v4 = vld [vmem:[#allocation11 + $0x770] ss:$8 sps:$4 sm:$0xff]  }
 0x2c3   :  { %2896 = vmatpush1.bf16.msra.mxu1 %v8590_v6  ;;  %v8677_v6 = vld [vmem:[#allocation10 + $0x884] ss:$8 sps:$4 sm:$0xff]  }
 0x2c4   :  { %6131 = vmatpush1.bf16.msra.mxu0 %v8593_v7  ;;  %2897 = vmatprep.subr.bf16.mxu1 %v8598_v8  ;;  %v8680_v7 = vld [vmem:[#allocation11 + $0x784] ss:$8 sps:$4 sm:$0xff]   ;;  %v8675_v8 = vld [vmem:[#allocation10 + $0x880] ss:$8 sps:$4 sm:$0xff]  }
 0x2c5   :  { %6132 = vmatprep.subr.bf16.mxu0 %v8601_v9  ;;  %v8678_v9 = vld [vmem:[#allocation11 + $0x780] ss:$8 sps:$4 sm:$0xff]  }
 0x2c7   :  { %2898 = vmatpush1.bf16.msra.mxu1 %v8596_v10  ;;  %v8683_v10 = vld [vmem:[#allocation10 + $0x894] ss:$8 sps:$4 sm:$0xff]  }
 0x2c8   :  { %6133 = vmatpush1.bf16.msra.mxu0 %v8599_v35  ;;  %2899 = vmatprep.subr.bf16.mxu1 %v8604_v28  ;;  %v8686_v35 = vld [vmem:[#allocation11 + $0x794] ss:$8 sps:$4 sm:$0xff]   ;;  %v8681_v28 = vld [vmem:[#allocation10 + $0x890] ss:$8 sps:$4 sm:$0xff]  }
 0x2c9   :  { %6134 = vmatprep.subr.bf16.mxu0 %v8607_v59  ;;  %v8684_v59 = vld [vmem:[#allocation11 + $0x790] ss:$8 sps:$4 sm:$0xff]  }
 0x2cb   :  { %2900 = vmatpush1.bf16.msra.mxu1 %v8602_v13  ;;  %v8689_v13 = vld [vmem:[#allocation10 + $0x8a4] ss:$8 sps:$4 sm:$0xff]  }
 0x2cc   :  { %6135 = vmatpush1.bf16.msra.mxu0 %v8605_v14  ;;  %2901 = vmatprep.subr.bf16.mxu1 %v8610_v16  ;;  %v8692_v14 = vld [vmem:[#allocation11 + $0x7a4] ss:$8 sps:$4 sm:$0xff]   ;;  %v8687_v16 = vld [vmem:[#allocation10 + $0x8a0] ss:$8 sps:$4 sm:$0xff]  }
 0x2cd   :  { %6136 = vmatprep.subr.bf16.mxu0 %v8613_v17  ;;  %v8690_v17 = vld [vmem:[#allocation11 + $0x7a0] ss:$8 sps:$4 sm:$0xff]  }
 0x2cf   :  { %2902 = vmatpush1.bf16.msra.mxu1 %v8608_v19  ;;  %v8695_v19 = vld [vmem:[#allocation10 + $0x8b4] ss:$8 sps:$4 sm:$0xff]  }
 0x2d0   :  { %6137 = vmatpush1.bf16.msra.mxu0 %v8611_v20  ;;  %2903 = vmatprep.subr.bf16.mxu1 %v8616_v21  ;;  %v8698_v20 = vld [vmem:[#allocation11 + $0x7b4] ss:$8 sps:$4 sm:$0xff]   ;;  %v8693_v21 = vld [vmem:[#allocation10 + $0x8b0] ss:$8 sps:$4 sm:$0xff]  }
 0x2d1   :  { %6138 = vmatprep.subr.bf16.mxu0 %v8619_v1  ;;  %v8696_v1 = vld [vmem:[#allocation11 + $0x7b0] ss:$8 sps:$4 sm:$0xff]  }
 0x2d3   :  { %2904 = vmatpush1.bf16.msra.mxu1 %v8614_v2  ;;  %v8701_v2 = vld [vmem:[#allocation10 + $0x8c4] ss:$8 sps:$4 sm:$0xff]  }
 0x2d4   :  { %6139 = vmatpush1.bf16.msra.mxu0 %v8617_v5  ;;  %2905 = vmatprep.subr.bf16.mxu1 %v8622_v24  ;;  %v8704_v5 = vld [vmem:[#allocation11 + $0x7c4] ss:$8 sps:$4 sm:$0xff]   ;;  %v8699_v24 = vld [vmem:[#allocation10 + $0x8c0] ss:$8 sps:$4 sm:$0xff]  }
 0x2d5   :  { %6140 = vmatprep.subr.bf16.mxu0 %v8625_v25  ;;  %v8702_v25 = vld [vmem:[#allocation11 + $0x7c0] ss:$8 sps:$4 sm:$0xff]  }
 0x2d7   :  { %2906 = vmatpush1.bf16.msra.mxu1 %v8620_v29  ;;  %v8710_v29 = vld [vmem:[#allocation11 + $0x7d4] ss:$8 sps:$4 sm:$0xff]  }
 0x2d8   :  { %6141 = vmatpush1.bf16.msra.mxu0 %v8623_v30  ;;  %2916 = vmatprep.subr.bf16.mxu1 %v8629_v31  ;;  %v8705_v30 = vld [vmem:[#allocation10 + $0x8d0] ss:$8 sps:$4 sm:$0xff]  }
 0x2d9   :  { %6151 = vmatprep.subr.bf16.mxu0 %v8632_v32  ;;  %v8708_v31 = vld [vmem:[#allocation11 + $0x7d0] ss:$8 sps:$4 sm:$0xff]   ;;  %v8713_v32 = vld [vmem:[#allocation10 + $0x8e4] ss:$8 sps:$4 sm:$0xff]  }
 0x2da   :  { %2908 = vmatmul.mubr.bf16.vlgmr.msra.gmra.mrb[0].mxu1 %v9784_v22  ;;  %v8650_v22 = vld [vmem:[#allocation11 + $0x734] ss:$8 sps:$4 sm:$0xff]  }
 0x2db   :  { %6143 = vmatmul.mubr.bf16.vlgmr.msra.gmra.mrb[4].mxu0 %v9788_v23  ;;  %2917 = vmatpush1.bf16.msra.mxu1 %v8627_v15  ;;  %v8645_v23 = vld [vmem:[#allocation10 + $0x830] ss:$8 sps:$4 sm:$0xff]   ;;  %v8716_v15 = vld [vmem:[#allocation11 + $0x7e4] ss:$8 sps:$4 sm:$0xff]  }
 0x2dc   :  { %6152 = vmatpush1.bf16.msra.mxu0 %v8630_v11  ;;  %2918 = vmatprep.subr.bf16.mxu1 %v8635_v12  ;;  %v8711_v11 = vld [vmem:[#allocation10 + $0x8e0] ss:$8 sps:$4 sm:$0xff]  }
 0x2dd   :  { %6153 = vmatprep.subr.bf16.mxu0 %v8638_v40  ;;  %2948 = vmatprep.mubr.bf16.mxu1 %v707_v44  ;;  %v8714_v12 = vld [vmem:[#allocation11 + $0x7e0] ss:$8 sps:$4 sm:$0xff]   ;;  %v8719_v40 = vld [vmem:[#allocation10 + $0x8f4] ss:$8 sps:$4 sm:$0xff]  }
 0x2de   :  { %6183 = vmatprep.mubr.bf16.mxu0 %v3885_v18  ;;  %v8722_v44 = vld [vmem:[#allocation11 + $0x7f4] ss:$8 sps:$4 sm:$0xff]   ;;  %v692_v18 = vcombine.high %v9798_v27, %v9798_v27  ;;  %v8723_v27 = vld [vmem:[#allocation10 + $0x900] ss:$8 sps:$4 sm:$0xff]  }
 0x2df   :  { %2919 = vmatpush1.bf16.msra.mxu1 %v8633_v45  ;;  %v9815_v45 = vld [vmem:[#allocation7 + $0x20] sm:$0xff] }
 0x2e0   :  { %6154 = vmatpush1.bf16.msra.mxu0 %v8636_v46  ;;  %2920 = vmatprep.subr.bf16.mxu1 %v8641_v47  ;;  %v8717_v46 = vld [vmem:[#allocation10 + $0x8f0] ss:$8 sps:$4 sm:$0xff]  }
 0x2e1   :  { %6155 = vmatprep.subr.bf16.mxu0 %v8644_v48  ;;  %v8720_v47 = vld [vmem:[#allocation11 + $0x7f0] ss:$8 sps:$4 sm:$0xff]   ;;  %v8725_v48 = vld [vmem:[#allocation10 + $0x904] ss:$8 sps:$4 sm:$0xff]  }
 0x2e3   :  { %2921 = vmatpush1.bf16.msra.mxu1 %v8639_v49  ;;  %v8729_v49 = vld [vmem:[#allocation11 + $0x804] ss:$8 sps:$4 sm:$0xff]  }
 0x2e4   :  { %6156 = vmatpush1.bf16.msra.mxu0 %v8642_v50  ;;  %2922 = vmatprep.subr.bf16.mxu1 %v8647_v52  ;;  %v9818_v50 = vrot.slane %v692_v18, %v9671_v38  ;;  %v9822_v52 = vrot.slane %v9815_v45, %v9671_v38  ;;  %v8804_v18 = vld [vmem:[#allocation10 + $0x9d4] ss:$8 sps:$4 sm:$0xff]  }
 0x2e5   :  { %6157 = vmatprep.subr.bf16.mxu0 %v8650_v22  ;;  %v8727_v22 = vld [vmem:[#allocation11 + $0x800] ss:$8 sps:$4 sm:$0xff]  }
 0x2e7   :  { %2923 = vmatpush1.bf16.msra.mxu1 %v8645_v23  ;;  %v8732_v23 = vld [vmem:[#allocation10 + $0x914] ss:$8 sps:$4 sm:$0xff]  }
 0x2e8   :  { %6158 = vmatpush1.bf16.msra.mxu0 %v8648_v53  ;;  %2924 = vmatprep.subr.bf16.mxu1 %v8653_v54  ;;  %v8735_v53 = vld [vmem:[#allocation11 + $0x814] ss:$8 sps:$4 sm:$0xff]   ;;  %v708_v54 = vcombine.high %v9818_v50, %v9818_v50 }
 0x2e9   :  { %6159 = vmatprep.subr.bf16.mxu0 %v8656_v55  ;;  %v3901_v55 = vcombine.high %v9822_v52, %v9822_v52 }
 0x2eb   :  { %2925 = vmatpush1.bf16.msra.mxu1 %v8651_v36  ;;  %v8730_v36 = vld [vmem:[#allocation10 + $0x910] ss:$8 sps:$4 sm:$0xff]  }
 0x2ec   :  { %6160 = vmatpush1.bf16.msra.mxu0 %v8654_v56  ;;  %2926 = vmatprep.subr.bf16.mxu1 %v8659_v57  ;;  %v8733_v56 = vld [vmem:[#allocation11 + $0x810] ss:$8 sps:$4 sm:$0xff]   ;;  %v8738_v57 = vld [vmem:[#allocation10 + $0x924] ss:$8 sps:$4 sm:$0xff]  }
 0x2ed   :  { %6161 = vmatprep.subr.bf16.mxu0 %v8662_v58  ;;  %v8741_v58 = vld [vmem:[#allocation11 + $0x824] ss:$8 sps:$4 sm:$0xff]  }
 0x2ef   :  { %2927 = vmatpush1.bf16.msra.mxu1 %v8657_v60  ;;  %v8736_v60 = vld [vmem:[#allocation10 + $0x920] ss:$8 sps:$4 sm:$0xff]  }
 0x2f0   :  { %6162 = vmatpush1.bf16.msra.mxu0 %v8660_v61  ;;  %2928 = vmatprep.subr.bf16.mxu1 %v8665_v62  ;;  %v8739_v61 = vld [vmem:[#allocation11 + $0x820] ss:$8 sps:$4 sm:$0xff]   ;;  %v8744_v62 = vld [vmem:[#allocation10 + $0x934] ss:$8 sps:$4 sm:$0xff]  }
 0x2f1   :  { %6163 = vmatprep.subr.bf16.mxu0 %v8668_v63  ;;  %v8745_v63 = vld [vmem:[#allocation11 + $0x830] ss:$8 sps:$4 sm:$0xff]  }
 0x2f3   :  { %2929 = vmatpush1.bf16.msra.mxu1 %v8663_v0  ;;  %v8750_v0 = vld [vmem:[#allocation10 + $0x944] ss:$8 sps:$4 sm:$0xff]  }
 0x2f4   :  { %6164 = vmatpush1.bf16.msra.mxu0 %v8666_v42  ;;  %2930 = vmatprep.subr.bf16.mxu1 %v8671_v43  ;;  %v8753_v42 = vld [vmem:[#allocation11 + $0x844] ss:$8 sps:$4 sm:$0xff]   ;;  %v8748_v43 = vld [vmem:[#allocation10 + $0x940] ss:$8 sps:$4 sm:$0xff]  }
 0x2f5   :  { %6165 = vmatprep.subr.bf16.mxu0 %v8674_v51  ;;  %v8751_v51 = vld [vmem:[#allocation11 + $0x840] ss:$8 sps:$4 sm:$0xff]  }
 0x2f7   :  { %2931 = vmatpush1.bf16.msra.mxu1 %v8669_v3  ;;  %v8756_v3 = vld [vmem:[#allocation10 + $0x954] ss:$8 sps:$4 sm:$0xff]  }
 0x2f8   :  { %6166 = vmatpush1.bf16.msra.mxu0 %v8672_v4  ;;  %2932 = vmatprep.subr.bf16.mxu1 %v8677_v6  ;;  %v8759_v4 = vld [vmem:[#allocation11 + $0x854] ss:$8 sps:$4 sm:$0xff]   ;;  %v8754_v6 = vld [vmem:[#allocation10 + $0x950] ss:$8 sps:$4 sm:$0xff]  }
 0x2f9   :  { %6167 = vmatprep.subr.bf16.mxu0 %v8680_v7  ;;  %v8757_v7 = vld [vmem:[#allocation11 + $0x850] ss:$8 sps:$4 sm:$0xff]  }
 0x2fb   :  { %2933 = vmatpush1.bf16.msra.mxu1 %v8675_v8  ;;  %v8762_v8 = vld [vmem:[#allocation10 + $0x964] ss:$8 sps:$4 sm:$0xff]  }
 0x2fc   :  { %6168 = vmatpush1.bf16.msra.mxu0 %v8678_v9  ;;  %2934 = vmatprep.subr.bf16.mxu1 %v8683_v10  ;;  %v8765_v9 = vld [vmem:[#allocation11 + $0x864] ss:$8 sps:$4 sm:$0xff]   ;;  %v8760_v10 = vld [vmem:[#allocation10 + $0x960] ss:$8 sps:$4 sm:$0xff]  }
 0x2fd   :  { %6169 = vmatprep.subr.bf16.mxu0 %v8686_v35  ;;  %v8763_v35 = vld [vmem:[#allocation11 + $0x860] ss:$8 sps:$4 sm:$0xff]  }
 0x2ff   :  { %2935 = vmatpush1.bf16.msra.mxu1 %v8681_v28  ;;  %v8768_v28 = vld [vmem:[#allocation10 + $0x974] ss:$8 sps:$4 sm:$0xff]  }
 0x300   :  { %6170 = vmatpush1.bf16.msra.mxu0 %v8684_v59  ;;  %2936 = vmatprep.subr.bf16.mxu1 %v8689_v13  ;;  %v8771_v59 = vld [vmem:[#allocation11 + $0x874] ss:$8 sps:$4 sm:$0xff]   ;;  %v8766_v13 = vld [vmem:[#allocation10 + $0x970] ss:$8 sps:$4 sm:$0xff]  }
 0x301   :  { %6171 = vmatprep.subr.bf16.mxu0 %v8692_v14  ;;  %v8769_v14 = vld [vmem:[#allocation11 + $0x870] ss:$8 sps:$4 sm:$0xff]  }
 0x303   :  { %2937 = vmatpush1.bf16.msra.mxu1 %v8687_v16  ;;  %v8774_v16 = vld [vmem:[#allocation10 + $0x984] ss:$8 sps:$4 sm:$0xff]  }
 0x304   :  { %6172 = vmatpush1.bf16.msra.mxu0 %v8690_v17  ;;  %2938 = vmatprep.subr.bf16.mxu1 %v8695_v19  ;;  %v8777_v17 = vld [vmem:[#allocation11 + $0x884] ss:$8 sps:$4 sm:$0xff]   ;;  %v8772_v19 = vld [vmem:[#allocation10 + $0x980] ss:$8 sps:$4 sm:$0xff]  }
 0x305   :  { %6173 = vmatprep.subr.bf16.mxu0 %v8698_v20  ;;  %v8775_v20 = vld [vmem:[#allocation11 + $0x880] ss:$8 sps:$4 sm:$0xff]  }
 0x307   :  { %2939 = vmatpush1.bf16.msra.mxu1 %v8693_v21  ;;  %v8780_v21 = vld [vmem:[#allocation10 + $0x994] ss:$8 sps:$4 sm:$0xff]  }
 0x308   :  { %6174 = vmatpush1.bf16.msra.mxu0 %v8696_v1  ;;  %2940 = vmatprep.subr.bf16.mxu1 %v8701_v2  ;;  %v8783_v1 = vld [vmem:[#allocation11 + $0x894] ss:$8 sps:$4 sm:$0xff]   ;;  %v8778_v2 = vld [vmem:[#allocation10 + $0x990] ss:$8 sps:$4 sm:$0xff]  }
 0x309   :  { %6175 = vmatprep.subr.bf16.mxu0 %v8704_v5  ;;  %v8781_v5 = vld [vmem:[#allocation11 + $0x890] ss:$8 sps:$4 sm:$0xff]  }
 0x30b   :  { %2941 = vmatpush1.bf16.msra.mxu1 %v8699_v24  ;;  %v8786_v24 = vld [vmem:[#allocation10 + $0x9a4] ss:$8 sps:$4 sm:$0xff]  }
 0x30c   :  { %6176 = vmatpush1.bf16.msra.mxu0 %v8702_v25  ;;  %2942 = vmatprep.subr.bf16.mxu1 %v8707_v26  ;;  %v8789_v25 = vld [vmem:[#allocation11 + $0x8a4] ss:$8 sps:$4 sm:$0xff]   ;;  %v8784_v26 = vld [vmem:[#allocation10 + $0x9a0] ss:$8 sps:$4 sm:$0xff]  }
 0x30d   :  { %6177 = vmatprep.subr.bf16.mxu0 %v8710_v29  ;;  %v8787_v29 = vld [vmem:[#allocation11 + $0x8a0] ss:$8 sps:$4 sm:$0xff]  }
 0x30f   :  { %2943 = vmatpush1.bf16.msra.mxu1 %v8705_v30  ;;  %v8792_v30 = vld [vmem:[#allocation10 + $0x9b4] ss:$8 sps:$4 sm:$0xff]  }
 0x310   :  { %6178 = vmatpush1.bf16.msra.mxu0 %v8708_v31  ;;  %2944 = vmatprep.subr.bf16.mxu1 %v8713_v32  ;;  %v8795_v31 = vld [vmem:[#allocation11 + $0x8b4] ss:$8 sps:$4 sm:$0xff]   ;;  %v8790_v32 = vld [vmem:[#allocation10 + $0x9b0] ss:$8 sps:$4 sm:$0xff]  }
 0x311   :  { %6179 = vmatprep.subr.bf16.mxu0 %v8716_v15  ;;  %v8793_v15 = vld [vmem:[#allocation11 + $0x8b0] ss:$8 sps:$4 sm:$0xff]  }
 0x313   :  { %2945 = vmatpush1.bf16.msra.mxu1 %v8711_v11  ;;  %v8798_v11 = vld [vmem:[#allocation10 + $0x9c4] ss:$8 sps:$4 sm:$0xff]  }
 0x314   :  { %6180 = vmatpush1.bf16.msra.mxu0 %v8714_v12  ;;  %2946 = vmatprep.subr.bf16.mxu1 %v8719_v40  ;;  %v8801_v12 = vld [vmem:[#allocation11 + $0x8c4] ss:$8 sps:$4 sm:$0xff]   ;;  %v8796_v40 = vld [vmem:[#allocation10 + $0x9c0] ss:$8 sps:$4 sm:$0xff]  }
 0x315   :  { %6181 = vmatprep.subr.bf16.mxu0 %v8722_v44  ;;  %v8799_v44 = vld [vmem:[#allocation11 + $0x8c0] ss:$8 sps:$4 sm:$0xff]  }
 0x317   :  { %2947 = vmatpush1.bf16.msra.mxu1 %v8717_v46  ;;  %v8807_v46 = vld [vmem:[#allocation11 + $0x8d4] ss:$8 sps:$4 sm:$0xff]  }
 0x318   :  { %6182 = vmatpush1.bf16.msra.mxu0 %v8720_v47  ;;  %2957 = vmatprep.subr.bf16.mxu1 %v8725_v48  ;;  %v8802_v47 = vld [vmem:[#allocation10 + $0x9d0] ss:$8 sps:$4 sm:$0xff]  }
 0x319   :  { %6192 = vmatprep.subr.bf16.mxu0 %v8729_v49  ;;  %v8805_v48 = vld [vmem:[#allocation11 + $0x8d0] ss:$8 sps:$4 sm:$0xff]   ;;  %v8810_v49 = vld [vmem:[#allocation10 + $0x9e4] ss:$8 sps:$4 sm:$0xff]  }
 0x31a   :  { %2949 = vmatmul.mubr.bf16.vlgmr.msra.gmra.mrb[0].mxu1 %v9802_v37  ;;  %v8747_v37 = vld [vmem:[#allocation11 + $0x834] ss:$8 sps:$4 sm:$0xff]  }
 0x31b   :  { %6184 = vmatmul.mubr.bf16.vlgmr.msra.gmra.mrb[4].mxu0 %v9805_v39  ;;  %2958 = vmatpush1.bf16.msra.mxu1 %v8723_v27  ;;  %v8742_v39 = vld [vmem:[#allocation10 + $0x930] ss:$8 sps:$4 sm:$0xff]   ;;  %v8813_v27 = vld [vmem:[#allocation11 + $0x8e4] ss:$8 sps:$4 sm:$0xff]  }
 0x31c   :  { %6193 = vmatpush1.bf16.msra.mxu0 %v8727_v22  ;;  %2959 = vmatprep.subr.bf16.mxu1 %v8732_v23  ;;  %v8808_v22 = vld [vmem:[#allocation10 + $0x9e0] ss:$8 sps:$4 sm:$0xff]  }
 0x31d   :  { %6194 = vmatprep.subr.bf16.mxu0 %v8735_v53  ;;  %2989 = vmatprep.mubr.bf16.mxu1 %v708_v54  ;;  %v8811_v23 = vld [vmem:[#allocation11 + $0x8e0] ss:$8 sps:$4 sm:$0xff]   ;;  %v8816_v53 = vld [vmem:[#allocation10 + $0x9f4] ss:$8 sps:$4 sm:$0xff]  }
 0x31e   :  { %6224 = vmatprep.mubr.bf16.mxu0 %v3901_v55  ;;  %v8819_v54 = vld [vmem:[#allocation11 + $0x8f4] ss:$8 sps:$4 sm:$0xff]   ;;  %v3886_v55 = vcombine.high %v9815_v45, %v9815_v45 }
 0x31f   :  { %2960 = vmatpush1.bf16.msra.mxu1 %v8730_v36  ;;  %v8814_v36 = vld [vmem:[#allocation10 + $0x9f0] ss:$8 sps:$4 sm:$0xff]   ;;  %v8829_v45 = vld [vmem:[#allocation10 + $0xa14] ss:$8 sps:$4 sm:$0xff]  }
 0x320   :  { %6195 = vmatpush1.bf16.msra.mxu0 %v8733_v56  ;;  %2961 = vmatprep.subr.bf16.mxu1 %v8738_v57  ;;  %v8817_v56 = vld [vmem:[#allocation11 + $0x8f0] ss:$8 sps:$4 sm:$0xff]   ;;  %v8823_v57 = vld [vmem:[#allocation10 + $0xa04] ss:$8 sps:$4 sm:$0xff]  }
 0x321   :  { %6196 = vmatprep.subr.bf16.mxu0 %v8741_v58  ;;  %v8826_v58 = vld [vmem:[#allocation11 + $0x904] ss:$8 sps:$4 sm:$0xff]  }
 0x323   :  { %2962 = vmatpush1.bf16.msra.mxu1 %v8736_v60  ;;  %v9832_v60 = vld.sshfl [vmem:[#allocation5 + $0x28] sm:$0x3f pattern:$0x76325410] }
 0x324   :  { %6197 = vmatpush1.bf16.msra.mxu0 %v8739_v61  ;;  %2963 = vmatprep.subr.bf16.mxu1 %v8744_v62  ;;  %v9835_v61 = vrot.slane %v3886_v55, %v9671_v38  ;;  %v8821_v62 = vld [vmem:[#allocation10 + $0xa00] ss:$8 sps:$4 sm:$0xff]   ;;  %v8904_v55 = vld [vmem:[#allocation11 + $0x9d4] ss:$8 sps:$4 sm:$0xff]  }
 0x325   :  { %6198 = vmatprep.subr.bf16.mxu0 %v8747_v37  ;;  %v8824_v37 = vld [vmem:[#allocation11 + $0x900] ss:$8 sps:$4 sm:$0xff]  }
 0x327   :  { %2964 = vmatpush1.bf16.msra.mxu1 %v8742_v39  ;;  %v8832_v39 = vld [vmem:[#allocation11 + $0x914] ss:$8 sps:$4 sm:$0xff]  }
 0x328   :  { %6199 = vmatpush1.bf16.msra.mxu0 %v8745_v63  ;;  %2965 = vmatprep.subr.bf16.mxu1 %v8750_v0  ;;  %v724_v63 = vcombine.high %v9832_v60, %v9832_v60  ;;  %v3902_v0 = vcombine.high %v9835_v61, %v9835_v61 }
 0x329   :  { %6200 = vmatprep.subr.bf16.mxu0 %v8753_v42  ;;  %v8827_v42 = vld [vmem:[#allocation10 + $0xa10] ss:$8 sps:$4 sm:$0xff]  }
 0x32b   :  { %2966 = vmatpush1.bf16.msra.mxu1 %v8748_v43  ;;  %v8830_v43 = vld [vmem:[#allocation11 + $0x910] ss:$8 sps:$4 sm:$0xff]  }
 0x32c   :  { %6201 = vmatpush1.bf16.msra.mxu0 %v8751_v51  ;;  %2967 = vmatprep.subr.bf16.mxu1 %v8756_v3  ;;  %v8835_v51 = vld [vmem:[#allocation10 + $0xa24] ss:$8 sps:$4 sm:$0xff]  }
 0x32d   :  { %6202 = vmatprep.subr.bf16.mxu0 %v8759_v4  ;;  %v8838_v3 = vld [vmem:[#allocation11 + $0x924] ss:$8 sps:$4 sm:$0xff]   ;;  %v8833_v4 = vld [vmem:[#allocation10 + $0xa20] ss:$8 sps:$4 sm:$0xff]  }
 0x32f   :  { %2968 = vmatpush1.bf16.msra.mxu1 %v8754_v6  ;;  %v8836_v6 = vld [vmem:[#allocation11 + $0x920] ss:$8 sps:$4 sm:$0xff]  }
 0x330   :  { %6203 = vmatpush1.bf16.msra.mxu0 %v8757_v7  ;;  %2969 = vmatprep.subr.bf16.mxu1 %v8762_v8  ;;  %v8841_v7 = vld [vmem:[#allocation10 + $0xa34] ss:$8 sps:$4 sm:$0xff]   ;;  %v8842_v8 = vld [vmem:[#allocation11 + $0x930] ss:$8 sps:$4 sm:$0xff]  }
 0x331   :  { %6204 = vmatprep.subr.bf16.mxu0 %v8765_v9  ;;  %v8847_v9 = vld [vmem:[#allocation10 + $0xa44] ss:$8 sps:$4 sm:$0xff]  }
 0x333   :  { %2970 = vmatpush1.bf16.msra.mxu1 %v8760_v10  ;;  %v8850_v10 = vld [vmem:[#allocation11 + $0x944] ss:$8 sps:$4 sm:$0xff]  }
 0x334   :  { %6205 = vmatpush1.bf16.msra.mxu0 %v8763_v35  ;;  %2971 = vmatprep.subr.bf16.mxu1 %v8768_v28  ;;  %v8845_v35 = vld [vmem:[#allocation10 + $0xa40] ss:$8 sps:$4 sm:$0xff]  }
 0x335   :  { %6206 = vmatprep.subr.bf16.mxu0 %v8771_v59  ;;  %v8848_v28 = vld [vmem:[#allocation11 + $0x940] ss:$8 sps:$4 sm:$0xff]   ;;  %v8853_v59 = vld [vmem:[#allocation10 + $0xa54] ss:$8 sps:$4 sm:$0xff]  }
 0x337   :  { %2972 = vmatpush1.bf16.msra.mxu1 %v8766_v13  ;;  %v8856_v13 = vld [vmem:[#allocation11 + $0x954] ss:$8 sps:$4 sm:$0xff]  }
 0x338   :  { %6207 = vmatpush1.bf16.msra.mxu0 %v8769_v14  ;;  %2973 = vmatprep.subr.bf16.mxu1 %v8774_v16  ;;  %v8851_v14 = vld [vmem:[#allocation10 + $0xa50] ss:$8 sps:$4 sm:$0xff]  }
 0x339   :  { %6208 = vmatprep.subr.bf16.mxu0 %v8777_v17  ;;  %v8854_v16 = vld [vmem:[#allocation11 + $0x950] ss:$8 sps:$4 sm:$0xff]   ;;  %v8859_v17 = vld [vmem:[#allocation10 + $0xa64] ss:$8 sps:$4 sm:$0xff]  }
 0x33b   :  { %2974 = vmatpush1.bf16.msra.mxu1 %v8772_v19  ;;  %v8862_v19 = vld [vmem:[#allocation11 + $0x964] ss:$8 sps:$4 sm:$0xff]  }
 0x33c   :  { %6209 = vmatpush1.bf16.msra.mxu0 %v8775_v20  ;;  %2975 = vmatprep.subr.bf16.mxu1 %v8780_v21  ;;  %v8857_v20 = vld [vmem:[#allocation10 + $0xa60] ss:$8 sps:$4 sm:$0xff]  }
 0x33d   :  { %6210 = vmatprep.subr.bf16.mxu0 %v8783_v1  ;;  %v8860_v21 = vld [vmem:[#allocation11 + $0x960] ss:$8 sps:$4 sm:$0xff]   ;;  %v8865_v1 = vld [vmem:[#allocation10 + $0xa74] ss:$8 sps:$4 sm:$0xff]  }
 0x33f   :  { %2976 = vmatpush1.bf16.msra.mxu1 %v8778_v2  ;;  %v8868_v2 = vld [vmem:[#allocation11 + $0x974] ss:$8 sps:$4 sm:$0xff]  }
 0x340   :  { %6211 = vmatpush1.bf16.msra.mxu0 %v8781_v5  ;;  %2977 = vmatprep.subr.bf16.mxu1 %v8786_v24  ;;  %v8863_v5 = vld [vmem:[#allocation10 + $0xa70] ss:$8 sps:$4 sm:$0xff]  }
 0x341   :  { %6212 = vmatprep.subr.bf16.mxu0 %v8789_v25  ;;  %v8866_v24 = vld [vmem:[#allocation11 + $0x970] ss:$8 sps:$4 sm:$0xff]   ;;  %v8871_v25 = vld [vmem:[#allocation10 + $0xa84] ss:$8 sps:$4 sm:$0xff]  }
 0x343   :  { %2978 = vmatpush1.bf16.msra.mxu1 %v8784_v26  ;;  %v8874_v26 = vld [vmem:[#allocation11 + $0x984] ss:$8 sps:$4 sm:$0xff]  }
 0x344   :  { %6213 = vmatpush1.bf16.msra.mxu0 %v8787_v29  ;;  %2979 = vmatprep.subr.bf16.mxu1 %v8792_v30  ;;  %v8869_v29 = vld [vmem:[#allocation10 + $0xa80] ss:$8 sps:$4 sm:$0xff]  }
 0x345   :  { %6214 = vmatprep.subr.bf16.mxu0 %v8795_v31  ;;  %v8872_v30 = vld [vmem:[#allocation11 + $0x980] ss:$8 sps:$4 sm:$0xff]   ;;  %v8877_v31 = vld [vmem:[#allocation10 + $0xa94] ss:$8 sps:$4 sm:$0xff]  }
 0x347   :  { %2980 = vmatpush1.bf16.msra.mxu1 %v8790_v32  ;;  %v8880_v32 = vld [vmem:[#allocation11 + $0x994] ss:$8 sps:$4 sm:$0xff]  }
 0x348   :  { %6215 = vmatpush1.bf16.msra.mxu0 %v8793_v15  ;;  %2981 = vmatprep.subr.bf16.mxu1 %v8798_v11  ;;  %v8875_v15 = vld [vmem:[#allocation10 + $0xa90] ss:$8 sps:$4 sm:$0xff]  }
 0x349   :  { %6216 = vmatprep.subr.bf16.mxu0 %v8801_v12  ;;  %v8878_v11 = vld [vmem:[#allocation11 + $0x990] ss:$8 sps:$4 sm:$0xff]   ;;  %v8883_v12 = vld [vmem:[#allocation10 + $0xaa4] ss:$8 sps:$4 sm:$0xff]  }
 0x34b   :  { %2982 = vmatpush1.bf16.msra.mxu1 %v8796_v40  ;;  %v8886_v40 = vld [vmem:[#allocation11 + $0x9a4] ss:$8 sps:$4 sm:$0xff]  }
 0x34c   :  { %6217 = vmatpush1.bf16.msra.mxu0 %v8799_v44  ;;  %2983 = vmatprep.subr.bf16.mxu1 %v8804_v18  ;;  %v8881_v44 = vld [vmem:[#allocation10 + $0xaa0] ss:$8 sps:$4 sm:$0xff]  }
 0x34d   :  { %6218 = vmatprep.subr.bf16.mxu0 %v8807_v46  ;;  %v8884_v18 = vld [vmem:[#allocation11 + $0x9a0] ss:$8 sps:$4 sm:$0xff]   ;;  %v8889_v46 = vld [vmem:[#allocation10 + $0xab4] ss:$8 sps:$4 sm:$0xff]  }
 0x34f   :  { %2984 = vmatpush1.bf16.msra.mxu1 %v8802_v47  ;;  %v8892_v47 = vld [vmem:[#allocation11 + $0x9b4] ss:$8 sps:$4 sm:$0xff]  }
 0x350   :  { %6219 = vmatpush1.bf16.msra.mxu0 %v8805_v48  ;;  %2985 = vmatprep.subr.bf16.mxu1 %v8810_v49  ;;  %v8887_v48 = vld [vmem:[#allocation10 + $0xab0] ss:$8 sps:$4 sm:$0xff]  }
 0x351   :  { %6220 = vmatprep.subr.bf16.mxu0 %v8813_v27  ;;  %v8890_v49 = vld [vmem:[#allocation11 + $0x9b0] ss:$8 sps:$4 sm:$0xff]   ;;  %v8895_v27 = vld [vmem:[#allocation10 + $0xac4] ss:$8 sps:$4 sm:$0xff]  }
 0x353   :  { %2986 = vmatpush1.bf16.msra.mxu1 %v8808_v22  ;;  %v8898_v22 = vld [vmem:[#allocation11 + $0x9c4] ss:$8 sps:$4 sm:$0xff]  }
 0x354   :  { %6221 = vmatpush1.bf16.msra.mxu0 %v8811_v23  ;;  %2987 = vmatprep.subr.bf16.mxu1 %v8816_v53  ;;  %v8893_v23 = vld [vmem:[#allocation10 + $0xac0] ss:$8 sps:$4 sm:$0xff]  }
 0x355   :  { %6222 = vmatprep.subr.bf16.mxu0 %v8819_v54  ;;  %v8896_v53 = vld [vmem:[#allocation11 + $0x9c0] ss:$8 sps:$4 sm:$0xff]   ;;  %v8901_v54 = vld [vmem:[#allocation10 + $0xad4] ss:$8 sps:$4 sm:$0xff]  }
 0x357   :  { %2988 = vmatpush1.bf16.msra.mxu1 %v8814_v36  ;;  %v8899_v36 = vld [vmem:[#allocation10 + $0xad0] ss:$8 sps:$4 sm:$0xff]  }
 0x358   :  { %6223 = vmatpush1.bf16.msra.mxu0 %v8817_v56  ;;  %2998 = vmatprep.subr.bf16.mxu1 %v8823_v57  ;;  %v8902_v56 = vld [vmem:[#allocation11 + $0x9d0] ss:$8 sps:$4 sm:$0xff]   ;;  %v8907_v57 = vld [vmem:[#allocation10 + $0xae4] ss:$8 sps:$4 sm:$0xff]  }
 0x359   :  { %6233 = vmatprep.subr.bf16.mxu0 %v8826_v58  ;;  %v8910_v58 = vld [vmem:[#allocation11 + $0x9e4] ss:$8 sps:$4 sm:$0xff]  }
 0x35a   :  { %2990 = vmatmul.mubr.bf16.vlgmr.msra.gmra.mrb[0].mxu1 %v9818_v50  ;;  %v8844_v50 = vld [vmem:[#allocation11 + $0x934] ss:$8 sps:$4 sm:$0xff]  }
 0x35b   :  { %6225 = vmatmul.mubr.bf16.vlgmr.msra.gmra.mrb[4].mxu0 %v9822_v52  ;;  %2999 = vmatpush1.bf16.msra.mxu1 %v8821_v62  ;;  %v8839_v52 = vld [vmem:[#allocation10 + $0xa30] ss:$8 sps:$4 sm:$0xff]   ;;  %v8905_v62 = vld [vmem:[#allocation10 + $0xae0] ss:$8 sps:$4 sm:$0xff]  }
 0x35c   :  { %6234 = vmatpush1.bf16.msra.mxu0 %v8824_v37  ;;  %3000 = vmatprep.subr.bf16.mxu1 %v8829_v45  ;;  %v8908_v37 = vld [vmem:[#allocation11 + $0x9e0] ss:$8 sps:$4 sm:$0xff]   ;;  %v8913_v45 = vld [vmem:[#allocation10 + $0xaf4] ss:$8 sps:$4 sm:$0xff]  }
 0x35d   :  { %6235 = vmatprep.subr.bf16.mxu0 %v8832_v39  ;;  %3030 = vmatprep.mubr.bf16.mxu1 %v724_v63  ;;  %v8916_v39 = vld [vmem:[#allocation11 + $0x9f4] ss:$8 sps:$4 sm:$0xff]  }
 0x35e   :  { %6265 = vmatprep.mubr.bf16.mxu0 %v3902_v0  ;;  %v9843_v63 = vld [vmem:[#allocation7 + $0x28] sm:$0xff] }
 0x35f   :  { %3001 = vmatpush1.bf16.msra.mxu1 %v8827_v42  ;;  %v8911_v0 = vld [vmem:[#allocation10 + $0xaf0] ss:$8 sps:$4 sm:$0xff]  }
 0x360   :  { %6236 = vmatpush1.bf16.msra.mxu0 %v8830_v43  ;;  %3002 = vmatprep.subr.bf16.mxu1 %v8835_v51  ;;  %v8914_v42 = vld [vmem:[#allocation11 + $0x9f0] ss:$8 sps:$4 sm:$0xff]   ;;  %v8919_v43 = vld [vmem:[#allocation8 + $0x4] ss:$8 sps:$4 sm:$0xff]  }
 0x361   :  { %6237 = vmatprep.subr.bf16.mxu0 %v8838_v3  ;;  %v8923_v51 = vld [vmem:[#allocation11 + $0xa04] ss:$8 sps:$4 sm:$0xff]   ;;  %v9845_v3 = vld.sshfl [vmem:[#allocation2] sm:$0x3f pattern:$0x76325410] }
 0x363   :  { %3003 = vmatpush1.bf16.msra.mxu1 %v8833_v4  ;;  %v9849_v4 = vrot.slane %v9843_v63, %v9671_v38 }
 0x364   :  { %6238 = vmatpush1.bf16.msra.mxu0 %v8836_v6  ;;  %3004 = vmatprep.subr.bf16.mxu1 %v8841_v7  ;;  %v8917_v6 = vld [vmem:[#allocation8] ss:$8 sps:$4 sm:$0xff]  }
 0x365   :  { %6239 = vmatprep.subr.bf16.mxu0 %v8844_v50  ;;  %v8921_v7 = vld [vmem:[#allocation11 + $0xa00] ss:$8 sps:$4 sm:$0xff]   ;;  %v8926_v50 = vld [vmem:[#allocation8 + $0x14] ss:$8 sps:$4 sm:$0xff]  }
 0x367   :  { %3005 = vmatpush1.bf16.msra.mxu1 %v8839_v52  ;;  %v8929_v52 = vld [vmem:[#allocation11 + $0xa14] ss:$8 sps:$4 sm:$0xff]  }
 0x368   :  { %6240 = vmatpush1.bf16.msra.mxu0 %v8842_v8  ;;  %3006 = vmatprep.subr.bf16.mxu1 %v8847_v9  ;;  %v3096_v8 = vcombine.high %v9845_v3, %v9845_v3  ;;  %v3918_v9 = vcombine.high %v9849_v4, %v9849_v4 }
 0x369   :  { %6241 = vmatprep.subr.bf16.mxu0 %v8850_v10  ;;  %v8924_v10 = vld [vmem:[#allocation8 + $0x10] ss:$8 sps:$4 sm:$0xff]  }
 0x36b   :  { %3007 = vmatpush1.bf16.msra.mxu1 %v8845_v35  ;;  %v8927_v35 = vld [vmem:[#allocation11 + $0xa10] ss:$8 sps:$4 sm:$0xff]  }
 0x36c   :  { %6242 = vmatpush1.bf16.msra.mxu0 %v8848_v28  ;;  %3008 = vmatprep.subr.bf16.mxu1 %v8853_v59  ;;  %v8932_v28 = vld [vmem:[#allocation8 + $0x24] ss:$8 sps:$4 sm:$0xff]  }
 0x36d   :  { %6243 = vmatprep.subr.bf16.mxu0 %v8856_v13  ;;  %v8935_v59 = vld [vmem:[#allocation11 + $0xa24] ss:$8 sps:$4 sm:$0xff]   ;;  %v8930_v13 = vld [vmem:[#allocation8 + $0x20] ss:$8 sps:$4 sm:$0xff]  }
 0x36f   :  { %3009 = vmatpush1.bf16.msra.mxu1 %v8851_v14  ;;  %v8933_v14 = vld [vmem:[#allocation11 + $0xa20] ss:$8 sps:$4 sm:$0xff]  }
 0x370   :  { %6244 = vmatpush1.bf16.msra.mxu0 %v8854_v16  ;;  %3010 = vmatprep.subr.bf16.mxu1 %v8859_v17  ;;  %v8938_v16 = vld [vmem:[#allocation8 + $0x34] ss:$8 sps:$4 sm:$0xff]   ;;  %v8939_v17 = vld [vmem:[#allocation11 + $0xa30] ss:$8 sps:$4 sm:$0xff]  }
 0x371   :  { %6245 = vmatprep.subr.bf16.mxu0 %v8862_v19  ;;  %v8944_v19 = vld [vmem:[#allocation8 + $0x44] ss:$8 sps:$4 sm:$0xff]  }
 0x373   :  { %3011 = vmatpush1.bf16.msra.mxu1 %v8857_v20  ;;  %v8947_v20 = vld [vmem:[#allocation11 + $0xa44] ss:$8 sps:$4 sm:$0xff]  }
 0x374   :  { %6246 = vmatpush1.bf16.msra.mxu0 %v8860_v21  ;;  %3012 = vmatprep.subr.bf16.mxu1 %v8865_v1  ;;  %v8942_v21 = vld [vmem:[#allocation8 + $0x40] ss:$8 sps:$4 sm:$0xff]  }
 0x375   :  { %6247 = vmatprep.subr.bf16.mxu0 %v8868_v2  ;;  %v8945_v1 = vld [vmem:[#allocation11 + $0xa40] ss:$8 sps:$4 sm:$0xff]   ;;  %v8950_v2 = vld [vmem:[#allocation8 + $0x54] ss:$8 sps:$4 sm:$0xff]  }
 0x377   :  { %3013 = vmatpush1.bf16.msra.mxu1 %v8863_v5  ;;  %v8953_v5 = vld [vmem:[#allocation11 + $0xa54] ss:$8 sps:$4 sm:$0xff]  }
 0x378   :  { %6248 = vmatpush1.bf16.msra.mxu0 %v8866_v24  ;;  %3014 = vmatprep.subr.bf16.mxu1 %v8871_v25  ;;  %v8948_v24 = vld [vmem:[#allocation8 + $0x50] ss:$8 sps:$4 sm:$0xff]  }
 0x379   :  { %6249 = vmatprep.subr.bf16.mxu0 %v8874_v26  ;;  %v8951_v25 = vld [vmem:[#allocation11 + $0xa50] ss:$8 sps:$4 sm:$0xff]   ;;  %v8956_v26 = vld [vmem:[#allocation8 + $0x64] ss:$8 sps:$4 sm:$0xff]  }
 0x37b   :  { %3015 = vmatpush1.bf16.msra.mxu1 %v8869_v29  ;;  %v8959_v29 = vld [vmem:[#allocation11 + $0xa64] ss:$8 sps:$4 sm:$0xff]  }
 0x37c   :  { %6250 = vmatpush1.bf16.msra.mxu0 %v8872_v30  ;;  %3016 = vmatprep.subr.bf16.mxu1 %v8877_v31  ;;  %v8954_v30 = vld [vmem:[#allocation8 + $0x60] ss:$8 sps:$4 sm:$0xff]  }
 0x37d   :  { %6251 = vmatprep.subr.bf16.mxu0 %v8880_v32  ;;  %v8957_v31 = vld [vmem:[#allocation11 + $0xa60] ss:$8 sps:$4 sm:$0xff]   ;;  %v8962_v32 = vld [vmem:[#allocation8 + $0x74] ss:$8 sps:$4 sm:$0xff]  }
 0x37f   :  { %3017 = vmatpush1.bf16.msra.mxu1 %v8875_v15  ;;  %v8965_v15 = vld [vmem:[#allocation11 + $0xa74] ss:$8 sps:$4 sm:$0xff]  }
 0x380   :  { %6252 = vmatpush1.bf16.msra.mxu0 %v8878_v11  ;;  %3018 = vmatprep.subr.bf16.mxu1 %v8883_v12  ;;  %v8960_v11 = vld [vmem:[#allocation8 + $0x70] ss:$8 sps:$4 sm:$0xff]  }
 0x381   :  { %6253 = vmatprep.subr.bf16.mxu0 %v8886_v40  ;;  %v8963_v12 = vld [vmem:[#allocation11 + $0xa70] ss:$8 sps:$4 sm:$0xff]   ;;  %v8968_v40 = vld [vmem:[#allocation8 + $0x84] ss:$8 sps:$4 sm:$0xff]  }
 0x383   :  { %3019 = vmatpush1.bf16.msra.mxu1 %v8881_v44  ;;  %v8971_v44 = vld [vmem:[#allocation11 + $0xa84] ss:$8 sps:$4 sm:$0xff]  }
 0x384   :  { %6254 = vmatpush1.bf16.msra.mxu0 %v8884_v18  ;;  %3020 = vmatprep.subr.bf16.mxu1 %v8889_v46  ;;  %v8966_v18 = vld [vmem:[#allocation8 + $0x80] ss:$8 sps:$4 sm:$0xff]  }
 0x385   :  { %6255 = vmatprep.subr.bf16.mxu0 %v8892_v47  ;;  %v8969_v46 = vld [vmem:[#allocation11 + $0xa80] ss:$8 sps:$4 sm:$0xff]   ;;  %v8974_v47 = vld [vmem:[#allocation8 + $0x94] ss:$8 sps:$4 sm:$0xff]  }
 0x387   :  { %3021 = vmatpush1.bf16.msra.mxu1 %v8887_v48  ;;  %v8977_v48 = vld [vmem:[#allocation11 + $0xa94] ss:$8 sps:$4 sm:$0xff]  }
 0x388   :  { %6256 = vmatpush1.bf16.msra.mxu0 %v8890_v49  ;;  %3022 = vmatprep.subr.bf16.mxu1 %v8895_v27  ;;  %v8972_v49 = vld [vmem:[#allocation8 + $0x90] ss:$8 sps:$4 sm:$0xff]  }
 0x389   :  { %6257 = vmatprep.subr.bf16.mxu0 %v8898_v22  ;;  %v8975_v27 = vld [vmem:[#allocation11 + $0xa90] ss:$8 sps:$4 sm:$0xff]   ;;  %v8980_v22 = vld [vmem:[#allocation8 + $0xa4] ss:$8 sps:$4 sm:$0xff]  }
 0x38b   :  { %3023 = vmatpush1.bf16.msra.mxu1 %v8893_v23  ;;  %v8983_v23 = vld [vmem:[#allocation11 + $0xaa4] ss:$8 sps:$4 sm:$0xff]  }
 0x38c   :  { %6258 = vmatpush1.bf16.msra.mxu0 %v8896_v53  ;;  %3024 = vmatprep.subr.bf16.mxu1 %v8901_v54  ;;  %v8978_v53 = vld [vmem:[#allocation8 + $0xa0] ss:$8 sps:$4 sm:$0xff]  }
 0x38d   :  { %6259 = vmatprep.subr.bf16.mxu0 %v8904_v55  ;;  %v8981_v54 = vld [vmem:[#allocation11 + $0xaa0] ss:$8 sps:$4 sm:$0xff]   ;;  %v8986_v55 = vld [vmem:[#allocation8 + $0xb4] ss:$8 sps:$4 sm:$0xff]  }
 0x38f   :  { %3025 = vmatpush1.bf16.msra.mxu1 %v8899_v36  ;;  %v8989_v36 = vld [vmem:[#allocation11 + $0xab4] ss:$8 sps:$4 sm:$0xff]  }
 0x390   :  { %6260 = vmatpush1.bf16.msra.mxu0 %v8902_v56  ;;  %3026 = vmatprep.subr.bf16.mxu1 %v8907_v57  ;;  %v8984_v56 = vld [vmem:[#allocation8 + $0xb0] ss:$8 sps:$4 sm:$0xff]  }
 0x391   :  { %6261 = vmatprep.subr.bf16.mxu0 %v8910_v58  ;;  %v8987_v57 = vld [vmem:[#allocation11 + $0xab0] ss:$8 sps:$4 sm:$0xff]   ;;  %v8992_v58 = vld [vmem:[#allocation8 + $0xc4] ss:$8 sps:$4 sm:$0xff]  }
 0x393   :  { %3027 = vmatpush1.bf16.msra.mxu1 %v8905_v62  ;;  %v8995_v62 = vld [vmem:[#allocation11 + $0xac4] ss:$8 sps:$4 sm:$0xff]  }
 0x394   :  { %6262 = vmatpush1.bf16.msra.mxu0 %v8908_v37  ;;  %3028 = vmatprep.subr.bf16.mxu1 %v8913_v45  ;;  %v8990_v37 = vld [vmem:[#allocation8 + $0xc0] ss:$8 sps:$4 sm:$0xff]  }
 0x395   :  { %6263 = vmatprep.subr.bf16.mxu0 %v8916_v39  ;;  %v8993_v45 = vld [vmem:[#allocation11 + $0xac0] ss:$8 sps:$4 sm:$0xff]   ;;  %v8998_v39 = vld [vmem:[#allocation8 + $0xd4] ss:$8 sps:$4 sm:$0xff]  }
 0x397   :  { %3029 = vmatpush1.bf16.msra.mxu1 %v8911_v0  ;;  %v9001_v0 = vld [vmem:[#allocation11 + $0xad4] ss:$8 sps:$4 sm:$0xff]  }
 0x398   :  { %6264 = vmatpush1.bf16.msra.mxu0 %v8914_v42  ;;  %3340 = vmatprep.subr.bf16.mxu1 %v8919_v43  ;;  %v8996_v42 = vld [vmem:[#allocation8 + $0xd0] ss:$8 sps:$4 sm:$0xff]  }
 0x399   :  { %6274 = vmatprep.subr.bf16.mxu0 %v8923_v51  ;;  %v8999_v43 = vld [vmem:[#allocation11 + $0xad0] ss:$8 sps:$4 sm:$0xff]   ;;  %v9004_v51 = vld [vmem:[#allocation8 + $0xe4] ss:$8 sps:$4 sm:$0xff]  }
 0x39a   :  { %3031 = vmatmul.mubr.bf16.vlgmr.msra.gmra.mrb[0].mxu1 %v9832_v60  ;;  %v8941_v60 = vld [vmem:[#allocation11 + $0xa34] ss:$8 sps:$4 sm:$0xff]  }
 0x39b   :  { %6266 = vmatmul.mubr.bf16.vlgmr.msra.gmra.mrb[4].mxu0 %v9835_v61  ;;  %3341 = vmatpush1.bf16.msra.mxu1 %v8917_v6  ;;  %v8936_v61 = vld [vmem:[#allocation8 + $0x30] ss:$8 sps:$4 sm:$0xff]   ;;  %v9007_v6 = vld [vmem:[#allocation11 + $0xae4] ss:$8 sps:$4 sm:$0xff]  }
 0x39c   :  { %6275 = vmatpush1.bf16.msra.mxu0 %v8921_v7  ;;  %3342 = vmatprep.subr.bf16.mxu1 %v8926_v50  ;;  %v9002_v7 = vld [vmem:[#allocation8 + $0xe0] ss:$8 sps:$4 sm:$0xff]  }
 0x39d   :  { %6276 = vmatprep.subr.bf16.mxu0 %v8929_v52  ;;  %3372 = vmatprep.mubr.bf16.mxu1 %v3096_v8  ;;  %v9005_v50 = vld [vmem:[#allocation11 + $0xae0] ss:$8 sps:$4 sm:$0xff]   ;;  %v3903_v52 = vcombine.high %v9843_v63, %v9843_v63  ;;  %v9010_v8 = vld [vmem:[#allocation8 + $0xf4] ss:$8 sps:$4 sm:$0xff]  }
 0x39e   :  { %6306 = vmatprep.mubr.bf16.mxu0 %v3918_v9  ;;  %v9013_v9 = vld [vmem:[#allocation11 + $0xaf4] ss:$8 sps:$4 sm:$0xff]  }
 0x39f   :  { %3343 = vmatpush1.bf16.msra.mxu1 %v8924_v10  ;;  %v9008_v10 = vld [vmem:[#allocation8 + $0xf0] ss:$8 sps:$4 sm:$0xff]  }
 0x3a0   :  { %6277 = vmatpush1.bf16.msra.mxu0 %v8927_v35  ;;  %3344 = vmatprep.subr.bf16.mxu1 %v8932_v28  ;;  %v9011_v35 = vld [vmem:[#allocation11 + $0xaf0] ss:$8 sps:$4 sm:$0xff]   ;;  %v9860_v28 = vrot.slane %v3903_v52, %v9671_v38  ;;  %v9022_v38 = vld [vmem:[#allocation11 + $0xb24] ss:$8 sps:$4 sm:$0xff]  }
 0x3a1   :  { %6278 = vmatprep.subr.bf16.mxu0 %v8935_v59  ;;  %v9016_v59 = vld [vmem:[#allocation11 + $0xb04] ss:$8 sps:$4 sm:$0xff]   ;;  %v9075_v52 = vld [vmem:[#allocation16 + $0x70] sm:$0xff]  }
 0x3a2   :  { %v3919_v63 = vcombine.high %v9860_v28, %v9860_v28 }
 0x3a3   :  { %3345 = vmatpush1.bf16.msra.mxu1 %v8930_v13  ;;  %v9014_v13 = vld [vmem:[#allocation11 + $0xb00] ss:$8 sps:$4 sm:$0xff]  }
 0x3a4   :  { %6279 = vmatpush1.bf16.msra.mxu0 %v8933_v14  ;;  %3346 = vmatprep.subr.bf16.mxu1 %v8938_v16  ;;  %v9019_v14 = vld [vmem:[#allocation11 + $0xb14] ss:$8 sps:$4 sm:$0xff]   ;;  %v9017_v16 = vld [vmem:[#allocation11 + $0xb10] ss:$8 sps:$4 sm:$0xff]  }
 0x3a5   :  { %6280 = vmatprep.subr.bf16.mxu0 %v8941_v60  ;;  %v9020_v60 = vld [vmem:[#allocation11 + $0xb20] ss:$8 sps:$4 sm:$0xff]  }
 0x3a7   :  { %3347 = vmatpush1.bf16.msra.mxu1 %v8936_v61  ;;  %v9025_v61 = vld [vmem:[#allocation11 + $0xb34] ss:$8 sps:$4 sm:$0xff]  }
 0x3a8   :  { %6281 = vmatpush1.bf16.msra.mxu0 %v8939_v17  ;;  %3348 = vmatprep.subr.bf16.mxu1 %v8944_v19  ;;  %v9023_v17 = vld [vmem:[#allocation11 + $0xb30] ss:$8 sps:$4 sm:$0xff]   ;;  %v9028_v19 = vld [vmem:[#allocation11 + $0xb44] ss:$8 sps:$4 sm:$0xff]  }
 0x3a9   :  { %6282 = vmatprep.subr.bf16.mxu0 %v8947_v20  ;;  %v9026_v20 = vld [vmem:[#allocation11 + $0xb40] ss:$8 sps:$4 sm:$0xff]  }
 0x3ab   :  { %3349 = vmatpush1.bf16.msra.mxu1 %v8942_v21  ;;  %v9031_v21 = vld [vmem:[#allocation11 + $0xb54] ss:$8 sps:$4 sm:$0xff]  }
 0x3ac   :  { %6283 = vmatpush1.bf16.msra.mxu0 %v8945_v1  ;;  %3350 = vmatprep.subr.bf16.mxu1 %v8950_v2  ;;  %v9032_v1 = vld [vmem:[#allocation11 + $0xb60] ss:$8 sps:$4 sm:$0xff]   ;;  %v9037_v2 = vld [vmem:[#allocation11 + $0xb74] ss:$8 sps:$4 sm:$0xff]  }
 0x3ad   :  { %6284 = vmatprep.subr.bf16.mxu0 %v8953_v5  ;;  %v9035_v5 = vld [vmem:[#allocation11 + $0xb70] ss:$8 sps:$4 sm:$0xff]  }
 0x3af   :  { %3351 = vmatpush1.bf16.msra.mxu1 %v8948_v24  ;;  %v9040_v24 = vld [vmem:[#allocation11 + $0xb84] ss:$8 sps:$4 sm:$0xff]  }
 0x3b0   :  { %6285 = vmatpush1.bf16.msra.mxu0 %v8951_v25  ;;  %3352 = vmatprep.subr.bf16.mxu1 %v8956_v26  ;;  %v9038_v25 = vld [vmem:[#allocation11 + $0xb80] ss:$8 sps:$4 sm:$0xff]   ;;  %v9043_v26 = vld [vmem:[#allocation11 + $0xb94] ss:$8 sps:$4 sm:$0xff]  }
 0x3b1   :  { %6286 = vmatprep.subr.bf16.mxu0 %v8959_v29  ;;  %v9041_v29 = vld [vmem:[#allocation11 + $0xb90] ss:$8 sps:$4 sm:$0xff]  }
 0x3b3   :  { %3353 = vmatpush1.bf16.msra.mxu1 %v8954_v30  ;;  %v9046_v30 = vld [vmem:[#allocation11 + $0xba4] ss:$8 sps:$4 sm:$0xff]  }
 0x3b4   :  { %6287 = vmatpush1.bf16.msra.mxu0 %v8957_v31  ;;  %3354 = vmatprep.subr.bf16.mxu1 %v8962_v32  ;;  %v9044_v31 = vld [vmem:[#allocation11 + $0xba0] ss:$8 sps:$4 sm:$0xff]   ;;  %v9049_v32 = vld [vmem:[#allocation11 + $0xbb4] ss:$8 sps:$4 sm:$0xff]  }
 0x3b5   :  { %6288 = vmatprep.subr.bf16.mxu0 %v8965_v15  ;;  %v9047_v15 = vld [vmem:[#allocation11 + $0xbb0] ss:$8 sps:$4 sm:$0xff]  }
 0x3b7   :  { %3355 = vmatpush1.bf16.msra.mxu1 %v8960_v11  ;;  %v9052_v11 = vld [vmem:[#allocation11 + $0xbc4] ss:$8 sps:$4 sm:$0xff]  }
 0x3b8   :  { %6289 = vmatpush1.bf16.msra.mxu0 %v8963_v12  ;;  %3356 = vmatprep.subr.bf16.mxu1 %v8968_v40  ;;  %v9050_v12 = vld [vmem:[#allocation11 + $0xbc0] ss:$8 sps:$4 sm:$0xff]   ;;  %v9055_v40 = vld [vmem:[#allocation11 + $0xbd4] ss:$8 sps:$4 sm:$0xff]  }
 0x3b9   :  { %6290 = vmatprep.subr.bf16.mxu0 %v8971_v44  ;;  %v9053_v44 = vld [vmem:[#allocation11 + $0xbd0] ss:$8 sps:$4 sm:$0xff]  }
 0x3bb   :  { %3357 = vmatpush1.bf16.msra.mxu1 %v8966_v18  ;;  %v9058_v18 = vld [vmem:[#allocation11 + $0xbe4] ss:$8 sps:$4 sm:$0xff]  }
 0x3bc   :  { %6291 = vmatpush1.bf16.msra.mxu0 %v8969_v46  ;;  %3358 = vmatprep.subr.bf16.mxu1 %v8974_v47  ;;  %v9056_v46 = vld [vmem:[#allocation11 + $0xbe0] ss:$8 sps:$4 sm:$0xff]   ;;  %v9061_v47 = vld [vmem:[#allocation11 + $0xbf4] ss:$8 sps:$4 sm:$0xff]  }
 0x3bd   :  { %6292 = vmatprep.subr.bf16.mxu0 %v8977_v48  ;;  %v9059_v48 = vld [vmem:[#allocation11 + $0xbf0] ss:$8 sps:$4 sm:$0xff]  }
 0x3bf   :  { %3359 = vmatpush1.bf16.msra.mxu1 %v8972_v49 }
 0x3c0   :  { %6293 = vmatpush1.bf16.msra.mxu0 %v8975_v27  ;;  %3360 = vmatprep.subr.bf16.mxu1 %v8980_v22 }
 0x3c1   :  { %6294 = vmatprep.subr.bf16.mxu0 %v8983_v23 }
 0x3c3   :  { %3361 = vmatpush1.bf16.msra.mxu1 %v8978_v53 }
 0x3c4   :  { %6295 = vmatpush1.bf16.msra.mxu0 %v8981_v54  ;;  %3362 = vmatprep.subr.bf16.mxu1 %v8986_v55  ;;  %v9063_v55 = vld [vmem:[#allocation16 + $0x40] sm:$0xff]  }
 0x3c5   :  { %6296 = vmatprep.subr.bf16.mxu0 %v8989_v36  ;;  %v9064_v36 = vld [vmem:[#allocation16] sm:$0xff]  }
 0x3c7   :  { %3363 = vmatpush1.bf16.msra.mxu1 %v8984_v56  ;;  %v9065_v56 = vld [vmem:[#allocation16 + $0x48] sm:$0xff]  }
 0x3c8   :  { %6297 = vmatpush1.bf16.msra.mxu0 %v8987_v57  ;;  %3364 = vmatprep.subr.bf16.mxu1 %v8992_v58  ;;  %v9066_v57 = vld [vmem:[#allocation16 + $0x8] sm:$0xff]   ;;  %v9067_v58 = vld [vmem:[#allocation16 + $0x50] sm:$0xff]  }
 0x3c9   :  { %6298 = vmatprep.subr.bf16.mxu0 %v8995_v62  ;;  %v9068_v62 = vld [vmem:[#allocation16 + $0x10] sm:$0xff]  }
 0x3cb   :  { %3365 = vmatpush1.bf16.msra.mxu1 %v8990_v37  ;;  %v9069_v37 = vld [vmem:[#allocation16 + $0x58] sm:$0xff]  }
 0x3cc   :  { %6299 = vmatpush1.bf16.msra.mxu0 %v8993_v45  ;;  %3366 = vmatprep.subr.bf16.mxu1 %v8998_v39  ;;  %v9070_v45 = vld [vmem:[#allocation16 + $0x18] sm:$0xff]   ;;  %v9072_v39 = vld [vmem:[#allocation16 + $0x20] sm:$0xff]  }
 0x3cd   :  { %6300 = vmatprep.subr.bf16.mxu0 %v9001_v0 }
 0x3cf   :  { %3367 = vmatpush1.bf16.msra.mxu1 %v8996_v42 }
 0x3d0   :  { %6301 = vmatpush1.bf16.msra.mxu0 %v8999_v43  ;;  %3368 = vmatprep.subr.bf16.mxu1 %v9004_v51 }
 0x3d1   :  { %6302 = vmatprep.subr.bf16.mxu0 %v9007_v6 }
 0x3d3   :  { %3369 = vmatpush1.bf16.msra.mxu1 %v9002_v7  ;;  %v9073_v7 = vld [vmem:[#allocation16 + $0x68] sm:$0xff]  }
 0x3d4   :  { %6303 = vmatpush1.bf16.msra.mxu0 %v9005_v50  ;;  %3370 = vmatprep.subr.bf16.mxu1 %v9010_v8  ;;  %v9074_v50 = vld [vmem:[#allocation16 + $0x28] sm:$0xff]   ;;  %v9076_v8 = vld [vmem:[#allocation16 + $0x30] sm:$0xff]  }
 0x3d5   :  { %6304 = vmatprep.subr.bf16.mxu0 %v9013_v9  ;;  %v9077_v9 = vld [vmem:[#allocation16 + $0x78] sm:$0xff]  }
 0x3d7   :  { %3371 = vmatpush1.bf16.msra.mxu1 %v9008_v10  ;;  %v9078_v10 = vld [vmem:[#allocation16 + $0x38] sm:$0xff]  }
 0x3d8   :  { %6305 = vmatpush1.bf16.msra.mxu0 %v9011_v35  ;;  %7635 = vmatprep.subr.bf16.mxu1 %v9063_v55 }
 0x3d9   :  { %6315 = vmatprep.subr.bf16.mxu0 %v9016_v59 }
 0x3da   :  { %3373 = vmatmul.mubr.bf16.vlgmr.msra.gmra.mrb[4].mxu1 %v9845_v3  ;;  %v9029_v3 = vld [vmem:[#allocation11 + $0xb50] ss:$8 sps:$4 sm:$0xff]  }
 0x3db   :  { %6307 = vmatmul.mubr.bf16.vlgmr.msra.gmra.mrb[4].mxu0 %v9849_v4  ;;  %v9034_v4 = vld [vmem:[#allocation11 + $0xb64] ss:$8 sps:$4 sm:$0xff]   ;;  %7636 = vmatpush3.bf16.msra.mxu1 %v9064_v36 }
 0x3dc   :  { %6316 = vmatpush1.bf16.msra.mxu0 %v9014_v13  ;;  %6347 = vmatprep.mubr.bf16.mxu0 %v3919_v63 }
 0x3dd   :  { %6317 = vmatprep.subr.bf16.mxu0 %v9019_v14  ;;  %7637 = vmatprep.subr.bf16.mxu1 %v9065_v56 }
 0x3df   :  { %7638 = vmatpush3.bf16.msra.mxu1 %v9066_v57  ;;  %v9413_v57 = vmov 1966171168  }
 0x3e0   :  { %6318 = vmatpush1.bf16.msra.mxu0 %v9017_v16  ;;  %7639 = vmatprep.subr.bf16.mxu1 %v9067_v58  ;;  %v6406_v58 = vunpack.c.l.s4 %v9413_v57 }
 0x3e1   :  { %6319 = vmatprep.subr.bf16.mxu0 %v9022_v38 }
 0x3e3   :  { %7640 = vmatpush3.bf16.msra.mxu1 %v9068_v62  ;;  %v6407_v62 = vunpack.c.0.s8 %v6406_v58 }
 0x3e4   :  { %6320 = vmatpush1.bf16.msra.mxu0 %v9020_v60  ;;  %7641 = vmatprep.subr.bf16.mxu1 %v9069_v37 }
 0x3e5   :  { %6321 = vmatprep.subr.bf16.mxu0 %v9025_v61 }
 0x3e7   :  { %7642 = vmatpush3.bf16.msra.mxu1 %v9070_v45  ;;  %v6410_v45 = vsub.s32 %v6407_v62, %v9668_v34 }
 0x3e8   :  { %6322 = vmatpush1.bf16.msra.mxu0 %v9023_v17 }
 0x3e9   :  { %6323 = vmatprep.subr.bf16.mxu0 %v9028_v19 }
 0x3ec   :  { %6324 = vmatpush1.bf16.msra.mxu0 %v9026_v20 }
 0x3ed   :  { %6325 = vmatprep.subr.bf16.mxu0 %v9031_v21 }
 0x3f0   :  { %6326 = vmatpush1.bf16.msra.mxu0 %v9029_v3 }
 0x3f1   :  { %6327 = vmatprep.subr.bf16.mxu0 %v9034_v4 }
 0x3f4   :  { %6328 = vmatpush1.bf16.msra.mxu0 %v9032_v1 }
 0x3f5   :  { %6329 = vmatprep.subr.bf16.mxu0 %v9037_v2 }
 0x3f8   :  { %6330 = vmatpush1.bf16.msra.mxu0 %v9035_v5 }
 0x3f9   :  { %6331 = vmatprep.subr.bf16.mxu0 %v9040_v24 }
 0x3fc   :  { %6332 = vmatpush1.bf16.msra.mxu0 %v9038_v25 }
 0x3fd   :  { %6333 = vmatprep.subr.bf16.mxu0 %v9043_v26 }
 0x400   :  { %6334 = vmatpush1.bf16.msra.mxu0 %v9041_v29 }
 0x401   :  { %6335 = vmatprep.subr.bf16.mxu0 %v9046_v30 }
 0x404   :  { %6336 = vmatpush1.bf16.msra.mxu0 %v9044_v31 }
 0x405   :  { %6337 = vmatprep.subr.bf16.mxu0 %v9049_v32 }
 0x408   :  { %6338 = vmatpush1.bf16.msra.mxu0 %v9047_v15 }
 0x409   :  { %6339 = vmatprep.subr.bf16.mxu0 %v9052_v11 }
 0x40c   :  { %6340 = vmatpush1.bf16.msra.mxu0 %v9050_v12 }
 0x40d   :  { %6341 = vmatprep.subr.bf16.mxu0 %v9055_v40 }
 0x410   :  { %6342 = vmatpush1.bf16.msra.mxu0 %v9053_v44 }
 0x411   :  { %6343 = vmatprep.subr.bf16.mxu0 %v9058_v18 }
 0x414   :  { %6344 = vmatpush1.bf16.msra.mxu0 %v9056_v46 }
 0x415   :  { %6345 = vmatprep.subr.bf16.mxu0 %v9061_v47 }
 0x418   :  { %6346 = vmatpush1.bf16.msra.mxu0 %v9059_v48 }
 0x41b   :  { %6348 = vmatmul.mubr.bf16.vlgmr.msra.gmra.mrb[4].mxu0 %v9860_v28 }
 0x46d   :  { %v3032_v49 = vpop.f32.mrb[0].mxu1 }
 0x46e   :  { %v7733_v27 = vadd.f32 %v9724_v41, %v3032_v49  ;;  %v3034_v22 = vpop.f32.mrb[1].mxu1  ;;  %v9071_v41 = vld [vmem:[#allocation16 + $0x60] sm:$0xff]  }
 0x46f   :  { %v7736_v23 = vadd.f32 %v9726_v33, %v3034_v22  ;;  %v3036_v53 = vpop.f32.mrb[2].mxu1  ;;  %7643 = vmatprep.subr.bf16.mxu1 %v9071_v41 }
 0x470   :  { %v3037_v54 = vpop.f32.mrb[3].mxu1  ;;  %7644 = vmatpush3.bf16.msra.mxu1 %v9072_v39 }
 0x471   :  { %7645 = vmatprep.subr.bf16.mxu1 %v9073_v7 }
 0x474   :  { %7646 = vmatpush3.bf16.msra.mxu1 %v9074_v50 }
 0x475   :  { %7647 = vmatprep.subr.bf16.mxu1 %v9075_v52 }
 0x478   :  { %7648 = vmatpush3.bf16.msra.mxu1 %v9076_v8 }
 0x479   :  { %7649 = vmatprep.subr.bf16.mxu1 %v9077_v9 }
 0x47c   :  { %7650 = vmatpush3.bf16.msra.mxu1 %v9078_v10 }
 0x4ad   :  { %v3374_v33 = vpop.f32.mrb[4].mxu1 }
 0x4ae   :  { %v7734_v0 = vadd.f32 %v7733_v27, %v3374_v33  ;;  %v3376_v42 = vpop.f32.mrb[5].mxu1 }
 0x4af   :  { %v7737_v43 = vadd.f32 %v7736_v23, %v3376_v42  ;;  %v3378_v51 = vpop.f32.mrb[6].mxu1 }
 0x4b0   :  { %v3379_v6 = vpop.f32.mrb[7].mxu1  ;;  %v6428_v51 = vsub.s32 1, %v9668_v34 }
 0x4ee   :  { %v6349_v35 = vpop.f32.mrb[4].mxu0 }
 0x4ef   :  { %v7735_v28 = vadd.f32 %v7734_v0, %v6349_v35  ;;  %v6351_v59 = vpop.f32.mrb[5].mxu0  ;;  %v6358_v0 = vld [vmem:[#allocation13] sm:$0x3] }
 0x4f0   :  { %v7738_v13 = vadd.f32 %v7737_v43, %v6351_v59  ;;  %v6353_v63 = vpop.f32.mrb[6].mxu0  ;;  %v9875_v43 = vsub.s32 0, %v9668_v34 }
 0x4f1   :  { %v6361_v14 = vsel %vm6360_vm0, %v7735_v28, 0.0  ;;  %v6354_v16 = vpop.f32.mrb[7].mxu0  ;;  %v6359_v63 = vld [vmem:[#allocation14] sm:$0x3] }
 0x4f2   :  { %v6362_v38 = vrot.slane %v6361_v14, 4  ;;  %v6368_v60 = vsel %vm6360_vm0, %v7738_v13, 0.0 }
 0x4f3   :  { %v6369_v61 = vrot.slane %v6368_v60, 4 }
 0x4f4   :  { %v6363_v17 = vadd.f32 %v6362_v38, %v6361_v14 }
 0x4f5   :  { %v6370_v19 = vadd.f32 %v6369_v61, %v6368_v60 }
 0x4f6   :  { %v6364_v20 = vrot.slane %v6363_v17, 2 }
 0x4f7   :  { %v6371_v21 = vrot.slane %v6370_v19, 2 }
 0x4f8   :  { %v6365_v3 = vadd.f32 %v6364_v20, %v6363_v17 }
 0x4f9   :  { %v6372_v4 = vadd.f32 %v6371_v21, %v6370_v19 }
 0x4fa   :  { %v6366_v1 = vrot.slane %v6365_v3, 1 }
 0x4fb   :  { %v6373_v2 = vrot.slane %v6372_v4, 1 }
 0x4fc   :  { %v6367_v5 = vadd.f32 %v6366_v1, %v6365_v3 }
 0x4fd   :  { %v6374_v24 = vadd.f32 %v6373_v2, %v6372_v4  ;;  %v9414_v2 = vmov 0.0|0.0  }
 0x4fe   :  { %v6376_v25 = vmul.f32 0.25, %v6367_v5  ;;  %7709 = vmatprep.subr.bf16.mxu1 %v9414_v2  ;;  %v6689_v5 = vld [vmem:[%s9961_s11 + $0x10] sm:$0xff] }
 0x4ff   :  { %v6377_v26 = vmul.f32 0.25, %v6374_v24  ;;  %v6690_v24 = vld [vmem:[%s9961_s11 + $0x18] sm:$0xff] }
 0x500   :  { %v6378_v29 = vsub.f32 %v7735_v28, %v6376_v25 }
 0x501   :  { %v6379_v30 = vsub.f32 %v7738_v13, %v6377_v26 }
 0x502   :  { %v6380_v31 = vmul.f32 %v6378_v29, %v6378_v29  ;;  %v6692_v29 = vld [vmem:[%s9961_s11 + $0x28] sm:$0xff] }
 0x503   :  { %v6381_v32 = vmul.f32 %v6379_v30, %v6379_v30 }
 0x504   :  { %v6382_v15 = vsel %vm6360_vm0, %v6380_v31, 0.0  ;;  %v6693_v31 = vld [vmem:[%s9961_s11 + $0x30] sm:$0xff] }
 0x505   :  { %v6383_v11 = vrot.slane %v6382_v15, 4  ;;  %v6389_v12 = vsel %vm6360_vm0, %v6381_v32, 0.0  ;;  %v6694_v32 = vld [vmem:[%s9961_s11 + $0x38] sm:$0xff] }
 0x506   :  { %v6390_v40 = vrot.slane %v6389_v12, 4 }
 0x507   :  { %v6384_v44 = vadd.f32 %v6383_v11, %v6382_v15  ;;  %v7719_v15 = vpack.c.bf16 %v6694_v32, %v6693_v31  ;;  %v6695_v11 = vld [vmem:[%s9961_s11 + $0x40] sm:$0xff] }
 0x508   :  { %v6391_v18 = vadd.f32 %v6390_v40, %v6389_v12  ;;  %v6696_v12 = vld [vmem:[%s9961_s11 + $0x48] sm:$0xff] }
 0x509   :  { %v6385_v46 = vrot.slane %v6384_v44, 2  ;;  %v7722_v40 = vpack.c.bf16 %v6696_v12, %v6695_v11 }
 0x50a   :  { %v6392_v47 = vrot.slane %v6391_v18, 2 }
 0x50b   :  { %v6386_v48 = vadd.f32 %v6385_v46, %v6384_v44  ;;  %v6697_v44 = vld [vmem:[%s9961_s11 + $0x50] sm:$0xff] }
 0x50c   :  { %v6393_v49 = vadd.f32 %v6392_v47, %v6391_v18  ;;  %v6698_v18 = vld [vmem:[%s9961_s11 + $0x58] sm:$0xff]  ;;  %v6699_v47 = vld [vmem:[%s9961_s11 + $0x60] sm:$0xff] }
 0x50d   :  { %v6387_v27 = vrot.slane %v6386_v48, 1  ;;  %v7725_v46 = vpack.c.bf16 %v6698_v18, %v6697_v44 }
 0x50e   :  { %v6394_v22 = vrot.slane %v6393_v49, 1 }
 0x50f   :  { %v6388_v23 = vadd.f32 %v6387_v27, %v6386_v48  ;;  %v6700_v48 = vld [vmem:[%s9961_s11 + $0x68] sm:$0xff]  ;;  %v6701_v27 = vld [vmem:[%s9961_s11 + $0x70] sm:$0xff] }
 0x510   :  { %v6395_v53 = vadd.f32 %v6394_v22, %v6393_v49  ;;  %v7728_v49 = vpack.c.bf16 %v6700_v48, %v6699_v47  ;;  %v6702_v22 = vld [vmem:[%s9961_s11 + $0x78] sm:$0xff] }
 0x511   :  { %v6396_v54 = vmul.f32 0.25, %v6388_v23  ;;  %v7731_v23 = vpack.c.bf16 %v6702_v22, %v6701_v27 }
 0x512   :  { %v6397_v55 = vmul.f32 0.25, %v6395_v53  ;;  %v9416_v53 = vmov 0.0  }
 0x513   :  { %v6398_v36 = vadd.f32 1e-05, %v6396_v54 }
 0x514   :  { %v6399_v56 = vadd.f32 1e-05, %v6397_v55 }
 0x515   :  { %9079 = vrsqrt.f32 %v6398_v36 }
 0x516   :  { %9081 = vrsqrt.f32 %v6399_v56 }
 0x51f   :  { %v9080_v37 = vpop.eup %9079 }
 0x520   :  { %v9082_v41 = vpop.eup %9081 }
 0x521   :  { %v6404_v33 = vcombine.low %v9080_v37, %v9082_v41 }
 0x523   :  { %v6411_v39 = vrot.slane %v6404_v33, %v6410_v45 }
 0x525   :  { %v6418_v42 = vrot.slane %v6411_v39, %v6410_v45 }
 0x527   :  { %v6420_v6 = vmul.f32 %v6418_v42, %v6358_v0 }
 0x529   :  { %v6425_v7 = vrot.slane %v6420_v6, %v9875_v43  ;;  %v6429_v50 = vrot.slane %v6420_v6, %v6428_v51 }
 0x52b   :  { %v6432_v52 = vmul.f32 %v6425_v7, %v6376_v25  ;;  %v6433_v8 = vmul.f32 %v6429_v50, %v6377_v26  ;;  %v6453_v9 = vmul.f32 %v7735_v28, %v6425_v7  ;;  %v6454_v10 = vmul.f32 %v7738_v13, %v6429_v50  ;;  %v6687_v28 = vld [vmem:[%s9961_s11] sm:$0xff]  ;;  %v6688_v13 = vld [vmem:[%s9961_s11 + $0x8] sm:$0xff] }
 0x52c   :  { %v7710_v1 = vpack.c.bf16 %v6688_v13, %v6687_v28  ;;  %v7713_v25 = vpack.c.bf16 %v6690_v24, %v6689_v5  ;;  %v6691_v26 = vld [vmem:[%s9961_s11 + $0x20] sm:$0xff]  ;;  %s9417_s11 = smov [#allocation22]  }
 0x52d   :  { %v6436_v35 = vcombine.low %v6432_v52, %v6433_v8  ;;  %v7716_v30 = vpack.c.bf16 %v6692_v29, %v6691_v26  ;;  %s6801_s15 = sshll.u32 %s9417_s11, 4  ;;  %s6802_s15 = int_to_ptr.vmem [resolvable:$true] %s6801_s15 }
 0x52e   :  { %s9357_s5 = scalar_lea.vmem %s6802_s15, 64  ;;  %p9362_p13 = scmp.lt.s32.totalorder %s6802_s15, %s6802_s15 }
 0x52f   :  { %v6443_v59 = vrot.slane %v6436_v35, %v6410_v45  ;;  %p9358_p12 = scmp.ne.s32.totalorder %s6802_s15, %s9357_s5  ;;  %p9363_p0 = scmp.lt.s32.totalorder %s9357_s5, %s9357_s5 }
 0x531   :  { %v6450_v14 = vrot.slane %v6443_v59, %v6410_v45  ;;  %p9364_p1 = por %p9363_p0, %p9362_p13 }
 0x533   :  { %v6452_v16 = vsub.f32 %v6359_v63, %v6450_v14  ;;  %v6644_v63 = vld [vmem:[#allocation17] sm:$0x1]  ;;  %p9365_p2 = pnand %p9364_p1, %p9358_p12 }
 0x535   :  { %v6459_v38 = vrot.slane %v6452_v16, %v9875_v43  ;;  %v6463_v60 = vrot.slane %v6452_v16, %v6428_v51 }
 0x537   :  { %v6467_v61 = vadd.f32 %v6463_v60, %v6454_v10  ;;  %v6466_v17 = vadd.f32 %v6459_v38, %v6453_v9  ;;  %v6645_v38 = vld [vmem:[#allocation19] sm:$0x1] }
 0x539   :  { %vm6469_vm1 = vcmp.gt.f32.partialorder %v6467_v61, 0.0  ;;  %v6471_v34 = vmul.f32 0.01, %v6467_v61  ;;  %vm6468_vm2 = vcmp.gt.f32.partialorder %v6466_v17, 0.0  ;;  %v6470_v19 = vmul.f32 0.01, %v6466_v17 }
 0x53b   :  { %v6473_v20 = vsel %vm6469_vm1, %v6467_v61, %v6471_v34  ;;  %v6472_v21 = vsel %vm6468_vm2, %v6466_v17, %v6470_v19 }
 0x53c   :  { %v6475_v3 = vpack.c.bf16 %v6473_v20, %v6473_v20  ;;  %v6474_v4 = vpack.c.bf16 %v6472_v21, %v6472_v21 }
 0x53e   :  { %6636 = vmatprep.mubr.bf16.mxu1 %v6475_v3 }
 0x53f   :  { %6637 = vmatmul.mubr.bf16.vlgmr.msra.gmra.mrb[8].mxu1 %v6474_v4  ;;  %v7634_v4 = vld [vmem:[#allocation20] ss:$0 sm:$0xff] }
 0x540   :  { %7711 = vmatpush3.bf16.msra.mxu1 %v7710_v1  ;;  %7706 = vmatprep.mubr.msk.f32.mxu1 %vm9415_vm3, %v9416_v53 }
 0x541   :  { %7712 = vmatprep.subr.bf16.mxu1 %v9414_v2 }
 0x544   :  { %7714 = vmatpush3.bf16.msra.mxu1 %v7713_v25 }
 0x545   :  { %7715 = vmatprep.subr.bf16.mxu1 %v9414_v2 }
 0x548   :  { %7717 = vmatpush3.bf16.msra.mxu1 %v7716_v30 }
 0x549   :  { %7718 = vmatprep.subr.bf16.mxu1 %v9414_v2 }
 0x54c   :  { %7720 = vmatpush3.bf16.msra.mxu1 %v7719_v15 }
 0x54d   :  { %7721 = vmatprep.subr.bf16.mxu1 %v9414_v2 }
 0x550   :  { %7723 = vmatpush3.bf16.msra.mxu1 %v7722_v40 }
 0x551   :  { %7724 = vmatprep.subr.bf16.mxu1 %v9414_v2 }
 0x554   :  { %7726 = vmatpush3.bf16.msra.mxu1 %v7725_v46 }
 0x555   :  { %7727 = vmatprep.subr.bf16.mxu1 %v9414_v2 }
 0x558   :  { %7729 = vmatpush3.bf16.msra.mxu1 %v7728_v49 }
 0x559   :  { %7730 = vmatprep.subr.bf16.mxu1 %v9414_v2 }
 0x55c   :  { %7732 = vmatpush3.bf16.msra.mxu1 %v7731_v23 }
 0x612   :  { %v7651_v54 = vpop.f32.mrb[8].mxu1 }
 0x613   :  { %v7652_v55 = vpop.f32.mrb[9].mxu1 }
 0x614   :  { %v7653_v36 = vadd.f32 %v7652_v55, %v7651_v54  ;;  %v7654_v56 = vpop.f32.mrb[10].mxu1 }
 0x615   :  { %v7655_v57 = vpop.f32.mrb[11].mxu1 }
 0x616   :  { %v6646_v58 = vsel %vm6360_vm0, %v7653_v36, 0.0 }
 0x617   :  { %v6647_v62 = vrot.slane %v6646_v58, 4 }
 0x619   :  { %v6648_v37 = vadd.f32 %v6647_v62, %v6646_v58 }
 0x61b   :  { %v6649_v45 = vrot.slane %v6648_v37, 2 }
 0x61d   :  { %v6650_v41 = vadd.f32 %v6649_v45, %v6648_v37 }
 0x61f   :  { %v6651_v33 = vrot.slane %v6650_v41, 1 }
 0x621   :  { %v6652_v39 = vadd.f32 %v6651_v33, %v6650_v41 }
 0x623   :  { %v6653_v0 = vmul.f32 0.25, %v6652_v39 }
 0x625   :  { %v6654_v42 = vsub.f32 %v7653_v36, %v6653_v0 }
 0x627   :  { %v6655_v51 = vmul.f32 %v6654_v42, %v6654_v42 }
 0x629   :  { %v6656_v6 = vsel %vm6360_vm0, %v6655_v51, 0.0 }
 0x62a   :  { %v6657_v7 = vrot.slane %v6656_v6, 4 }
 0x62c   :  { %v6658_v50 = vadd.f32 %v6657_v7, %v6656_v6 }
 0x62e   :  { %v6659_v52 = vrot.slane %v6658_v50, 2 }
 0x630   :  { %v6660_v8 = vadd.f32 %v6659_v52, %v6658_v50 }
 0x632   :  { %v6661_v9 = vrot.slane %v6660_v8, 1 }
 0x634   :  { %v6662_v10 = vadd.f32 %v6661_v9, %v6660_v8 }
 0x636   :  { %v6663_v35 = vmul.f32 0.25, %v6662_v10 }
 0x638   :  { %v6664_v59 = vadd.f32 1e-05, %v6663_v35 }
 0x63a   :  { %9083 = vrsqrt.f32 %v6664_v59 }
 0x644   :  { %v9084_v14 = vpop.eup %9083 }
 0x645   :  { %v6666_v16 = vmul.f32 %v9084_v14, %v6644_v63 }
 0x647   :  { %v6667_v60 = vmul.f32 %v6666_v16, %v6653_v0  ;;  %v6673_v61 = vrot.slane %v6666_v16, %v9875_v43 }
 0x649   :  { %v6668_v17 = vsub.f32 %v6645_v38, %v6667_v60  ;;  %v6675_v34 = vmul.f32 %v7653_v36, %v6673_v61 }
 0x64b   :  { %v6680_v19 = vrot.slane %v6668_v17, %v9875_v43 }
 0x64d   :  { %v6682_v20 = vadd.f32 %v6680_v19, %v6675_v34 }
 0x64f   :  { %vm6683_vm4 = vcmp.gt.f32.partialorder %v6682_v20, 0.0  ;;  %v6684_v21 = vmul.f32 0.01, %v6682_v20 }
 0x651   :  { %v6685_v3 = vsel %vm6683_vm4, %v6682_v20, %v6684_v21 }
 0x652   :  { %7707 = vmatmul.mubr.f32.vlgmr.msra.gmra.mrb[12].mxu1 %v6685_v3  ;;  %6686 = vst [vmem:[#allocation22] sm:$0xf] %v6685_v3 }
 0x725   :  { %v6776_v28 = vpop.f32.mrb[12].mxu1 }
 0x726   :  { %v6777_v13 = vadd.f32 %v7634_v4, %v6776_v28  ;;  %v7708_v1 = vpop.f32.mrb[13].mxu1 }
 0x728   :  { %v6781_v2 = vsel %vm6780_vm5, %v6777_v13, -inf }
 0x729   :  { %6782 = vmax.xlane.f32.xlu0 %v6781_v2 }
 0x7b6   :  { %v6783_v5 = vpop.xlane.xlu0 %6782 }
 0x7b7   :  { %v6784_v24 = vsub.f32 %v6777_v13, %v6783_v5 }
 0x7b9   :  { %v6785_v25 = vmul.f32 1.442695, %v6784_v24 }
 0x7bb   :  { %9085 = vpow2.f32 %v6785_v25 }
 0x7c5   :  { %v9086_v26 = vpop.eup %9085 }
 0x7c6   :  { %v6787_v43 = vsel %vm6780_vm5, %v9086_v26, 0.0 }
 0x7c7   :  { %6788 = vadd.xlane.f32.xlu0 %v6787_v43 }
 0x7c8   :  { %9368 = shalt.err (!%p9365_p2)
}
 0x7c9   :  { %s9369_s3 = scalar_lea.hbm %s9964_s14, 64 }
 0x7ca   :  { %p9370_p3 = scmp.ne.s32.totalorder %s9964_s14, %s9369_s3  ;;  %p9373_p4 = scmp.lt.u32.totalorder %s9369_s3, %s9964_s14 }
 0x7cc   :  { %p9375_p5 = pnand %p9373_p4, %p9370_p3 }
 0x7ce   :  { %9378 = shalt.err (!%p9375_p5)
}
 0x7cf   :  { %6804 = dma.vmem_to_hbm [thread:$0]  %s6802_s15, 64, %s9964_s14, [#allocation4]  }
 0x854   :  { %v6789_v29 = vpop.xlane.xlu0 %6788 }
 0x855   :  { %9087 = vrcp.f32 %v6789_v29 }
 0x85f   :  { %v9088_v30 = vpop.eup %9087 }
 0x860   :  { %v6791_v31 = vmul.f32 %v9088_v30, %v9086_v26 }
 0x862   :  { %6792 = vst.msk [vmem:[%s9963_s13] sm:$0xf] %vm6780_vm5, %v6791_v31 }
 0x863   :  { %9393 = dma.done.wait [#allocation4], 64  }
 0x864   :  { %9394 = vsyncadd [#allocation4], 4294967232 }
 0x865   :  { %6810 = vsyncpa [#allocation3], 1 }
 0x866   :  { %6811 = vsyncpa [#allocation6], 1 }
 0x867   :  { %6812 = vsyncpa [#allocation9], 1 }
 0x868   :  { %6813 = vsyncpa [#allocation12], 1 }
 0x869   :  { %6814 = vsyncpa [#allocation15], 1 }
 0x86a   :  { %6815 = vsyncpa [#allocation18], 1 }
 0x86b   :  { %6816 = vsyncpa [#allocation21], 1 }
 0x86c   :  { %6817 = vsyncpa [#allocation4], 1 }

</bundles_post_ra>
